<compile_context>
chip_gen: v5e
topology: v5e:2x2
jax: 0.10.0
libtpu: 0.0.40
codegen_flags: <defaults>
</compile_context>

<pallas_src>
import functools
import numpy as np
import jax
import jax.numpy as jnp
from jax import lax
from jax.experimental import pallas as pl
from jax.experimental.pallas import tpu as pltpu


def _round_up(n, m):
    return ((n + m - 1) // m) * m


def _conformal_kernel(x_ref, w_ref, b_ref, u_ref,
                      logits_ref, scores_ref, sizes_ref,
                      acc_ref, st_ref,
                      *, T, tau, kreg, lamda, randomized, allow_zero_sets,
                      num_classes, chunk):
    TM, Cp = acc_ref.shape
    k = pl.program_id(1)

    # ---- K-tiled matmul with resident f32 accumulator ----
    @pl.when(k == 0)
    def _init():
        acc_ref[...] = jnp.zeros_like(acc_ref)

    acc_ref[...] += jnp.dot(x_ref[...], w_ref[...],
                            preferred_element_type=jnp.float32)

    # ---- epilogue: softmax + sort-free RAPS, only on the last K tile ----
    @pl.when(k == pl.num_programs(1) - 1)
    def _epilogue():
        logits = acc_ref[...] + b_ref[...]                       # (TM, Cp) f32
        logits_ref[...] = logits

        # mask of real (non-padded) classes
        valid = lax.broadcasted_iota(jnp.int32, (TM, Cp), 1) < num_classes

        # temperature-scaled softmax over valid classes only (exact recip)
        z = logits * (1.0 / T)
        z = jnp.where(valid, z, -1e30)
        z = z - jnp.max(z, axis=1, keepdims=True)
        e = jnp.where(valid, jnp.exp(z), 0.0)
        s = e * pl.reciprocal(jnp.sum(e, axis=1, keepdims=True))
        scores_ref[...] = s

        # transposed scores in scratch so k-chunks are read as (CH, TM) with
        # a sublane-aligned pl.ds, keeping the big reductions on axis 0
        st_ref[...] = s.T                                        # (Cp, TM)

        # sort-free rank / cumulative-sorted-score via chunked pairwise
        # compare-reduce:
        #   rank[b, j] = #{k : s_k beats s_j}             (strict, index ties)
        #   cum [b, j] = sum of scores ranked <= rank of j (inclusive)
        # padded classes have score 0 and index >= num_classes so they never
        # "beat" a real class and contribute 0 to cum -> no k-mask needed.
        # TODO(synk): for num_classes >= ~512 replace this O(C^2) pass with a
        # ~24-step bisection on a score threshold (two O(C) reductions/step).
        CH = chunk
        n_chunks = Cp // CH
        s_j = s[None, :, :]                                      # (1, TM, Cp)
        kbase = lax.broadcasted_iota(jnp.int32, (CH, Cp), 0)     # 2-D masks
        jidx = lax.broadcasted_iota(jnp.int32, (CH, Cp), 1)

        def body(c, carry):
            rank_acc, cum_acc = carry
            off = pl.multiple_of(c * CH, CH)
            sk = st_ref[pl.ds(off, CH), :]                       # (CH, TM)
            sk3 = sk[:, :, None]                                 # (CH, TM, 1)
            gt = sk3 > s_j                                       # (CH, TM, Cp)
            eq = sk3 == s_j
            kidx = kbase + off
            lt = (kidx < jidx)[:, None, :]                       # (CH, 1, Cp)
            le = (kidx <= jidx)[:, None, :]
            rank_acc = rank_acc + jnp.sum(
                (gt | (eq & lt)).astype(jnp.int32), axis=0)
            cum_acc = cum_acc + jnp.sum(
                jnp.where(gt | (eq & le), sk3, 0.0), axis=0)
            return rank_acc, cum_acc

        rank, cum = lax.fori_loop(
            0, n_chunks, body,
            (jnp.zeros((TM, Cp), jnp.int32), jnp.zeros((TM, Cp), jnp.float32)))

        # penalties_cumsum at rank r = lamda * max(0, r + 1 - kreg)
        pc = lamda * jnp.maximum(rank + 1 - kreg, 0).astype(jnp.float32)

        # sizes_base = (cumsum + penalties_cumsum <= tau).sum() + 1, capped
        ind = valid & (cum + pc <= tau)
        sizes_base = jnp.sum(ind.astype(jnp.int32), axis=1, keepdims=True) + 1
        sizes_base = jnp.minimum(sizes_base, num_classes)        # (TM, 1)

        if randomized and tau != 1.0:
            idx = jnp.maximum(sizes_base - 1, 0)                 # (TM, 1)
            sel = (rank == idx) & valid                          # (TM, Cp)
            ordered_at = jnp.sum(jnp.where(sel, s, 0.0), axis=1, keepdims=True)
            cumsum_at = jnp.sum(jnp.where(sel, cum, 0.0), axis=1, keepdims=True)
            pc_at = lamda * jnp.maximum(idx + 1 - kreg, 0).astype(jnp.float32)
            inv_ord = pl.reciprocal(jnp.maximum(ordered_at, 1e-30))
            V = (tau - (cumsum_at - ordered_at) - pc_at) * inv_ord
            sizes = sizes_base - (u_ref[...] >= V).astype(jnp.int32)  # (TM,128)
        else:
            sizes = jnp.broadcast_to(sizes_base, sizes_ref.shape)

        if tau == 1.0:
            sizes = jnp.full(sizes_ref.shape, num_classes, jnp.int32)
        if not allow_zero_sets:
            sizes = jnp.maximum(sizes, 1)
        sizes_ref[...] = sizes


def conformal_forward(x, W, b, u, *, T, Qhat, kreg, lamda,
                      randomized=True, allow_zero_sets=False,
                      tm=None, tk=None):
    """Fused linear head + temperature softmax + RAPS set sizes."""
    B = x.shape[0]
    D = int(np.prod(x.shape[1:]))
    C = W.shape[1]

    # lane-dense / sublane-aligned padded shapes
    Cp = _round_up(C, 128)
    Bp8 = _round_up(B, 8)
    if tm is None:
        # feed the 256-wide MXUs on v6e/v7x; keep >=2 batch tiles when
        # possible so the "parallel" batch axis can span both v7x TensorCores
        TM = min(256, Bp8)
        if Bp8 // TM < 2 and Bp8 >= 16:
            TM = _round_up(Bp8 // 2, 8)
    else:
        TM = min(_round_up(tm, 8), Bp8)
    TM = max(TM, 8)
    Bp = _round_up(B, TM)

    Dp128 = _round_up(D, 128)
    TK = min(2048, Dp128) if tk is None else min(_round_up(tk, 128), Dp128)
    Dp = _round_up(D, TK)
    SW = 128  # sizes / u lane width (avoid lane-1 VMEM refs)

    # epilogue chunk: bound (CH, TM, Cp) temporaries (~4 live) to ~4 MiB
    CH = 128
    while CH > 8 and CH * TM * Cp * 16 > 4 * 1024 * 1024:
        CH //= 2
    CH = min(CH, Cp)

    # single cast + pad (no extra f32 HBM pass in the wrapper)
    x_p = jnp.pad(jnp.reshape(jnp.asarray(x), (B, D)).astype(jnp.bfloat16),
                  ((0, Bp - B), (0, Dp - D)))
    W_p = jnp.pad(jnp.asarray(W).astype(jnp.bfloat16),
                  ((0, Dp - D), (0, Cp - C)))
    b_p = jnp.pad(jnp.asarray(b, jnp.float32).reshape(1, C),
                  ((0, 0), (0, Cp - C)))
    u_p = jnp.broadcast_to(
        jnp.pad(jnp.asarray(u, jnp.float32).reshape(B, 1),
                ((0, Bp - B), (0, 0))),
        (Bp, SW))

    kernel = functools.partial(
        _conformal_kernel, T=float(T), tau=float(Qhat), kreg=int(kreg),
        lamda=float(lamda), randomized=bool(randomized),
        allow_zero_sets=bool(allow_zero_sets), num_classes=C, chunk=CH)

    grid = (Bp // TM, Dp // TK)
    cost = pl.CostEstimate(
        flops=2 * Bp * Dp * Cp + 4 * Bp * Cp * Cp,
        transcendentals=Bp * Cp,
        bytes_accessed=(Bp * Dp * 2 + (Bp // TM) * Dp * Cp * 2 + Cp * 4
                        + Bp * SW * 4 + 2 * Bp * Cp * 4 + Bp * SW * 4))

    logits_p, scores_p, sizes_p = pl.pallas_call(
        kernel,
        out_shape=(jax.ShapeDtypeStruct((Bp, Cp), jnp.float32),
                   jax.ShapeDtypeStruct((Bp, Cp), jnp.float32),
                   jax.ShapeDtypeStruct((Bp, SW), jnp.int32)),
        grid_spec=pltpu.PrefetchScalarGridSpec(
            num_scalar_prefetch=0,
            grid=grid,
            in_specs=[
                pl.BlockSpec((TM, TK), lambda i, k: (i, k)),   # x tile
                pl.BlockSpec((TK, Cp), lambda i, k: (k, 0)),   # W tile
                pl.BlockSpec((1, Cp), lambda i, k: (0, 0)),    # bias
                pl.BlockSpec((TM, SW), lambda i, k: (i, 0)),   # u (broadcast)
            ],
            out_specs=(
                pl.BlockSpec((TM, Cp), lambda i, k: (i, 0)),   # logits
                pl.BlockSpec((TM, Cp), lambda i, k: (i, 0)),   # scores
                pl.BlockSpec((TM, SW), lambda i, k: (i, 0)),   # sizes slab
            ),
            scratch_shapes=[pltpu.VMEM((TM, Cp), jnp.float32),   # accumulator
                            pltpu.VMEM((Cp, TM), jnp.float32)],  # scores^T
        ),
        compiler_params=pltpu.CompilerParams(
            dimension_semantics=("parallel", "arbitrary"),
            # sized for v7x's 64 MiB/TC physical VMEM (fits v5e/v6e too)
            vmem_limit_bytes=48 * 1024 * 1024),
        cost_estimate=cost,
    )(x_p, W_p, b_p, u_p)

    return logits_p[:B, :C], scores_p[:B, :C], sizes_p[:B, 0]


def build_prediction_sets(scores, sizes):
    # TODO(synk): ragged prediction-set construction (stable argsort + per-row
    # variable-length slicing) has no clean fixed-shape Pallas equivalent;
    # done in numpy glue on the host.
    scores_np = np.asarray(scores)
    sizes_np = np.asarray(sizes).reshape(-1)
    I = np.argsort(-scores_np, axis=1, kind="stable")  # descending, stable
    return [I[i, :int(sizes_np[i])] for i in range(scores_np.shape[0])]


# ----------------- init-time (host) conformal calibration -------------------
def _softmax_np(x, axis=1):
    x = x - x.max(axis=axis, keepdims=True)
    e = np.exp(x)
    return e / e.sum(axis=axis, keepdims=True)


def calibrate_qhat(calib_logits, calib_targets, T, alpha):
    # Deterministic (non-randomized) variant of conformal_calibration_logits:
    # tau_i = cumulative sorted score up to the true label's rank.
    scores = _softmax_np(calib_logits / T, axis=1)
    order = np.argsort(-scores, axis=1, kind="stable")
    ordered = np.take_along_axis(scores, order, axis=1)
    cumsum = np.cumsum(ordered, axis=1)
    E = np.zeros(scores.shape[0])
    for i in range(scores.shape[0]):
        pos = int(np.where(order[i] == calib_targets[i])[0][0])
        E[i] = cumsum[i, pos]
    return float(np.quantile(E, 1 - alpha, method="higher"))


if __name__ == "__main__":
    key = jax.random.PRNGKey(0)
    B, Cin, H, Wd = 2, 4, 16, 16
    num_classes = 16
    D = Cin * H * Wd

    kx, kw, kb, ku, kc, kt = jax.random.split(key, 6)
    x = jax.random.normal(kx, (B, Cin, H, Wd), jnp.float32)        # NCHW
    Wp = jax.random.normal(kw, (D, num_classes), jnp.float32) * 0.05
    bp = jax.random.normal(kb, (num_classes,), jnp.float32) * 0.01
    u = jax.random.uniform(ku, (B,), jnp.float32)   # replaces np.random in gcq

    # Deterministic init-time statistics (ConformalModel.__init__ on host)
    T = 1.3        # platt-scaled temperature (deterministic synthetic value)
    alpha = 0.1
    kreg = 5
    lamda = 0.01
    calib_logits = np.asarray(jax.random.normal(kc, (64, num_classes), jnp.float32))
    calib_targets = np.asarray(jax.random.randint(kt, (64,), 0, num_classes))
    Qhat = calibrate_qhat(calib_logits, calib_targets, T, alpha)

    logits, scores, sizes = conformal_forward(
        x, Wp, bp, u, T=T, Qhat=Qhat, kreg=kreg, lamda=lamda,
        randomized=True, allow_zero_sets=False)
    jax.block_until_ready((logits, scores, sizes))

    # light numerical sanity checks (loose tolerance: bf16 matmul operands)
    logits_ref = (np.asarray(x, np.float32).reshape(B, -1)
                  @ np.asarray(Wp, np.float32) + np.asarray(bp, np.float32))
    assert np.allclose(np.asarray(logits), logits_ref, rtol=5e-2, atol=5e-2)
    assert np.allclose(np.asarray(scores).sum(axis=1), 1.0, atol=5e-3)

    S = build_prediction_sets(scores, sizes)
    assert len(S) == B and all(1 <= len(s) <= num_classes for s in S)
    assert logits.shape == (B, num_classes) and scores.shape == (B, num_classes)
    print("KERNEL_OK")
</pallas_src>

<mosaic_0001>
module attributes {stable_mosaic.version = 11 : i64} {
  func.func @_conformal_kernel(%arg0: i32, %arg1: i32, %arg2: memref<8x1024xbf16, #tpu.memory_space<vmem>>, %arg3: memref<1024x128xbf16, #tpu.memory_space<vmem>>, %arg4: memref<1x128xf32, #tpu.memory_space<vmem>>, %arg5: memref<8x128xf32, #tpu.memory_space<vmem>>, %arg6: memref<8x128xf32, #tpu.memory_space<vmem>>, %arg7: memref<8x128xf32, #tpu.memory_space<vmem>>, %arg8: memref<8x128xi32, #tpu.memory_space<vmem>>, %arg9: memref<8x128xf32, #tpu.memory_space<vmem>>, %arg10: memref<128x8xf32, #tpu.memory_space<vmem>>) attributes {dimension_semantics = [#tpu.dimension_semantics<parallel>, #tpu.dimension_semantics<arbitrary>], iteration_bounds = array<i64: 1, 1>, scalar_prefetch = 0 : i64, scratch_operands = 2 : i64, tpu.core_type = #tpu.core_type<tc>, window_params = [{transform_indices = @transform_0, window_bounds = array<i64: 8, 1024>}, {transform_indices = @transform_1, window_bounds = array<i64: 1024, 128>}, {pipeline_mode = #tpu.pipeline_mode<synchronous>, transform_indices = @transform_2, window_bounds = array<i64: 1, 128>}, {transform_indices = @transform_3, window_bounds = array<i64: 8, 128>}, {transform_indices = @transform_4, window_bounds = array<i64: 8, 128>}, {transform_indices = @transform_5, window_bounds = array<i64: 8, 128>}, {transform_indices = @transform_6, window_bounds = array<i64: 8, 128>}]} {
    %c0_i32 = arith.constant 0 : i32
    %0 = arith.cmpi eq, %arg1, %c0_i32 : i32
    %1 = arith.extui %0 : i1 to i32
    %c0_i32_0 = arith.constant 0 : i32
    %2 = arith.cmpi ne, %1, %c0_i32_0 : i32
    scf.if %2 {
      %cst_10 = arith.constant 0.000000e+00 : f32
      %12 = vector.broadcast %cst_10 : f32 to vector<8x128xf32>
      %c0_11 = arith.constant 0 : index
      %c0_12 = arith.constant 0 : index
      %13 = vector.load %arg9[%c0_11, %c0_12] : memref<8x128xf32, #tpu.memory_space<vmem>>, vector<8x128xf32>
      tpu.vector_store %arg9[%c0_11, %c0_12], %12 {strides = array<i32>} : memref<8x128xf32, #tpu.memory_space<vmem>>, vector<8x128xf32>,
    } else {
    }
    %c0 = arith.constant 0 : index
    %c0_1 = arith.constant 0 : index
    %3 = vector.load %arg9[%c0, %c0_1] : memref<8x128xf32, #tpu.memory_space<vmem>>, vector<8x128xf32>
    %c0_2 = arith.constant 0 : index
    %c0_3 = arith.constant 0 : index
    %4 = vector.load %arg2[%c0_2, %c0_3] : memref<8x1024xbf16, #tpu.memory_space<vmem>>, vector<8x1024xbf16>
    %c0_4 = arith.constant 0 : index
    %c0_5 = arith.constant 0 : index
    %5 = vector.load %arg3[%c0_4, %c0_5] : memref<1024x128xbf16, #tpu.memory_space<vmem>>, vector<1024x128xbf16>
    %cst = arith.constant dense<0.000000e+00> : vector<8x128xf32>
    %6 = tpu.matmul %4, %5, %cst {dimension_numbers = #tpu.dot_dimension_numbers<[1], [0], [0], [1], [0, 0, 1, 1], [], []>} : vector<8x1024xbf16>, vector<1024x128xbf16>, vector<8x128xf32> -> vector<8x128xf32>
    %7 = arith.addf %3, %6 : vector<8x128xf32>
    %c0_6 = arith.constant 0 : index
    %c0_7 = arith.constant 0 : index
    %8 = vector.load %arg9[%c0_6, %c0_7] : memref<8x128xf32, #tpu.memory_space<vmem>>, vector<8x128xf32>
    tpu.vector_store %arg9[%c0_6, %c0_7], %7 {strides = array<i32>} : memref<8x128xf32, #tpu.memory_space<vmem>>, vector<8x128xf32>,
    %c0_i32_8 = arith.constant 0 : i32
    %9 = arith.cmpi eq, %arg1, %c0_i32_8 : i32
    %10 = arith.extui %9 : i1 to i32
    %c0_i32_9 = arith.constant 0 : i32
    %11 = arith.cmpi ne, %10, %c0_i32_9 : i32
    scf.if %11 {
      %c0_10 = arith.constant 0 : index
      %c0_11 = arith.constant 0 : index
      %12 = vector.load %arg9[%c0_10, %c0_11] : memref<8x128xf32, #tpu.memory_space<vmem>>, vector<8x128xf32>
      %c0_12 = arith.constant 0 : index
      %c0_13 = arith.constant 0 : index
      %13 = vector.load %arg4[%c0_12, %c0_13] : memref<1x128xf32, #tpu.memory_space<vmem>>, vector<1x128xf32>
      %14 = vector.broadcast %13 : vector<1x128xf32> to vector<8x128xf32>
      %15 = arith.addf %12, %14 : vector<8x128xf32>
      %c0_14 = arith.constant 0 : index
      %c0_15 = arith.constant 0 : index
      %16 = vector.load %arg6[%c0_14, %c0_15] : memref<8x128xf32, #tpu.memory_space<vmem>>, vector<8x128xf32>
      tpu.vector_store %arg6[%c0_14, %c0_15], %15 {strides = array<i32>} : memref<8x128xf32, #tpu.memory_space<vmem>>, vector<8x128xf32>,
      %17 = tpu.iota {dimensions = array<i32: 1>} : vector<8x128xi32>
      %c16_i32 = arith.constant 16 : i32
      %18 = vector.broadcast %c16_i32 : i32 to vector<8x128xi32>
      %19 = arith.cmpi slt, %17, %18 : vector<8x128xi32>
      %cst_16 = arith.constant 0.769230782 : f32
      %20 = vector.broadcast %cst_16 : f32 to vector<8x128xf32>
      %21 = arith.mulf %15, %20 : vector<8x128xf32>
      %cst_17 = arith.constant -1.000000e+30 : f32
      %22 = vector.broadcast %cst_17 : f32 to vector<8x128xf32>
      %23 = arith.select %19, %21, %22 : vector<8x128xi1>, vector<8x128xf32>
      %cst_18 = arith.constant dense<0xFF800000> : vector<8xf32>
      %24 = vector.multi_reduction <maximumf>, %23, %cst_18 [1] : vector<8x128xf32> to vector<8xf32>
      %25 = vector.shape_cast %24 : vector<8xf32> to vector<8x1xf32>
      %26 = vector.broadcast %25 : vector<8x1xf32> to vector<8x128xf32>
      %27 = arith.subf %23, %26 : vector<8x128xf32>
      %28 = math.exp %27 : vector<8x128xf32>
      %cst_19 = arith.constant 0.000000e+00 : f32
      %29 = vector.broadcast %cst_19 : f32 to vector<8x128xf32>
      %30 = arith.select %19, %28, %29 : vector<8x128xi1>, vector<8x128xf32>
      %cst_20 = arith.constant dense<0.000000e+00> : vector<8xf32>
      %31 = vector.multi_reduction <add>, %30, %cst_20 [1] : vector<8x128xf32> to vector<8xf32>
      %32 = vector.shape_cast %31 : vector<8xf32> to vector<8x1xf32>
      %33 = tpu.reciprocal %32 : vector<8x1xf32> -> vector<8x1xf32>
      %34 = vector.broadcast %33 : vector<8x1xf32> to vector<8x128xf32>
      %35 = arith.mulf %30, %34 : vector<8x128xf32>
      %c0_21 = arith.constant 0 : index
      %c0_22 = arith.constant 0 : index
      %36 = vector.load %arg7[%c0_21, %c0_22] : memref<8x128xf32, #tpu.memory_space<vmem>>, vector<8x128xf32>
      tpu.vector_store %arg7[%c0_21, %c0_22], %35 {strides = array<i32>} : memref<8x128xf32, #tpu.memory_space<vmem>>, vector<8x128xf32>,
      %37 = tpu.transpose %35, [1, 0] : vector<8x128xf32> -> vector<128x8xf32>
      %c0_23 = arith.constant 0 : index
      %c0_24 = arith.constant 0 : index
      %38 = vector.load %arg10[%c0_23, %c0_24] : memref<128x8xf32, #tpu.memory_space<vmem>>, vector<128x8xf32>
      tpu.vector_store %arg10[%c0_23, %c0_24], %37 {strides = array<i32>} : memref<128x8xf32, #tpu.memory_space<vmem>>, vector<128x8xf32>,
      %39 = vector.shape_cast %35 : vector<8x128xf32> to vector<1x8x128xf32>
      %40 = tpu.iota {dimensions = array<i32: 0>} : vector<128x128xi32>
      %41 = tpu.iota {dimensions = array<i32: 1>} : vector<128x128xi32>
      %c0_i32_25 = arith.constant 0 : i32
      %42 = vector.broadcast %c0_i32_25 : i32 to vector<8x128xi32>
      %cst_26 = arith.constant 0.000000e+00 : f32
      %43 = vector.broadcast %cst_26 : f32 to vector<8x128xf32>
      %c0_i32_27 = arith.constant 0 : i32
      %c128_i32 = arith.constant 128 : i32
      %44 = arith.muli %c0_i32_27, %c128_i32 : i32
      %45 = tpu.assume_multiple %44, 128 : i32
      %46 = arith.index_cast %45 : i32 to index
      %c0_28 = arith.constant 0 : index
      %47 = vector.load %arg10[%46, %c0_28] : memref<128x8xf32, #tpu.memory_space<vmem>>, vector<128x8xf32>
      %48 = vector.shape_cast %47 : vector<128x8xf32> to vector<128x8x1xf32>
      %49 = vector.broadcast %48 : vector<128x8x1xf32> to vector<128x8x128xf32>
      %50 = vector.broadcast %39 : vector<1x8x128xf32> to vector<128x8x128xf32>
      %51 = arith.cmpf ogt, %49, %50 : vector<128x8x128xf32>
      %52 = vector.broadcast %48 : vector<128x8x1xf32> to vector<128x8x128xf32>
      %53 = vector.broadcast %39 : vector<1x8x128xf32> to vector<128x8x128xf32>
      %54 = arith.cmpf oeq, %52, %53 : vector<128x8x128xf32>
      %55 = vector.broadcast %45 : i32 to vector<128x128xi32>
      %56 = arith.addi %40, %55 : vector<128x128xi32>
      %57 = arith.cmpi slt, %56, %41 : vector<128x128xi32>
      %58 = vector.shape_cast %57 : vector<128x128xi1> to vector<128x1x128xi1>
      %59 = arith.cmpi sle, %56, %41 : vector<128x128xi32>
      %60 = vector.shape_cast %59 : vector<128x128xi1> to vector<128x1x128xi1>
      %61 = vector.broadcast %58 : vector<128x1x128xi1> to vector<128x8x128xi1>
      %62 = arith.andi %54, %61 : vector<128x8x128xi1>
      %63 = arith.ori %51, %62 : vector<128x8x128xi1>
      %64 = arith.extui %63 : vector<128x8x128xi1> to vector<128x8x128xi32>
      %cst_29 = arith.constant dense<0> : vector<8x128xi32>
      %65 = vector.multi_reduction <add>, %64, %cst_29 [0] : vector<128x8x128xi32> to vector<8x128xi32>
      %66 = arith.addi %42, %65 : vector<8x128xi32>
      %67 = vector.broadcast %60 : vector<128x1x128xi1> to vector<128x8x128xi1>
      %68 = arith.andi %54, %67 : vector<128x8x128xi1>
      %69 = arith.ori %51, %68 : vector<128x8x128xi1>
      %cst_30 = arith.constant 0.000000e+00 : f32
      %70 = vector.shape_cast %48 : vector<128x8x1xf32> to vector<128x8x1xf32>
      %71 = vector.broadcast %70 : vector<128x8x1xf32> to vector<128x8x128xf32>
      %72 = vector.broadcast %cst_30 : f32 to vector<128x8x128xf32>
      %73 = arith.select %69, %71, %72 : vector<128x8x128xi1>, vector<128x8x128xf32>
      %cst_31 = arith.constant dense<0.000000e+00> : vector<8x128xf32>
      %74 = vector.multi_reduction <add>, %73, %cst_31 [0] : vector<128x8x128xf32> to vector<8x128xf32>
      %75 = arith.addf %43, %74 : vector<8x128xf32>
      %c1_i32 = arith.constant 1 : i32
      %c1_i32_32 = arith.constant 1 : i32
      %76 = vector.broadcast %c1_i32_32 : i32 to vector<8x128xi32>
      %77 = arith.addi %66, %76 : vector<8x128xi32>
      %c5_i32 = arith.constant 5 : i32
      %78 = vector.broadcast %c5_i32 : i32 to vector<8x128xi32>
      %79 = arith.subi %77, %78 : vector<8x128xi32>
      %c0_i32_33 = arith.constant 0 : i32
      %80 = vector.broadcast %c0_i32_33 : i32 to vector<8x128xi32>
      %81 = arith.maxsi %79, %80 : vector<8x128xi32>
      %82 = arith.sitofp %81 : vector<8x128xi32> to vector<8x128xf32>
      %cst_34 = arith.constant 0.00999999977 : f32
      %83 = vector.broadcast %cst_34 : f32 to vector<8x128xf32>
      %84 = arith.mulf %83, %82 : vector<8x128xf32>
      %85 = arith.addf %75, %84 : vector<8x128xf32>
      %cst_35 = arith.constant 0.97995156 : f32
      %86 = vector.broadcast %cst_35 : f32 to vector<8x128xf32>
      %87 = arith.cmpf ole, %85, %86 : vector<8x128xf32>
      %88 = arith.andi %19, %87 : vector<8x128xi1>
      %89 = arith.extui %88 : vector<8x128xi1> to vector<8x128xi32>
      %cst_36 = arith.constant dense<0> : vector<8xi32>
      %90 = vector.multi_reduction <add>, %89, %cst_36 [1] : vector<8x128xi32> to vector<8xi32>
      %91 = vector.shape_cast %90 : vector<8xi32> to vector<8x1xi32>
      %c1_i32_37 = arith.constant 1 : i32
      %92 = vector.broadcast %c1_i32_37 : i32 to vector<8x1xi32>
      %93 = arith.addi %91, %92 : vector<8x1xi32>
      %c16_i32_38 = arith.constant 16 : i32
      %94 = vector.broadcast %c16_i32_38 : i32 to vector<8x1xi32>
      %95 = arith.minsi %93, %94 : vector<8x1xi32>
      %c1_i32_39 = arith.constant 1 : i32
      %96 = vector.broadcast %c1_i32_39 : i32 to vector<8x1xi32>
      %97 = arith.subi %95, %96 : vector<8x1xi32>
      %c0_i32_40 = arith.constant 0 : i32
      %98 = vector.broadcast %c0_i32_40 : i32 to vector<8x1xi32>
      %99 = arith.maxsi %97, %98 : vector<8x1xi32>
      %100 = vector.broadcast %99 : vector<8x1xi32> to vector<8x128xi32>
      %101 = arith.cmpi eq, %66, %100 : vector<8x128xi32>
      %102 = arith.andi %101, %19 : vector<8x128xi1>
      %cst_41 = arith.constant 0.000000e+00 : f32
      %103 = vector.broadcast %cst_41 : f32 to vector<8x128xf32>
      %104 = arith.select %102, %35, %103 : vector<8x128xi1>, vector<8x128xf32>
      %cst_42 = arith.constant dense<0.000000e+00> : vector<8xf32>
      %105 = vector.multi_reduction <add>, %104, %cst_42 [1] : vector<8x128xf32> to vector<8xf32>
      %106 = vector.shape_cast %105 : vector<8xf32> to vector<8x1xf32>
      %cst_43 = arith.constant 0.000000e+00 : f32
      %107 = vector.broadcast %cst_43 : f32 to vector<8x128xf32>
      %108 = arith.select %102, %75, %107 : vector<8x128xi1>, vector<8x128xf32>
      %cst_44 = arith.constant dense<0.000000e+00> : vector<8xf32>
      %109 = vector.multi_reduction <add>, %108, %cst_44 [1] : vector<8x128xf32> to vector<8xf32>
      %110 = vector.shape_cast %109 : vector<8xf32> to vector<8x1xf32>
      %c1_i32_45 = arith.constant 1 : i32
      %111 = vector.broadcast %c1_i32_45 : i32 to vector<8x1xi32>
      %112 = arith.addi %99, %111 : vector<8x1xi32>
      %c5_i32_46 = arith.constant 5 : i32
      %113 = vector.broadcast %c5_i32_46 : i32 to vector<8x1xi32>
      %114 = arith.subi %112, %113 : vector<8x1xi32>
      %c0_i32_47 = arith.constant 0 : i32
      %115 = vector.broadcast %c0_i32_47 : i32 to vector<8x1xi32>
      %116 = arith.maxsi %114, %115 : vector<8x1xi32>
      %117 = arith.sitofp %116 : vector<8x1xi32> to vector<8x1xf32>
      %cst_48 = arith.constant 0.00999999977 : f32
      %118 = vector.broadcast %cst_48 : f32 to vector<8x1xf32>
      %119 = arith.mulf %118, %117 : vector<8x1xf32>
      %cst_49 = arith.constant 1.000000e-30 : f32
      %120 = vector.broadcast %cst_49 : f32 to vector<8x1xf32>
      %121 = arith.maximumf %106, %120 : vector<8x1xf32>
      %122 = tpu.reciprocal %121 : vector<8x1xf32> -> vector<8x1xf32>
      %123 = arith.subf %110, %106 : vector<8x1xf32>
      %cst_50 = arith.constant 0.97995156 : f32
      %124 = vector.broadcast %cst_50 : f32 to vector<8x1xf32>
      %125 = arith.subf %124, %123 : vector<8x1xf32>
      %126 = arith.subf %125, %119 : vector<8x1xf32>
      %127 = arith.mulf %126, %122 : vector<8x1xf32>
      %c0_51 = arith.constant 0 : index
      %c0_52 = arith.constant 0 : index
      %128 = vector.load %arg5[%c0_51, %c0_52] : memref<8x128xf32, #tpu.memory_space<vmem>>, vector<8x128xf32>
      %129 = vector.broadcast %127 : vector<8x1xf32> to vector<8x128xf32>
      %130 = arith.cmpf oge, %128, %129 : vector<8x128xf32>
      %131 = arith.extui %130 : vector<8x128xi1> to vector<8x128xi32>
      %132 = vector.broadcast %95 : vector<8x1xi32> to vector<8x128xi32>
      %133 = arith.subi %132, %131 : vector<8x128xi32>
      %c1_i32_53 = arith.constant 1 : i32
      %134 = vector.broadcast %c1_i32_53 : i32 to vector<8x128xi32>
      %135 = arith.maxsi %133, %134 : vector<8x128xi32>
      %c0_54 = arith.constant 0 : index
      %c0_55 = arith.constant 0 : index
      %136 = vector.load %arg8[%c0_54, %c0_55] : memref<8x128xi32, #tpu.memory_space<vmem>>, vector<8x128xi32>
      tpu.vector_store %arg8[%c0_54, %c0_55], %135 {strides = array<i32>} : memref<8x128xi32, #tpu.memory_space<vmem>>, vector<8x128xi32>,
    } else {
    }
    return
  }
  func.func @transform_0(%arg0: i32, %arg1: i32) -> (i32, i32) {
    %c0_i32 = arith.constant 0 : i32
    return %arg0, %arg1 : i32, i32
  }
  func.func @transform_1(%arg0: i32, %arg1: i32) -> (i32, i32) {
    %c0_i32 = arith.constant 0 : i32
    %c0_i32_0 = arith.constant 0 : i32
    return %arg1, %c0_i32 : i32, i32
  }
  func.func @transform_2(%arg0: i32, %arg1: i32) -> (i32, i32) {
    %c0_i32 = arith.constant 0 : i32
    %c0_i32_0 = arith.constant 0 : i32
    %c0_i32_1 = arith.constant 0 : i32
    return %c0_i32, %c0_i32_0 : i32, i32
  }
  func.func @transform_3(%arg0: i32, %arg1: i32) -> (i32, i32) {
    %c0_i32 = arith.constant 0 : i32
    %c0_i32_0 = arith.constant 0 : i32
    return %arg0, %c0_i32 : i32, i32
  }
  func.func @transform_4(%arg0: i32, %arg1: i32) -> (i32, i32) {
    %c0_i32 = arith.constant 0 : i32
    %c0_i32_0 = arith.constant 0 : i32
    return %arg0, %c0_i32 : i32, i32
  }
  func.func @transform_5(%arg0: i32, %arg1: i32) -> (i32, i32) {
    %c0_i32 = arith.constant 0 : i32
    %c0_i32_0 = arith.constant 0 : i32
    return %arg0, %c0_i32 : i32, i32
  }
  func.func @transform_6(%arg0: i32, %arg1: i32) -> (i32, i32) {
    %c0_i32 = arith.constant 0 : i32
    %c0_i32_0 = arith.constant 0 : i32
    return %arg0, %c0_i32 : i32, i32
  }
}

</mosaic_0001>

<bundles_post_ra>
// kernel: tpu_custom_call.1
= control target key start
LH: loop header
LB: loop body
LE: loop exit
PB: predicated region body
PF: predicated region fallthrough
CT: control target
= control target key end

     0   :  { %12 = vsyncpa [#allocation5], 0  ;;  %s11686_s0 = inlined_call_operand.hbm [shape: bf16[8,1024], index: 0, kind: input, shape index: {}]   ;;  %s11687_s1 = inlined_call_operand.hbm [shape: bf16[1024,128], index: 1, kind: input, shape index: {}]   ;;  %s11688_s2 = inlined_call_operand.vmem [shape: f32[1,128], index: 2, kind: input, shape index: {}]   ;;  %s11689_s3 = inlined_call_operand.hbm [shape: f32[8,128], index: 3, kind: input, shape index: {}]   ;;  %s11690_s4 = inlined_call_operand.hbm [shape: f32[8,128], index: 4, kind: output, shape index: {0}]   ;;  %s11691_s5 = inlined_call_operand.hbm [shape: f32[8,128], index: 5, kind: output, shape index: {1}]   ;;  %s11692_s6 = inlined_call_operand.hbm [shape: s32[8,128], index: 6, kind: output, shape index: {2}]  }
   0x1   :  { %13 = vsyncpa [#allocation8], 0 }
   0x2   :  { %14 = vsyncpa [#allocation6], 0  ;;  %s31_s23 = sshll.u32 %s11687_s1, 4  ;;  %s32_s23 = int_to_ptr.hbm [resolvable:$true] %s31_s23 }
   0x3   :  { %15 = vsyncpa [#allocation12], 0  ;;  %s4914_s24 = smov [#allocation7]   ;;  %s21_s28 = sshll.u32 %s11686_s0, 4  ;;  %s22_s28 = int_to_ptr.hbm [resolvable:$true] %s21_s28 }
   0x4   :  { %s33_s25 = sshll.u32 %s4914_s24, 4  ;;  %s4915_s29 = smov 64   ;;  %s34_s25 = int_to_ptr.vmem [resolvable:$true] %s33_s25 }
   0x5   :  { %s4916_s30 = smov 4   ;;  %s4917_s7 = smov [#allocation4]  }
   0x6   :  { %39 = dma.hbm_to_vmem [thread:$0]  %s32_s23, 8192, %s34_s25, [#allocation8], %s4915_s29, %s4915_s29, %s4916_s30  }
   0x7   :  { %s23_s8 = sshll.u32 %s4917_s7, 4  ;;  %s47_s11 = sshll.u32 %s11689_s3, 4  ;;  %s24_s8 = int_to_ptr.vmem [resolvable:$true] %s23_s8  ;;  %s48_s11 = int_to_ptr.hbm [resolvable:$true] %s47_s11 }
   0x8   :  { %26 = dma.hbm_to_vmem [thread:$0]  %s22_s28, 512, %s24_s8, [#allocation5]  }
   0x9   :  { %s4918_s1 = smov [#allocation9]  }
   0xa   :  { %s49_s12 = sshll.u32 %s4918_s1, 4  ;;  %s50_s12 = int_to_ptr.vmem [resolvable:$true] %s49_s12 }
   0xb   :  { %52 = dma.hbm_to_vmem [thread:$0]  %s48_s11, 128, %s50_s12, [#allocation8]  }
   0xc   :  { %4906 = dma.done.wait [#allocation5], 512  }
   0xd   :  { %4907 = vsyncadd [#allocation5], 4294966784 }
   0xe   :  { %4908 = dma.done.wait [#allocation8], 8320  }
   0xf   :  { %4909 = vsyncadd [#allocation8], 4294958976  ;;  %v4669_v0 = vld [vmem:[#allocation7 + $0x38] sm:$0xff]  ;;  %v4668_v4 = vld [vmem:[#allocation7 + $0x30] sm:$0xff]  ;;  %vm11694_vm5 = vcmask 64512   ;;  %s4368_s14 = sshll.u32 %s11691_s5, 4  ;;  %s4369_s14 = int_to_ptr.hbm [resolvable:$true] %s4368_s14 }
  0x10   :  { %v4677_v1 = vld [vmem:[#allocation7 + $0x78] sm:$0xff]  ;;  %615 = vmatpush.bf16.msra.mxu0 %v4669_v0  ;;  %v4676_v5 = vld [vmem:[#allocation7 + $0x70] sm:$0xff]  ;;  %v4667_v8 = vld [vmem:[#allocation7 + $0x28] sm:$0xff]  ;;  %s4920_s15 = smov [#allocation11]   ;;  %s4921_s17 = smov [#allocation10]  }
  0x11   :  { %v4685_v2 = vld [vmem:[#allocation7 + $0xb8] sm:$0xff]  ;;  %628 = vmatpush.bf16.msra.mxu1 %v4677_v1  ;;  %v4684_v6 = vld [vmem:[#allocation7 + $0xb0] sm:$0xff]  ;;  %v4675_v9 = vld [vmem:[#allocation7 + $0x68] sm:$0xff]  ;;  %s4366_s16 = sshll.u32 %s4920_s15, 4  ;;  %s4355_s18 = sshll.u32 %s4921_s17, 4  ;;  %s4367_s16 = int_to_ptr.vmem [resolvable:$true] %s4366_s16  ;;  %s4356_s18 = int_to_ptr.vmem [resolvable:$true] %s4355_s18 }
  0x12   :  { %v4693_v3 = vld [vmem:[#allocation7 + $0xf8] sm:$0xff]  ;;  %641 = vmatpush.bf16.msra.mxu2 %v4685_v2  ;;  %v4692_v7 = vld [vmem:[#allocation7 + $0xf0] sm:$0xff]  ;;  %v4683_v10 = vld [vmem:[#allocation7 + $0xa8] sm:$0xff]  ;;  %s4357_s21 = sshll.u32 %s11690_s4, 4  ;;  %s4922_s4 = smov [#allocation13]   ;;  %s4358_s21 = int_to_ptr.hbm [resolvable:$true] %s4357_s21 }
  0x13   :  { %654 = vmatpush.bf16.msra.mxu3 %v4693_v3  ;;  %v4691_v11 = vld [vmem:[#allocation7 + $0xe8] sm:$0xff]  ;;  %v4666_v12 = vld [vmem:[#allocation7 + $0x20] sm:$0xff]  ;;  %v4665_v16 = vld [vmem:[#allocation7 + $0x18] sm:$0xff]  ;;  %s4377_s5 = sshll.u32 %s4922_s4, 4  ;;  %s4379_s24 = sshll.u32 %s11692_s6, 4  ;;  %s4378_s5 = int_to_ptr.vmem [resolvable:$true] %s4377_s5  ;;  %s4380_s24 = int_to_ptr.hbm [resolvable:$true] %s4379_s24 }
  0x14   :  { %616 = vmatpush.bf16.msra.mxu0 %v4668_v4  ;;  %v4674_v13 = vld [vmem:[#allocation7 + $0x60] sm:$0xff]  ;;  %v4673_v17 = vld [vmem:[#allocation7 + $0x58] sm:$0xff]  ;;  %v4664_v20 = vld [vmem:[#allocation7 + $0x10] sm:$0xff] }
  0x15   :  { %629 = vmatpush.bf16.msra.mxu1 %v4676_v5  ;;  %v4682_v14 = vld [vmem:[#allocation7 + $0xa0] sm:$0xff]  ;;  %v4681_v18 = vld [vmem:[#allocation7 + $0x98] sm:$0xff]  ;;  %v4672_v21 = vld [vmem:[#allocation7 + $0x50] sm:$0xff] }
  0x16   :  { %642 = vmatpush.bf16.msra.mxu2 %v4684_v6  ;;  %v4690_v15 = vld [vmem:[#allocation7 + $0xe0] sm:$0xff]  ;;  %v4689_v19 = vld [vmem:[#allocation7 + $0xd8] sm:$0xff]  ;;  %v4680_v22 = vld [vmem:[#allocation7 + $0x90] sm:$0xff] }
  0x17   :  { %655 = vmatpush.bf16.msra.mxu3 %v4692_v7  ;;  %v4688_v23 = vld [vmem:[#allocation7 + $0xd0] sm:$0xff]  ;;  %v4663_v24 = vld [vmem:[#allocation7 + $0x8] sm:$0xff]  ;;  %v71_v29 = vld [vmem:[#allocation4] sm:$0xff] }
  0x18   :  { %617 = vmatpush.bf16.msra.mxu0 %v4667_v8  ;;  %v4671_v25 = vld [vmem:[#allocation7 + $0x48] sm:$0xff]  ;;  %v4662_v30 = vld [vmem:[#allocation7] sm:$0xff]  ;;  %v207_v33 = vunpack.c.l.b16 %v71_v29  ;;  %v208_v37 = vunpack.c.h.b16 %v71_v29  ;;  %v4701_v38 = vld [vmem:[#allocation7 + $0x138] sm:$0xff] }
  0x19   :  { %630 = vmatpush.bf16.msra.mxu1 %v4675_v9  ;;  %v4679_v26 = vld [vmem:[#allocation7 + $0x88] sm:$0xff]  ;;  %v4670_v31 = vld [vmem:[#allocation7 + $0x40] sm:$0xff]  ;;  %v4709_v39 = vld [vmem:[#allocation7 + $0x178] sm:$0xff] }
  0x1a   :  { %643 = vmatpush.bf16.msra.mxu2 %v4683_v10  ;;  %v4687_v27 = vld [vmem:[#allocation7 + $0xc8] sm:$0xff]  ;;  %v4678_v34 = vld [vmem:[#allocation7 + $0x80] sm:$0xff]  ;;  %v4717_v40 = vld [vmem:[#allocation7 + $0x1b8] sm:$0xff]  ;;  %v215_v43 = vpack.c.b16 %v207_v33, %v207_v33  ;;  %v216_v45 = vpack.c.b16 %v208_v37, %v208_v37 }
  0x1b   :  { %656 = vmatpush.bf16.msra.mxu3 %v4691_v11  ;;  %v72_v28 = vld [vmem:[#allocation4 + $0x8] sm:$0xff]  ;;  %v4686_v35 = vld [vmem:[#allocation7 + $0xc0] sm:$0xff]  ;;  %v4725_v41 = vld [vmem:[#allocation7 + $0x1f8] sm:$0xff] }
  0x1c   :  { %618 = vmatpush.bf16.msra.mxu0 %v4666_v12  ;;  %v209_v32 = vunpack.c.l.b16 %v72_v28  ;;  %v210_v36 = vunpack.c.h.b16 %v72_v28  ;;  %v4700_v46 = vld [vmem:[#allocation7 + $0x130] sm:$0xff]  ;;  %v4699_v50 = vld [vmem:[#allocation7 + $0x128] sm:$0xff]  ;;  %v4698_v54 = vld [vmem:[#allocation7 + $0x120] sm:$0xff] }
  0x1d   :  { %631 = vmatpush.bf16.msra.mxu1 %v4674_v13  ;;  %v4708_v47 = vld [vmem:[#allocation7 + $0x170] sm:$0xff]  ;;  %v4707_v51 = vld [vmem:[#allocation7 + $0x168] sm:$0xff]  ;;  %v4706_v55 = vld [vmem:[#allocation7 + $0x160] sm:$0xff] }
  0x1e   :  { %644 = vmatpush.bf16.msra.mxu2 %v4682_v14  ;;  %v217_v42 = vpack.c.b16 %v209_v32, %v209_v32  ;;  %v218_v44 = vpack.c.b16 %v210_v36, %v210_v36  ;;  %v4716_v48 = vld [vmem:[#allocation7 + $0x1b0] sm:$0xff]  ;;  %v4715_v52 = vld [vmem:[#allocation7 + $0x1a8] sm:$0xff]  ;;  %v4714_v56 = vld [vmem:[#allocation7 + $0x1a0] sm:$0xff] }
  0x1f   :  { %657 = vmatpush.bf16.msra.mxu3 %v4690_v15  ;;  %v4724_v49 = vld [vmem:[#allocation7 + $0x1f0] sm:$0xff]  ;;  %v4723_v53 = vld [vmem:[#allocation7 + $0x1e8] sm:$0xff]  ;;  %v4722_v57 = vld [vmem:[#allocation7 + $0x1e0] sm:$0xff] }
  0x20   :  { %619 = vmatpush.bf16.msra.mxu0 %v4665_v16  ;;  %v4697_v58 = vld [vmem:[#allocation7 + $0x118] sm:$0xff]  ;;  %v4696_v62 = vld [vmem:[#allocation7 + $0x110] sm:$0xff]  ;;  %v4695_v2 = vld [vmem:[#allocation7 + $0x108] sm:$0xff] }
  0x21   :  { %632 = vmatpush.bf16.msra.mxu1 %v4673_v17  ;;  %v4705_v59 = vld [vmem:[#allocation7 + $0x158] sm:$0xff]  ;;  %v4704_v63 = vld [vmem:[#allocation7 + $0x150] sm:$0xff]  ;;  %v4703_v3 = vld [vmem:[#allocation7 + $0x148] sm:$0xff] }
  0x22   :  { %645 = vmatpush.bf16.msra.mxu2 %v4681_v18  ;;  %v4713_v60 = vld [vmem:[#allocation7 + $0x198] sm:$0xff]  ;;  %v4712_v0 = vld [vmem:[#allocation7 + $0x190] sm:$0xff]  ;;  %v4711_v5 = vld [vmem:[#allocation7 + $0x188] sm:$0xff] }
  0x23   :  { %658 = vmatpush.bf16.msra.mxu3 %v4689_v19  ;;  %v4721_v61 = vld [vmem:[#allocation7 + $0x1d8] sm:$0xff]  ;;  %v4720_v1 = vld [vmem:[#allocation7 + $0x1d0] sm:$0xff]  ;;  %v4719_v6 = vld [vmem:[#allocation7 + $0x1c8] sm:$0xff] }
  0x24   :  { %620 = vmatpush.bf16.msra.mxu0 %v4664_v20  ;;  %v73_v4 = vld [vmem:[#allocation4 + $0x10] sm:$0xff]  ;;  %v74_v7 = vld [vmem:[#allocation4 + $0x18] sm:$0xff]  ;;  %v4694_v10 = vld [vmem:[#allocation7 + $0x100] sm:$0xff] }
  0x25   :  { %633 = vmatpush.bf16.msra.mxu1 %v4672_v21  ;;  %v211_v8 = vunpack.c.l.b16 %v73_v4  ;;  %v212_v9 = vunpack.c.h.b16 %v73_v4  ;;  %v4702_v11 = vld [vmem:[#allocation7 + $0x140] sm:$0xff]  ;;  %v213_v12 = vunpack.c.l.b16 %v74_v7  ;;  %v214_v13 = vunpack.c.h.b16 %v74_v7 }
  0x26   :  { %646 = vmatpush.bf16.msra.mxu2 %v4680_v22  ;;  %v4710_v14 = vld [vmem:[#allocation7 + $0x180] sm:$0xff] }
  0x27   :  { %659 = vmatpush.bf16.msra.mxu3 %v4688_v23  ;;  %v4718_v15 = vld [vmem:[#allocation7 + $0x1c0] sm:$0xff]  ;;  %v219_v16 = vpack.c.b16 %v211_v8, %v211_v8  ;;  %v220_v17 = vpack.c.b16 %v212_v9, %v212_v9  ;;  %v221_v18 = vpack.c.b16 %v213_v12, %v213_v12  ;;  %v222_v19 = vpack.c.b16 %v214_v13, %v214_v13 }
  0x28   :  { %621 = vmatpush.bf16.msra.mxu0 %v4663_v24 }
  0x29   :  { %634 = vmatpush.bf16.msra.mxu1 %v4671_v25 }
  0x2a   :  { %647 = vmatpush.bf16.msra.mxu2 %v4679_v26 }
  0x2b   :  { %660 = vmatpush.bf16.msra.mxu3 %v4687_v27 }
  0x2c   :  { %622 = vmatpush.bf16.msra.mxu0 %v4662_v30 }
  0x2d   :  { %635 = vmatpush.bf16.msra.mxu1 %v4670_v31 }
  0x2e   :  { %648 = vmatpush.bf16.msra.mxu2 %v4678_v34  ;;  %v731_v34 = vlaneseq }
  0x2f   :  { %661 = vmatpush.bf16.msra.mxu3 %v4686_v35  ;;  %623 = vmatmul.bf16.vlgmr.msra.gmra.mxu0 %v215_v43 }
  0x30   :  { %667 = vmatpush.bf16.msrb.mxu0 %v4701_v38  ;;  %636 = vmatmul.bf16.vlgmr.msra.gmra.mxu1 %v216_v45 }
  0x31   :  { %680 = vmatpush.bf16.msrb.mxu1 %v4709_v39  ;;  %649 = vmatmul.bf16.vlgmr.msra.gmra.mxu2 %v217_v42  ;;  %v4739_v39 = vld [vmem:[%s11688_s2] ss:$0 sm:$0xff]  ;;  %v4970_v42 = vand.u32 127, %v731_v34 }
  0x32   :  { %693 = vmatpush.bf16.msrb.mxu2 %v4717_v40  ;;  %662 = vmatmul.bf16.vlgmr.msra.gmra.mxu3 %v218_v44 }
  0x33   :  { %706 = vmatpush.bf16.msrb.mxu3 %v4725_v41  ;;  %vm11693_vm0 = vcmp.lt.s32.totalorder %v4970_v42, 16 }
  0x34   :  { %668 = vmatpush.bf16.msrb.mxu0 %v4700_v46 }
  0x35   :  { %681 = vmatpush.bf16.msrb.mxu1 %v4708_v47 }
  0x36   :  { %694 = vmatpush.bf16.msrb.mxu2 %v4716_v48 }
  0x37   :  { %707 = vmatpush.bf16.msrb.mxu3 %v4724_v49 }
  0x38   :  { %669 = vmatpush.bf16.msrb.mxu0 %v4699_v50 }
  0x39   :  { %682 = vmatpush.bf16.msrb.mxu1 %v4707_v51 }
  0x3a   :  { %695 = vmatpush.bf16.msrb.mxu2 %v4715_v52 }
  0x3b   :  { %708 = vmatpush.bf16.msrb.mxu3 %v4723_v53 }
  0x3c   :  { %670 = vmatpush.bf16.msrb.mxu0 %v4698_v54 }
  0x3d   :  { %683 = vmatpush.bf16.msrb.mxu1 %v4706_v55 }
  0x3e   :  { %696 = vmatpush.bf16.msrb.mxu2 %v4714_v56 }
  0x3f   :  { %709 = vmatpush.bf16.msrb.mxu3 %v4722_v57 }
  0x40   :  { %671 = vmatpush.bf16.msrb.mxu0 %v4697_v58 }
  0x41   :  { %684 = vmatpush.bf16.msrb.mxu1 %v4705_v59 }
  0x42   :  { %697 = vmatpush.bf16.msrb.mxu2 %v4713_v60 }
  0x43   :  { %710 = vmatpush.bf16.msrb.mxu3 %v4721_v61 }
  0x44   :  { %672 = vmatpush.bf16.msrb.mxu0 %v4696_v62 }
  0x45   :  { %685 = vmatpush.bf16.msrb.mxu1 %v4704_v63 }
  0x46   :  { %698 = vmatpush.bf16.msrb.mxu2 %v4712_v0 }
  0x47   :  { %711 = vmatpush.bf16.msrb.mxu3 %v4720_v1 }
  0x48   :  { %673 = vmatpush.bf16.msrb.mxu0 %v4695_v2  ;;  %v4981_v2 = vshrl.u32 %v731_v34, 7 }
  0x49   :  { %686 = vmatpush.bf16.msrb.mxu1 %v4703_v3 }
  0x4a   :  { %699 = vmatpush.bf16.msrb.mxu2 %v4711_v5  ;;  %4738 = vset.pattern.permute.xlu0 %v4981_v2  ;;  %vm2011_vm6 = vcmp.lt.s32.totalorder %v4981_v2, %v4970_v42  ;;  %vm2267_vm7 = vcmp.le.s32.totalorder %v4981_v2, %v4970_v42 }
  0x4b   :  { %712 = vmatpush.bf16.msrb.mxu3 %v4719_v6  ;;  %4737 = vset.pattern.permute.xlu2 %v4981_v2 }
  0x4c   :  { %674 = vmatpush.bf16.msrb.mxu0 %v4694_v10 }
  0x4d   :  { %687 = vmatpush.bf16.msrb.mxu1 %v4702_v11 }
  0x4e   :  { %700 = vmatpush.bf16.msrb.mxu2 %v4710_v14 }
  0x4f   :  { %713 = vmatpush.bf16.msrb.mxu3 %v4718_v15  ;;  %675 = vmatmul.bf16.vlgmr.msrb.gmra.mxu0 %v219_v16 }
  0x50   :  { %688 = vmatmul.bf16.vlgmr.msrb.gmra.mxu1 %v220_v17 }
  0x51   :  { %701 = vmatmul.bf16.vlgmr.msrb.gmra.mxu2 %v221_v18 }
  0x52   :  { %714 = vmatmul.bf16.vlgmr.msrb.gmra.mxu3 %v222_v19 }
  0xac   :  { %v624_v20 = vpop.f32.mrf.mxu0 }
  0xad   :  { %v637_v21 = vpop.f32.mrf.mxu1 }
  0xae   :  { %v638_v28 = vadd.f32 %v637_v21, %v624_v20 }
  0xb4   :  { %v650_v22 = vpop.f32.mrf.mxu2  ;;  %v626_v24 = vpop.f32.mrf.mxu0 }
  0xb5   :  { %v663_v23 = vpop.f32.mrf.mxu3  ;;  %v639_v25 = vpop.f32.mrf.mxu1  ;;  %v651_v29 = vadd.f32 %v650_v22, %v638_v28 }
  0xb7   :  { %v664_v30 = vadd.f32 %v663_v23, %v651_v29 }
  0xbc   :  { %v652_v26 = vpop.f32.mrf.mxu2 }
  0xbd   :  { %v665_v27 = vpop.f32.mrf.mxu3 }
  0xcc   :  { %v676_v31 = vpop.f32.mrf.mxu0 }
  0xcd   :  { %v689_v32 = vpop.f32.mrf.mxu1  ;;  %v677_v33 = vadd.f32 %v676_v31, %v664_v30 }
  0xcf   :  { %v690_v35 = vadd.f32 %v689_v32, %v677_v33 }
  0xd4   :  { %v702_v36 = vpop.f32.mrf.mxu2  ;;  %v678_v40 = vpop.f32.mrf.mxu0 }
  0xd5   :  { %v715_v37 = vpop.f32.mrf.mxu3  ;;  %v703_v38 = vadd.f32 %v702_v36, %v690_v35  ;;  %v691_v41 = vpop.f32.mrf.mxu1 }
  0xd7   :  { %v716_v43 = vadd.f32 %v715_v37, %v703_v38 }
  0xd9   :  { %v729_v44 = vadd.f32 %v4739_v39, %v716_v43 }
  0xdb   :  { %730 = vst [vmem:[#allocation10] sm:$0xff] %v729_v44  ;;  %v734_v45 = vmul.f32 0.7692308, %v729_v44 }
  0xdc   :  { %v704_v46 = vpop.f32.mrf.mxu2  ;;  %4360 = dma.vmem_to_hbm [thread:$0]  %s4356_s18, 128, %s4358_s21, [#allocation6]  }
  0xdd   :  { %v717_v47 = vpop.f32.mrf.mxu3  ;;  %v735_v48 = vsel %vm11693_vm0, %v734_v45, -1e+30 }
  0xde   :  { %736 = vmax.xlane.f32.xlu0 %v735_v48 }
 0x151   :  { %v737_v49 = vpop.xlane.xlu0 %736 }
 0x152   :  { %v738_v50 = vsub.f32 %v735_v48, %v737_v49 }
 0x154   :  { %v739_v51 = vmul.f32 1.442695, %v738_v50 }
 0x156   :  { %4740 = vpow2.f32 %v739_v51  ;;  %v11715_v51 = vmov 0  }
 0x15c   :  { %v4741_v52 = vpop.eup %4740 }
 0x15d   :  { %v741_v53 = vsel %vm11693_vm0, %v4741_v52, 0.0  ;;  %v5033_v52 = vsel %vm2011_vm6, 1, %v11715_v51 }
 0x15e   :  { %742 = vadd.xlane.f32.xlu0 %v741_v53 }
 0x1d1   :  { %v743_v54 = vpop.xlane.xlu0 %742 }
 0x1d2   :  { %4742 = vrcp.f32 %v743_v54  ;;  %v755_v58 = vand.u32 2147483648, %v743_v54  ;;  %v753_v60 = vand.u32 2147483647, %v743_v54  ;;  %vm749_vm2 = vweird.f32 %v743_v54 }
 0x1d4   :  { %v756_v62 = vor.u32 1.1754944e-38, %v755_v58  ;;  %vm754_vm4 = vcmp.eq.f32.partialorder %v753_v60, 8.507059e+37 }
 0x1d8   :  { %v4743_v55 = vpop.eup %4742 }
 0x1d9   :  { %v745_v56 = vmul.f32 %v4743_v55, %v743_v54  ;;  %vm750_vm1 = vweird.f32 %v4743_v55 }
 0x1da   :  { %vm751_vm3 = vmor %vm749_vm2, %vm750_vm1 }
 0x1db   :  { %v746_v57 = vsub.f32 1.0, %v745_v56 }
 0x1dd   :  { %v747_v59 = vmul.f32 %v4743_v55, %v746_v57 }
 0x1df   :  { %v748_v61 = vadd.f32 %v4743_v55, %v747_v59  ;;  %v2044_v59 = vrot.slane %v5033_v52, 2 }
 0x1e1   :  { %v752_v63 = vsel %vm751_vm3, %v4743_v55, %v748_v61  ;;  %v2043_v55 = vrot.slane %v5033_v52, 1  ;;  %vm2156_vm10 = vcmp.ne.s32.totalorder %v2044_v59, 0 }
 0x1e2   :  { %v757_v0 = vsel %vm754_vm4, %v756_v62, %v752_v63 }
 0x1e3   :  { %v4977_v1 = vmul.f32 %v757_v0, %v741_v53  ;;  %v5036_v53 = vsel %vm2267_vm7, 1, %v11715_v51  ;;  %vm2155_vm8 = vcmp.ne.s32.totalorder %v2043_v55, 0  ;;  %v2046_v0 = vrot.slane %v5033_v52, 4 }
 0x1e4   :  { %v2299_v58 = vrot.slane %v5036_v53, 1  ;;  %v2300_v60 = vrot.slane %v5036_v53, 2  ;;  %v2523_v63 = vsel %vm2155_vm8, 1, %v11715_v51 }
 0x1e5   :  { %759 = vst [vmem:[#allocation11] sm:$0xff] %v4977_v1  ;;  %760 = vxpose.xlu1.b32.start.end [1/1] (short) %v4977_v1, 128  ;;  %vm5058_vm12 = vcmp.ne.s32.totalorder %v2046_v0, 0 }
 0x1e6   :  { %vm2411_vm9 = vcmp.ne.s32.totalorder %v2299_v58, 0  ;;  %vm2412_vm11 = vcmp.ne.s32.totalorder %v2300_v60, 0  ;;  %4371 = dma.vmem_to_hbm [thread:$0]  %s4367_s16, 128, %s4369_s14, [#allocation12]  }
 0x238   :  { %4736 = vset.pattern.permute.xlu1 %v4981_v2 }
 0x289   :  { %v776_v3 = vpop.trf.xlu1 }
 0x28a   :  { %793 = vst.msk [vmem:[#allocation3] sm:$0xff] %vm11694_vm5, %v776_v3  ;;  %v3402_v3 = vsel %vm2411_vm9, 1, %v11715_v51 }
 0x291   :  { %v777_v4 = vpop.trf.xlu1  ;;  %v826_v5 = vld [vmem:[#allocation3] sm:$0xff] }
 0x292   :  { %794 = vst.msk [vmem:[#allocation3 + $0x8] sm:$0xff] %vm11694_vm5, %v777_v4  ;;  %v863_v6 = vperm.slane %v826_v5, 3  ;;  %v849_v7 = vperm.slane %v826_v5, 1  ;;  %v856_v10 = vperm.slane %v826_v5, 2  ;;  %v870_v14 = vperm.slane %v826_v5, 4 }
 0x293   :  { %v877_v16 = vperm.slane %v826_v5, 5  ;;  %v884_v19 = vperm.slane %v826_v5, 6  ;;  %v842_v21 = vperm.slane %v826_v5, 0  ;;  %v891_v25 = vperm.slane %v826_v5, 7 }
 0x294   :  { %868 = vperm.xlu0 %4738, %v863_v6   ;;  %854 = vperm.xlu2 %4737, %v849_v7   ;;  %v2302_v5 = vrot.slane %v5036_v53, 4 }
 0x296   :  { %vm2414_vm13 = vcmp.ne.s32.totalorder %v2302_v5, 0 }
 0x299   :  { %v778_v8 = vpop.trf.xlu1  ;;  %v4988_v9 = vld [vmem:[#allocation3 + $0x8] sm:$0xff] }
 0x29a   :  { %795 = vst.msk [vmem:[#allocation3 + $0x10] sm:$0xff] %vm11694_vm5, %v778_v8  ;;  %v905_v11 = vperm.slane %v4988_v9, 1  ;;  %v919_v12 = vperm.slane %v4988_v9, 3  ;;  %v933_v17 = vperm.slane %v4988_v9, 5  ;;  %v947_v20 = vperm.slane %v4988_v9, 7 }
 0x29b   :  { %v898_v29 = vperm.slane %v4988_v9, 0  ;;  %v912_v33 = vperm.slane %v4988_v9, 2  ;;  %v926_v37 = vperm.slane %v4988_v9, 4  ;;  %v940_v44 = vperm.slane %v4988_v9, 6 }
 0x29c   :  { %861 = vperm.xlu2 %4737, %v856_v10   ;;  %910 = vperm.xlu0 %4738, %v905_v11   ;;  %v2524_v8 = vsel %vm2156_vm10, 1, %v11715_v51  ;;  %v3403_v9 = vsel %vm2412_vm11, 1, %v11715_v51  ;;  %v2636_v10 = vperm.slane %v2523_v63, 0 }
 0x29e   :  { %vm5075_vm14 = vcmp.eq.s32.totalorder %v2636_v10, 1 }
 0x2a1   :  { %v779_v13 = vpop.trf.xlu1  ;;  %v4998_v22 = vld [vmem:[#allocation3 + $0x10] sm:$0xff] }
 0x2a2   :  { %796 = vst.msk [vmem:[#allocation3 + $0x18] sm:$0xff] %vm11694_vm5, %v779_v13  ;;  %v961_v23 = vperm.slane %v4998_v22, 1  ;;  %v975_v26 = vperm.slane %v4998_v22, 3  ;;  %v989_v34 = vperm.slane %v4998_v22, 5  ;;  %v1003_v38 = vperm.slane %v4998_v22, 7 }
 0x2a3   :  { %v954_v48 = vperm.slane %v4998_v22, 0  ;;  %v968_v56 = vperm.slane %v4998_v22, 2  ;;  %v982_v6 = vperm.slane %v4998_v22, 4  ;;  %v996_v11 = vperm.slane %v4998_v22, 6 }
 0x2a4   :  { %875 = vperm.xlu2 %4737, %v870_v14   ;;  %924 = vperm.xlu0 %4738, %v919_v12   ;;  %v2045_v12 = vrot.slane %v5033_v52, 3  ;;  %v2047_v13 = vrot.slane %v5033_v52, 5  ;;  %v3515_v14 = vperm.slane %v3402_v3, 0 }
 0x2a6   :  { %vm2157_vm15 = vcmp.ne.s32.totalorder %v2045_v12, 0  ;;  %vm2159_vm1 = vcmp.ne.s32.totalorder %v2047_v13, 0  ;;  %vm5082_vm2 = vcmp.eq.s32.totalorder %v3515_v14, 1 }
 0x2a9   :  { %v780_v15 = vpop.trf.xlu1  ;;  %v5018_v40 = vld [vmem:[#allocation3 + $0x18] sm:$0xff] }
 0x2aa   :  { %797 = vst.msk [vmem:[#allocation3 + $0x20] sm:$0xff] %vm11694_vm5, %v780_v15  ;;  %v1017_v41 = vperm.slane %v5018_v40, 1  ;;  %v1031_v46 = vperm.slane %v5018_v40, 3  ;;  %v1045_v57 = vperm.slane %v5018_v40, 5  ;;  %v1059_v7 = vperm.slane %v5018_v40, 7 }
 0x2ac   :  { %882 = vperm.xlu2 %4737, %v877_v16   ;;  %938 = vperm.xlu0 %4738, %v933_v17   ;;  %v1010_v16 = vperm.slane %v5018_v40, 0  ;;  %v2301_v17 = vrot.slane %v5036_v53, 3 }
 0x2ae   :  { %vm2413_vm3 = vcmp.ne.s32.totalorder %v2301_v17, 0  ;;  %v2049_v17 = vrot.slane %v5033_v52, 7 }
 0x2b1   :  { %v781_v18 = vpop.trf.xlu1 }
 0x2b2   :  { %798 = vst.msk [vmem:[#allocation3 + $0x28] sm:$0xff] %vm11694_vm5, %v781_v18  ;;  %v2637_v18 = vperm.slane %v2524_v8, 0 }
 0x2b4   :  { %889 = vperm.xlu2 %4737, %v884_v19   ;;  %952 = vperm.xlu0 %4738, %v947_v20   ;;  %v3516_v19 = vperm.slane %v3403_v9, 0  ;;  %v5064_v20 = vld [vmem:[#allocation3 + $0x20] sm:$0xff]  ;;  %vm5089_vm4 = vcmp.eq.s32.totalorder %v2637_v18, 1  ;;  %v812_v9 = vadd.s32 16, %v4981_v2 }
 0x2b5   :  { %v1101_v60 = vperm.slane %v5064_v20, 5  ;;  %v1066_v63 = vperm.slane %v5064_v20, 0  ;;  %v1080_v12 = vperm.slane %v5064_v20, 2 }
 0x2b6   :  { %vm5093_vm6 = vcmp.eq.s32.totalorder %v3516_v19, 1 }
 0x2b7   :  { %847 = vperm.xlu1 %4736, %v842_v21   ;;  %v811_v21 = vadd.s32 8, %v4981_v2 }
 0x2b9   :  { %v782_v24 = vpop.trf.xlu1  ;;  %vm2012_vm7 = vcmp.lt.s32.totalorder %v811_v21, %v4970_v42  ;;  %vm2268_vm10 = vcmp.le.s32.totalorder %v811_v21, %v4970_v42 }
 0x2ba   :  { %799 = vst.msk [vmem:[#allocation3 + $0x30] sm:$0xff] %vm11694_vm5, %v782_v24  ;;  %v2303_v24 = vrot.slane %v5036_v53, 5  ;;  %v5150_v5 = vsel %vm2268_vm10, 1, %v11715_v51 }
 0x2bb   :  { %v2306_v21 = vrot.slane %v5150_v5, 1 }
 0x2bc   :  { %896 = vperm.xlu2 %4737, %v891_v25   ;;  %966 = vperm.xlu0 %4738, %v961_v23   ;;  %v1024_v25 = vperm.slane %v5018_v40, 2  ;;  %vm5100_vm8 = vcmp.ne.s32.totalorder %v2303_v24, 0 }
 0x2c1   :  { %v5003_v27 = vld [vmem:[#allocation3 + $0x30] sm:$0xff]  ;;  %v783_v28 = vpop.trf.xlu1 }
 0x2c2   :  { %v1199_v30 = vperm.slane %v5003_v27, 3  ;;  %800 = vst.msk [vmem:[#allocation3 + $0x38] sm:$0xff] %vm11694_vm5, %v783_v28  ;;  %v1220_v31 = vperm.slane %v5003_v27, 6  ;;  %v1052_v28 = vperm.slane %v5018_v40, 6 }
 0x2c4   :  { %903 = vperm.xlu2 %4737, %v898_v29   ;;  %980 = vperm.xlu0 %4738, %v975_v26   ;;  %v1038_v26 = vperm.slane %v5018_v40, 4 }
 0x2c5   :  { %1204 = vperm.xlu1 %4736, %v1199_v30   ;;  %v2526_v30 = vsel %vm5058_vm12, 1, %v11715_v51 }
 0x2c9   :  { %v784_v32 = vpop.trf.xlu1  ;;  %v5012_v35 = vld [vmem:[#allocation3 + $0x38] sm:$0xff] }
 0x2ca   :  { %801 = vst.msk [vmem:[#allocation3 + $0x40] sm:$0xff] %vm11694_vm5, %v784_v32  ;;  %v1241_v36 = vperm.slane %v5012_v35, 1  ;;  %v1262_v43 = vperm.slane %v5012_v35, 4  ;;  %v1283_v47 = vperm.slane %v5012_v35, 7 }
 0x2cb   :  { %11791 = vst [vmem:[#allocation18_spill] sm:$0xff] %v5012_v35 }
 0x2cc   :  { %917 = vperm.xlu2 %4737, %v912_v33   ;;  %994 = vperm.xlu0 %4738, %v989_v34   ;;  %v1073_v33 = vperm.slane %v5064_v20, 1  ;;  %v3405_v34 = vsel %vm2414_vm13, 1, %v11715_v51 }
 0x2cd   :  { %1225 = vperm.xlu1 %4736, %v1220_v31  }
 0x2d1   :  { %v785_v39 = vpop.trf.xlu1  ;;  %v834_v50 = vld [vmem:[#allocation3 + $0x40] sm:$0xff] }
 0x2d2   :  { %802 = vst.msk [vmem:[#allocation3 + $0x48] sm:$0xff] %vm11694_vm5, %v785_v39  ;;  %v1304_v54 = vperm.slane %v834_v50, 2  ;;  %v1325_v4 = vperm.slane %v834_v50, 5  ;;  %v2639_v39 = vperm.slane %v2526_v30, 0  ;;  %v5114_v50 = vsel %vm2012_vm7, 1, %v11715_v51 }
 0x2d3   :  { %v11822_v30 = vmov 0  ;;  %v2054_v15 = vrot.slane %v5114_v50, 5 }
 0x2d4   :  { %931 = vperm.xlu2 %4737, %v926_v37   ;;  %1008 = vperm.xlu0 %4738, %v1003_v38  }
 0x2d5   :  { %1246 = vperm.xlu1 %4736, %v1241_v36  }
 0x2d9   :  { %v786_v45 = vpop.trf.xlu1  ;;  %v5069_v23 = vld [vmem:[#allocation3 + $0x48] sm:$0xff] }
 0x2da   :  { %803 = vst.msk [vmem:[#allocation3 + $0x50] sm:$0xff] %vm11694_vm5, %v786_v45  ;;  %v1346_v38 = vperm.slane %v5069_v23, 0  ;;  %v3518_v45 = vperm.slane %v3405_v34, 0  ;;  %v2052_v34 = vrot.slane %v5114_v50, 3 }
 0x2dc   :  { %945 = vperm.xlu2 %4737, %v940_v44   ;;  %1022 = vperm.xlu0 %4738, %v1017_v41   ;;  %v2525_v41 = vsel %vm2157_vm15, 1, %v11715_v51  ;;  %v2527_v44 = vsel %vm2159_vm1, 1, %v11715_v51  ;;  %vm5141_vm15 = vcmp.eq.s32.totalorder %v2639_v39, 1  ;;  %vm5163_vm1 = vcmp.eq.s32.totalorder %v3518_v45, 1 }
 0x2dd   :  { %1267 = vperm.xlu1 %4736, %v1262_v43   ;;  %v2638_v55 = vperm.slane %v2525_v41, 0  ;;  %v2305_v39 = vrot.slane %v5036_v53, 7 }
 0x2e1   :  { %v787_v49 = vpop.trf.xlu1 }
 0x2e2   :  { %804 = vst.msk [vmem:[#allocation3 + $0x58] sm:$0xff] %vm11694_vm5, %v787_v49  ;;  %v2304_v49 = vrot.slane %v5036_v53, 6 }
 0x2e4   :  { %959 = vperm.xlu2 %4737, %v954_v48   ;;  %1036 = vperm.xlu0 %4738, %v1031_v46   ;;  %v1087_v46 = vperm.slane %v5064_v20, 3  ;;  %v2048_v48 = vrot.slane %v5033_v52, 6  ;;  %vm2416_vm7 = vcmp.ne.s32.totalorder %v2304_v49, 0 }
 0x2e5   :  { %1288 = vperm.xlu1 %4736, %v1283_v47   ;;  %v5109_v47 = vsel %vm2413_vm3, 1, %v11715_v51  ;;  %v3407_v32 = vsel %vm2416_vm7, 1, %v11715_v51  ;;  %vm5307_vm7 = vcmp.ne.s32.totalorder %v2305_v39, 0 }
 0x2e6   :  { %v3517_v3 = vperm.slane %v5109_v47, 0  ;;  %vm5168_vm3 = vcmp.ne.s32.totalorder %v2048_v48, 0  ;;  %v3520_v49 = vperm.slane %v3407_v32, 0  ;;  %v3408_v39 = vsel %vm5307_vm7, 1, %v11715_v51 }
 0x2e9   :  { %v788_v62 = vpop.trf.xlu1 }
 0x2ea   :  { %805 = vst.msk [vmem:[#allocation3 + $0x60] sm:$0xff] %vm11694_vm5, %v788_v62  ;;  %v1115_v62 = vperm.slane %v5064_v20, 7 }
 0x2ec   :  { %973 = vperm.xlu2 %4737, %v968_v56   ;;  %1050 = vperm.xlu0 %4738, %v1045_v57   ;;  %v2640_v56 = vperm.slane %v2527_v44, 0  ;;  %v5121_v57 = vsel %vm5100_vm8, 1, %v11715_v51  ;;  %vm5183_vm8 = vcmp.eq.s32.totalorder %v2638_v55, 1  ;;  %v2308_v44 = vrot.slane %v5150_v5, 3 }
 0x2ed   :  { %1309 = vperm.xlu1 %4736, %v1304_v54   ;;  %v1367_v54 = vperm.slane %v5069_v23, 3  ;;  %v3519_v10 = vperm.slane %v5121_v57, 0  ;;  %v2307_v55 = vrot.slane %v5150_v5, 2 }
 0x2ee   :  { %v5044_v61 = vpop.permute.xlu2 %854 }
 0x2ef   :  { %vm1867_vm9 = vcmp.eq.f32.partialorder %v5044_v61, %v4977_v1  ;;  %vm1739_vm11 = vcmp.gt.f32.partialorder %v5044_v61, %v4977_v1 }
 0x2f0   :  { %vm5130_vm12 = vmand %vm1867_vm9, %vm5075_vm14 }
 0x2f1   :  { %v789_v31 = vpop.trf.xlu1  ;;  %vm5159_vm14 = vmand %vm1867_vm9, %vm5082_vm2  ;;  %vm5187_vm9 = vcmp.eq.s32.totalorder %v2640_v56, 1  ;;  %v11834_v56 = vmov 0 }
 0x2f2   :  { %806 = vst.msk [vmem:[#allocation3 + $0x68] sm:$0xff] %vm11694_vm5, %v789_v31  ;;  %vm5179_vm2 = vmor %vm1739_vm11, %vm5130_vm12  ;;  %v2528_v31 = vsel %vm5168_vm3, 1, %v11715_v51 }
 0x2f3   :  { %vm5212_vm0 = vmor %vm1739_vm11, %vm5159_vm14  ;;  %v3148_v37 = vsel %vm5179_vm2, 1, %v11715_v51  ;;  %v2641_v48 = vperm.slane %v2528_v31, 0  ;;  %vm5262_vm14 = vcmp.ne.s32.totalorder %v2306_v21, 0  ;;  %vm5280_vm2 = vcmp.eq.s32.totalorder %v3517_v3, 1 }
 0x2f4   :  { %987 = vperm.xlu2 %4737, %v982_v6   ;;  %1064 = vperm.xlu0 %4738, %v1059_v7   ;;  %v5152_v7 = vld [vmem:[#allocation3 + $0x28] sm:$0xff]  ;;  %v11823_v30 = vsel %vm5212_vm0, 4294967295, %v11822_v30  ;;  %v3409_v14 = vsel %vm5262_vm14, 1, %v11715_v51 }
 0x2f5   :  { %1330 = vperm.xlu1 %4736, %v1325_v4   ;;  %v2050_v4 = vrot.slane %v5114_v50, 1  ;;  %v1129_v24 = vperm.slane %v5152_v7, 1  ;;  %v1143_v29 = vperm.slane %v5152_v7, 3  ;;  %v1157_v41 = vperm.slane %v5152_v7, 5 }
 0x2f6   :  { %v5067_v22 = vpop.permute.xlu2 %861 }
 0x2f7   :  { %vm1868_vm13 = vcmp.eq.f32.partialorder %v5067_v22, %v4977_v1  ;;  %vm1740_vm10 = vcmp.gt.f32.partialorder %v5067_v22, %v4977_v1 }
 0x2f8   :  { %vm5200_vm12 = vmand %vm1868_vm13, %vm5089_vm4  ;;  %vm5220_vm4 = vcmp.ne.s32.totalorder %v2050_v4, 0 }
 0x2f9   :  { %v790_v6 = vpop.trf.xlu1  ;;  %vm5230_vm11 = vmand %vm1868_vm13, %vm5093_vm6  ;;  %vm5252_vm13 = vcmp.ne.s32.totalorder %v2049_v17, 0  ;;  %v11868_v17 = vmov 0 }
 0x2fa   :  { %807 = vst.msk [vmem:[#allocation3 + $0x70] sm:$0xff] %vm11694_vm5, %v790_v6  ;;  %vm5248_vm6 = vmor %vm1740_vm10, %vm5200_vm12  ;;  %vm5288_vm5 = vcmp.ne.s32.totalorder %v2052_v34, 0  ;;  %v2529_v13 = vsel %vm5252_vm13, 1, %v11715_v51  ;;  %vm11844_vm12 = vcmask 64512   ;;  %v5357_v34 = vld [vmem:[#allocation3 + $0x50] sm:$0xff] }
 0x2fb   :  { %vm5274_vm3 = vmor %vm1740_vm10, %vm5230_vm11  ;;  %v3149_v3 = vsel %vm5248_vm6, 1, %v11715_v51  ;;  %vm5303_vm11 = vcmp.eq.s32.totalorder %v3519_v10, 1  ;;  %v2532_v0 = vsel %vm5288_vm5, 1, %v11715_v51  ;;  %v2642_v36 = vperm.slane %v2529_v13, 0 }
 0x2fc   :  { %1001 = vperm.xlu2 %4737, %v996_v11   ;;  %1078 = vperm.xlu0 %4738, %v1073_v33   ;;  %v11835_v56 = vsel %vm5274_vm3, 4294967295, %v11834_v56  ;;  %v3276_v32 = vadd.s32 %v3149_v3, %v3148_v37  ;;  %v3523_v37 = vperm.slane %v3409_v14, 0  ;;  %v1409_v58 = vperm.slane %v5357_v34, 1 }
 0x2fd   :  { %1351 = vperm.xlu1 %4736, %v1346_v38   ;;  %v1388_v38 = vperm.slane %v5069_v23, 6  ;;  %v11864_v11 = vmov 0  ;;  %v11888_v33 = vmov 0  ;;  %v1451_v31 = vperm.slane %v5357_v34, 7 }
 0x2fe   :  { %v5134_v59 = vpop.permute.xlu2 %875 }
 0x2ff   :  { %vm11848_vm13 = vcmp.eq.f32.partialorder %v5134_v59, %v4977_v1 }
 0x301   :  { %v791_v4 = vpop.trf.xlu1 }
 0x302   :  { %808 = vst.msk [vmem:[#allocation3 + $0x78] sm:$0xff] %vm11844_vm12, %v791_v4  ;;  %vm5332_vm12 = vmand %vm11848_vm13, %vm5141_vm15  ;;  %vm1742_vm15 = vcmp.gt.f32.partialorder %v5134_v59, %v4977_v1  ;;  %v3521_v4 = vperm.slane %v3408_v39, 0 }
 0x304   :  { %1015 = vperm.xlu2 %4737, %v1010_v16   ;;  %1092 = vperm.xlu0 %4738, %v1087_v46  }
 0x305   :  { %1372 = vperm.xlu1 %4736, %v1367_v54   ;;  %v2530_v54 = vsel %vm5220_vm4, 1, %v11715_v51 }
 0x306   :  { %v5258_v46 = vpop.permute.xlu0 %868  ;;  %v5260_v47 = vpop.permute.xlu2 %882  ;;  %v2644_v10 = vperm.slane %v2530_v54, 0 }
 0x307   :  { %vm11696_vm4 = vcmp.eq.f32.partialorder %v5258_v46, %v4977_v1  ;;  %vm11845_vm6 = vcmp.gt.f32.partialorder %v5258_v46, %v4977_v1  ;;  %vm11876_vm3 = vcmp.eq.f32.partialorder %v5258_v46, %v4977_v1 }
 0x308   :  { %vm2894_vm10 = vmand %vm11696_vm4, %vm5183_vm8  ;;  %vm11699_vm8 = vcmp.eq.f32.partialorder %v5260_v47, %v4977_v1  ;;  %vm5323_vm4 = vcmp.ne.s32.totalorder %v2308_v44, 0  ;;  %vm5388_vm7 = vcmp.eq.s32.totalorder %v2644_v10, 1  ;;  %v2646_v44 = vperm.slane %v2532_v0, 0 }
 0x309   :  { %vm3022_vm0 = vmor %vm11845_vm6, %vm2894_vm10  ;;  %vm11697_vm10 = vcmp.gt.f32.partialorder %v5260_v47, %v4977_v1  ;;  %vm5339_vm6 = vcmp.eq.s32.totalorder %v2641_v48, 1  ;;  %v5378_v16 = vsel %vm5323_vm4, 1, %v11715_v51  ;;  %v2310_v48 = vrot.slane %v5150_v5, 5 }
 0x30a   :  { %v3150_v21 = vsel %vm3022_vm0, 1, %v11715_v51  ;;  %vm11853_vm0 = vmmov %vm11848_vm13  ;;  %v3525_v10 = vperm.slane %v5378_v16, 0  ;;  %v2312_v16 = vrot.slane %v5150_v5, 7 }
 0x30b   :  { %vm5353_vm14 = vmand %vm11853_vm0, %vm5163_vm1  ;;  %vm5371_vm1 = vcmp.eq.s32.totalorder %v3520_v49, 1  ;;  %v3280_v23 = vadd.s32 %v3276_v32, %v3150_v21  ;;  %v5721_v21 = vld [vmem:[#allocation3 + $0x58] sm:$0xff] }
 0x30c   :  { %vm2896_vm5 = vmand %vm11699_vm8, %vm5187_vm9  ;;  %1029 = vperm.xlu2 %4737, %v1024_v25   ;;  %1106 = vperm.xlu0 %4738, %v1101_v60   ;;  %vm5456_vm8 = vcmp.ne.s32.totalorder %v2310_v48, 0  ;;  %v1430_v25 = vperm.slane %v5357_v34, 4  ;;  %v2643_v60 = vperm.slane %v5114_v50, 0  ;;  %v11895_v48 = vmov 0 }
 0x30d   :  { %vm5384_vm9 = vmor %vm11697_vm10, %vm2896_vm5  ;;  %1393 = vperm.xlu1 %4736, %v1388_v38   ;;  %vm5424_vm5 = vcmp.eq.s32.totalorder %v2642_v36, 1  ;;  %vm5441_vm10 = vcmp.ne.s32.totalorder %v2054_v15, 0  ;;  %v2056_v36 = vrot.slane %v5114_v50, 7  ;;  %v2051_v15 = vrot.slane %v5114_v50, 2 }
 0x30e   :  { %vm5401_vm4 = vmor %vm1742_vm15, %vm5332_vm12  ;;  %v5405_v38 = vpop.permute.xlu2 %889  ;;  %v5407_v54 = vpop.permute.xlu0 %910  ;;  %v3152_v14 = vsel %vm5384_vm9, 1, %v11715_v51  ;;  %v11923_v34 = vmov 0 }
 0x30f   :  { %vm5416_vm13 = vmor %vm1742_vm15, %vm5353_vm14  ;;  %vm11701_vm12 = vcmp.gt.f32.partialorder %v5405_v38, %v4977_v1  ;;  %vm11698_vm0 = vcmp.eq.f32.partialorder %v5405_v38, %v4977_v1  ;;  %vm5437_vm14 = vcmp.eq.s32.totalorder %v3523_v37, 1  ;;  %v3278_v32 = vadd.s32 %v3280_v23, %v3152_v14 }
 0x310   :  { %v11865_v11 = vsel %vm5416_vm13, 4294967295, %v11864_v11  ;;  %vm2897_vm15 = vmand %vm11698_vm0, %vm5339_vm6  ;;  %v11869_v17 = vsel %vm5437_vm14, 4294967295, %v11868_v17  ;;  %vm5452_vm0 = vcmp.eq.s32.totalorder %v2646_v44, 1  ;;  %v2534_v44 = vsel %vm5441_vm10, 1, %v11715_v51 }
 0x311   :  { %vm3025_vm9 = vmor %vm11701_vm12, %vm2897_vm15  ;;  %vm11702_vm15 = vcmp.gt.f32.partialorder %v5407_v54, %v4977_v1  ;;  %vm11879_vm12 = vcmp.eq.f32.partialorder %v5260_v47, %v4977_v1  ;;  %v3413_v14 = vsel %vm5456_vm8, 1, %v11715_v51  ;;  %v5509_v19 = vsel %vm5401_vm4, 1, %v11715_v51 }
 0x312   :  { %vm5466_vm14 = vmand %vm11876_vm3, %vm5280_vm2  ;;  %v3153_v37 = vsel %vm3025_vm9, 1, %v11715_v51  ;;  %vm11882_vm3 = vcmp.eq.f32.partialorder %v5407_v54, %v4977_v1  ;;  %vm5519_vm8 = vcmp.ne.s32.totalorder %v2056_v36, 0  ;;  %v2648_v36 = vperm.slane %v2534_v44, 0 }
 0x313   :  { %vm5480_vm6 = vmand %vm11879_vm12, %vm5303_vm11  ;;  %v3282_v23 = vadd.s32 %v3278_v32, %v3153_v37  ;;  %vm5498_vm11 = vcmp.eq.s32.totalorder %v3521_v4, 1  ;;  %v3522_v4 = vperm.slane %v5150_v5, 0  ;;  %vm5538_vm12 = vcmp.ne.s32.totalorder %v2312_v16, 0 }
 0x314   :  { %vm2900_vm2 = vmand %vm11882_vm3, %vm5388_vm7  ;;  %1043 = vperm.xlu2 %4737, %v1038_v26   ;;  %1120 = vperm.xlu0 %4738, %v1115_v62   ;;  %vm11887_vm7 = vcmp.gt.f32.partialorder %v5258_v46, %v4977_v1  ;;  %vm5542_vm9 = vcmp.ne.s32.totalorder %v2051_v15, 0  ;;  %v3527_v44 = vperm.slane %v3413_v14, 0  ;;  %v3415_v13 = vsel %vm5538_vm12, 1, %v11715_v51 }
 0x315   :  { %vm3028_vm10 = vmor %vm11702_vm15, %vm2900_vm2  ;;  %1414 = vperm.xlu1 %4736, %v1409_v58   ;;  %vm11897_vm2 = vcmp.eq.f32.partialorder %v5405_v38, %v4977_v1  ;;  %v2053_v32 = vrot.slane %v5114_v50, 4  ;;  %v2531_v0 = vsel %vm5542_vm9, 1, %v11715_v51  ;;  %vm5644_vm13 = vcmp.eq.s32.totalorder %v3522_v4, 1 }
 0x316   :  { %vm5529_vm4 = vmor %vm11887_vm7, %vm5466_vm14  ;;  %v3156_v37 = vsel %vm3028_vm10, 1, %v11715_v51  ;;  %v5534_v58 = vpop.permute.xlu2 %896  ;;  %v5536_v26 = vpop.permute.xlu0 %924  ;;  %vm11894_vm14 = vcmp.gt.f32.partialorder %v5260_v47, %v4977_v1  ;;  %v3529_v39 = vperm.slane %v3415_v13, 0  ;;  %vm11922_vm9 = vcmp.gt.f32.partialorder %v5407_v54, %v4977_v1 }
 0x317   :  { %v11889_v33 = vsel %vm5529_vm4, 4294967295, %v11888_v33  ;;  %vm5551_vm3 = vmor %vm11894_vm14, %vm5480_vm6  ;;  %v3284_v15 = vadd.s32 %v3282_v23, %v3156_v37  ;;  %vm11704_vm7 = vcmp.gt.f32.partialorder %v5534_v58, %v4977_v1  ;;  %vm11703_vm15 = vcmp.eq.f32.partialorder %v5534_v58, %v4977_v1 }
 0x318   :  { %v11896_v48 = vsel %vm5551_vm3, 4294967295, %v11895_v48  ;;  %vm5560_vm10 = vmand %vm11897_vm2, %vm5371_vm1  ;;  %vm5568_vm6 = vcmp.eq.s32.totalorder %v3525_v10, 1  ;;  %v2536_v23 = vsel %vm5519_vm8, 1, %v11715_v51  ;;  %vm11706_vm2 = vcmp.eq.f32.partialorder %v5536_v26, %v4977_v1 }
 0x319   :  { %vm2898_vm1 = vmand %vm11703_vm15, %vm5424_vm5  ;;  %vm5591_vm5 = vcmp.ne.s32.totalorder %v2307_v55, 0  ;;  %vm11904_vm8 = vcmp.gt.f32.partialorder %v5405_v38, %v4977_v1  ;;  %v11905_v10 = vmov 0  ;;  %v2309_v55 = vrot.slane %v5150_v5, 4 }
 0x31a   :  { %vm3026_vm14 = vmor %vm11704_vm7, %vm2898_vm1  ;;  %vm11907_vm1 = vnez %v11869_v17  ;;  %vm11908_vm7 = vcmp.eq.f32.partialorder %v5407_v54, %v4977_v1  ;;  %vm5658_vm12 = vcmp.ne.s32.totalorder %v2053_v32, 0  ;;  %v2055_v62 = vrot.slane %v5114_v50, 6 }
 0x31b   :  { %vm5601_vm15 = vmor %vm11904_vm8, %vm5560_vm10  ;;  %v3154_v37 = vsel %vm3026_vm14, 1, %v11715_v51  ;;  %vm5621_vm14 = vcmp.eq.s32.totalorder %v2648_v36, 1  ;;  %vm5625_vm8 = vcmp.eq.s32.totalorder %v2643_v60, 1  ;;  %v2650_v36 = vperm.slane %v2536_v23, 0 }
 0x31c   :  { %v11906_v10 = vsel %vm5601_vm15, 4294967295, %v11905_v10  ;;  %vm5617_vm10 = vmand %vm11908_vm7, %vm11907_vm1  ;;  %v3286_v3 = vadd.s32 %v3284_v15, %v3154_v37  ;;  %1057 = vperm.xlu2 %4737, %v1052_v28   ;;  %1134 = vperm.xlu0 %4738, %v1129_v24   ;;  %vm5640_vm1 = vcmp.eq.s32.totalorder %v3527_v44, 1  ;;  %v2645_v28 = vperm.slane %v2531_v0, 0 }
 0x31d   :  { %vm2902_vm7 = vmand %vm11706_vm2, %vm5452_vm0  ;;  %vm11919_vm0 = vcmp.gt.f32.partialorder %v5536_v26, %v4977_v1  ;;  %1435 = vperm.xlu1 %4736, %v1430_v25   ;;  %v3410_v24 = vsel %vm5591_vm5, 1, %v11715_v51  ;;  %vm5676_vm5 = vcmp.ne.s32.totalorder %v2309_v55, 0  ;;  %v2635_v55 = vperm.slane %v5033_v52, 0 }
 0x31e   :  { %vm3030_vm2 = vmor %vm11919_vm0, %vm2902_vm7  ;;  %v5672_v15 = vpop.permute.xlu0 %938  ;;  %v5674_v44 = vpop.permute.xlu2 %903  ;;  %vm11927_vm7 = vcmp.lt.s32.totalorder %v812_v9, %v4970_v42  ;;  %v3524_v0 = vperm.slane %v3410_v24, 0  ;;  %v2533_v16 = vsel %vm5658_vm12, 1, %v11715_v51  ;;  %vm5746_vm12 = vcmp.eq.s32.totalorder %v2645_v28, 1 }
 0x31f   :  { %vm5667_vm4 = vmor %vm11922_vm9, %vm5617_vm10  ;;  %v3158_v25 = vsel %vm3030_vm2, 1, %v11715_v51  ;;  %v5683_v37 = vsel %vm11927_vm7, 1, %v11715_v51  ;;  %vm11928_vm10 = vcmp.le.s32.totalorder %v812_v9, %v4970_v42  ;;  %vm11929_vm2 = vcmp.eq.f32.partialorder %v5534_v58, %v4977_v1 }
 0x320   :  { %v11924_v34 = vsel %vm5667_vm4, 4294967295, %v11923_v34  ;;  %v5688_v13 = vsel %vm11928_vm10, 1, %v11715_v51  ;;  %vm5695_vm9 = vmand %vm11929_vm2, %vm5498_vm11  ;;  %v3277_v32 = vadd.s32 %v3286_v3, %v3158_v25  ;;  %vm11709_vm0 = vcmp.gt.f32.partialorder %v5672_v15, %v4977_v1 }
 0x321   :  { %vm1879_vm7 = vcmp.eq.f32.partialorder %v5672_v15, %v4977_v1  ;;  %v816_v9 = vadd.s32 48, %v4981_v2  ;;  %vm5709_vm4 = vcmp.eq.s32.totalorder %v2650_v36, 1  ;;  %vm5713_vm11 = vcmp.eq.s32.totalorder %v3529_v39, 1 }
 0x322   :  { %vm2904_vm10 = vmand %vm1879_vm7, %vm5621_vm14  ;;  %v5729_v36 = vsel %vm5676_vm5, 1, %v11715_v51  ;;  %v2057_v39 = vrot.slane %v5683_v37, 1  ;;  %v2313_v24 = vrot.slane %v5688_v13, 1  ;;  %vm11936_vm14 = vcmp.eq.f32.partialorder %v5536_v26, %v4977_v1 }
 0x323   :  { %vm3032_vm2 = vmor %vm11709_vm0, %vm2904_vm10  ;;  %v3514_v28 = vperm.slane %v5036_v53, 0  ;;  %v11944_v17 = vmov 0  ;;  %v11946_v53 = vmov 0  ;;  %v2647_v14 = vperm.slane %v2533_v16, 0 }
 0x324   :  { %vm5741_vm10 = vmand %vm11936_vm14, %vm5568_vm6  ;;  %v3160_v25 = vsel %vm3032_vm2, 1, %v11715_v51  ;;  %vm11943_vm14 = vcmp.gt.f32.partialorder %v5534_v58, %v4977_v1  ;;  %1071 = vperm.xlu2 %4737, %v1066_v63   ;;  %1148 = vperm.xlu0 %4738, %v1143_v29   ;;  %v11949_v50 = vmov 0  ;;  %vm5795_vm2 = vcmp.eq.s32.totalorder %v2635_v55, 1 }
 0x325   :  { %v3281_v40 = vadd.s32 %v3277_v32, %v3160_v25  ;;  %vm5756_vm5 = vmand %vm1879_vm7, %vm5640_vm1  ;;  %vm5780_vm7 = vcmp.eq.s32.totalorder %v3524_v0, 1  ;;  %v1472_v32 = vperm.slane %v5721_v21, 2  ;;  %v3526_v25 = vperm.slane %v5729_v36, 0  ;;  %1456 = vperm.xlu1 %4736, %v1451_v31  }
 0x326   :  { %vm5772_vm1 = vmor %vm11943_vm14, %vm5695_vm9  ;;  %v11947_v53 = vsel %vm5780_vm7, 4294967295, %v11946_v53  ;;  %vm11948_vm9 = vcmp.gt.f32.partialorder %v5536_v26, %v4977_v1  ;;  %v11951_v63 = vmov 0  ;;  %vm5799_vm6 = vcmp.ne.s32.totalorder %v2057_v39, 0  ;;  %v5829_v39 = vpop.permute.xlu2 %917 }
 0x327   :  { %v11945_v17 = vsel %vm5772_vm1, 4294967295, %v11944_v17  ;;  %vm5791_vm14 = vmor %vm11948_vm9, %vm5741_vm10  ;;  %v11952_v63 = vsel %vm5795_vm2, 4294967295, %v11951_v63  ;;  %vm5803_vm0 = vcmp.ne.s32.totalorder %v2313_v24, 0  ;;  %v2311_v16 = vrot.slane %v5150_v5, 6  ;;  %v5827_v5 = vpop.permute.xlu0 %952 }
 0x328   :  { %v11950_v50 = vsel %vm5791_vm14, 4294967295, %v11949_v50  ;;  %vm11957_vm10 = vcmp.gt.f32.partialorder %v5672_v15, %v4977_v1  ;;  %v11958_v31 = vmov 0  ;;  %vm11960_vm15 = vcmp.eq.f32.partialorder %v5674_v44, %v4977_v1 }
 0x329   :  { %vm5814_vm9 = vmor %vm11957_vm10, %vm5756_vm5  ;;  %vm5831_vm2 = vcmp.ne.s32.totalorder %v2055_v62, 0  ;;  %v2059_v4 = vrot.slane %v5683_v37, 3  ;;  %vm11965_vm5 = vcmp.lt.s32.totalorder %v816_v9, %v4970_v42  ;;  %vm11714_vm7 = vcmp.gt.f32.partialorder %v5827_v5, %v4977_v1  ;;  %v5908_v60 = vpop.permute.xlu1 %847 }
 0x32a   :  { %v11959_v31 = vsel %vm5814_vm9, 4294967295, %v11958_v31  ;;  %vm5823_vm3 = vmand %vm11960_vm15, %vm5625_vm8  ;;  %v5839_v43 = vsel %vm11965_vm5, 1, %v11715_v51  ;;  %vm1881_vm5 = vcmp.eq.f32.partialorder %v5827_v5, %v4977_v1  ;;  %vm5857_vm14 = vcmp.eq.s32.totalorder %v3514_v28, 1 }
 0x32b   :  { %vm11966_vm10 = vmmov %vm11960_vm15  ;;  %v2315_v36 = vrot.slane %v5688_v13, 3  ;;  %v2537_v52 = vsel %vm5799_vm6, 1, %v11715_v51  ;;  %v3416_v28 = vsel %vm5803_vm0, 1, %v11715_v51  ;;  %vm11717_vm15 = vcmp.eq.f32.partialorder %v5829_v39, %v4977_v1 }
 0x32c   :  { %vm5849_vm9 = vmand %vm11966_vm10, %vm5644_vm13  ;;  %vm5882_vm8 = vcmp.eq.s32.totalorder %v2647_v14, 1  ;;  %v2087_v0 = vrot.slane %v5839_v43, 3  ;;  %vm11976_vm0 = vcmp.le.s32.totalorder %v816_v9, %v4970_v42  ;;  %vm11977_vm6 = vcmp.gt.f32.partialorder %v5674_v44, %v4977_v1  ;;  %1085 = vperm.xlu2 %4737, %v1080_v12   ;;  %1162 = vperm.xlu0 %4738, %v1157_v41  }
 0x32d   :  { %vm2906_vm13 = vmand %vm1881_vm5, %vm5709_vm4  ;;  %vm5886_vm4 = vcmp.ne.s32.totalorder %v2311_v16, 0  ;;  %v5894_v49 = vsel %vm11976_vm0, 1, %v11715_v51  ;;  %v2535_v9 = vsel %vm5831_vm2, 1, %v11715_v51  ;;  %vm5913_vm0 = vcmp.ne.s32.totalorder %v2059_v4, 0  ;;  %1477 = vperm.xlu1 %4736, %v1472_v32  }
 0x32e   :  { %vm3034_vm10 = vmor %vm11714_vm7, %vm2906_vm13  ;;  %vm11718_vm7 = vcmp.gt.f32.partialorder %v5829_v39, %v4977_v1  ;;  %v2652_v4 = vperm.slane %v2537_v52, 0  ;;  %v3531_v18 = vperm.slane %v3416_v28, 0  ;;  %v1493_v3 = vperm.slane %v5721_v21, 5  ;;  %v5984_v28 = vpop.permute.xlu2 %931 }
 0x32f   :  { %vm5901_vm13 = vmor %vm11977_vm6, %vm5823_vm3  ;;  %v3162_v16 = vsel %vm3034_vm10, 1, %v11715_v51  ;;  %vm5935_vm10 = vcmp.ne.s32.totalorder %v2315_v36, 0  ;;  %v11991_v52 = vmov 0   ;;  %v2343_v36 = vrot.slane %v5894_v49, 3  ;;  %v5986_v29 = vpop.permute.xlu0 %966 }
 0x330   :  { %vm11982_vm3 = vmmov %vm11977_vm6  ;;  %v3288_v45 = vadd.s32 %v3281_v40, %v3162_v16  ;;  %v3414_v23 = vsel %vm5886_vm4, 1, %v11991_v52  ;;  %v2649_v12 = vperm.slane %v2535_v9, 0  ;;  %v2539_v41 = vsel %vm5913_vm0, 1, %v11991_v52  ;;  %v6061_v9 = vld [vmem:[#allocation3 + $0x60] sm:$0xff] }
 0x331   :  { %vm5922_vm6 = vmor %vm11982_vm3, %vm5849_vm9  ;;  %vm5968_vm3 = vcmp.ne.s32.totalorder %v2087_v0, 0  ;;  %vm11994_vm4 = vcmp.gt.f32.partialorder %v5827_v5, %v4977_v1  ;;  %v3418_v0 = vsel %vm5935_vm10, 1, %v11991_v52  ;;  %v2061_v16 = vrot.slane %v5683_v37, 5 }
 0x332   :  { %vm5931_vm2 = vmand %vm1881_vm5, %vm5713_vm11  ;;  %vm5951_vm11 = vcmp.eq.s32.totalorder %v3526_v25, 1  ;;  %vm11719_vm5 = vcmp.eq.f32.partialorder %v5908_v60, %v4977_v1  ;;  %v3528_v62 = vperm.slane %v3414_v23, 0  ;;  %vm12004_vm10 = vnez %v11952_v63 }
 0x333   :  { %vm2901_vm9 = vmand %vm11717_vm15, %vm5746_vm12  ;;  %vm6013_vm0 = vcmp.eq.s32.totalorder %v3531_v18, 1  ;;  %v2317_v23 = vrot.slane %v5688_v13, 5  ;;  %v12019_v14 = vperm.slane %v5152_v7, 7  ;;  %v2346_v8 = vrot.slane %v5894_v49, 6 }
 0x334   :  { %vm3029_vm12 = vmor %vm11718_vm7, %vm2901_vm9  ;;  %vm6004_vm7 = vcmp.eq.s32.totalorder %v2652_v4, 1  ;;  %v2567_v4 = vsel %vm5968_vm3, 1, %v11991_v52  ;;  %vm12013_vm3 = vcmp.eq.f32.partialorder %v5908_v60, %v4977_v1  ;;  %v1514_v63 = vperm.slane %v6061_v9, 0 }
 0x335   :  { %vm5977_vm15 = vmor %vm11994_vm4, %vm5931_vm2  ;;  %v3157_v32 = vsel %vm3029_vm12, 1, %v11991_v52  ;;  %vm11998_vm2 = vnez %v11947_v53  ;;  %vm11999_vm12 = vcmp.eq.f32.partialorder %v5829_v39, %v4977_v1  ;;  %v2654_v53 = vperm.slane %v2539_v41, 0  ;;  %1176 = vperm.xlu0 %4738, %v12019_v14   ;;  %v6090_v14 = vld [vmem:[#allocation11] sm:$0xff]  ;;  %1498 = vperm.xlu1 %4736, %v1493_v3  }
 0x336   :  { %v3285_v55 = vadd.s32 %v3288_v45, %v3157_v32  ;;  %vm6000_vm4 = vmand %vm11999_vm12, %vm11998_vm2  ;;  %v12005_v45 = vmov 0  ;;  %vm6017_vm2 = vcmp.ne.s32.totalorder %v2343_v36, 0  ;;  %v3533_v36 = vperm.slane %v3418_v0, 0 }
 0x337   :  { %vm2891_vm9 = vmand %vm11719_vm5, %vm12004_vm10  ;;  %v12006_v45 = vsel %vm6013_vm0, 4294967295, %v12005_v45  ;;  %vm12010_vm10 = vcmp.gt.f32.partialorder %v5908_v60, %v4977_v1  ;;  %vm6033_vm0 = vcmp.eq.s32.totalorder %v2649_v12, 1  ;;  %v3155_v0 = vsel %vm5901_vm13, 1, %v11991_v52  ;;  %v6147_v40 = vpop.permute.xlu0 %980 }
 0x338   :  { %vm3019_vm5 = vmor %vm12010_vm10, %vm2891_vm9  ;;  %vm11724_vm9 = vcmp.gt.f32.partialorder %v5984_v28, %v4977_v1  ;;  %vm6046_vm10 = vcmp.ne.s32.totalorder %v2061_v16, 0  ;;  %v2686_v57 = vperm.slane %v2567_v4, 0  ;;  %v3446_v16 = vsel %vm6017_vm2, 1, %v11991_v52 }
 0x339   :  { %v3147_v21 = vsel %vm3019_vm5, 1, %v11991_v52  ;;  %vm3770_vm12 = vmand %vm12013_vm3, %vm5857_vm14  ;;  %vm12016_vm5 = vcmp.gt.f32.partialorder %v5908_v60, %v4977_v1  ;;  %vm12017_vm14 = vcmp.eq.f32.partialorder %v5984_v28, %v4977_v1  ;;  %vm6077_vm2 = vcmp.ne.s32.totalorder %v2317_v23, 0 }
 0x33a   :  { %v3275_v41 = vadd.s32 %v5509_v19, %v3147_v21  ;;  %vm3898_vm1 = vmor %vm12016_vm5, %vm3770_vm12  ;;  %v12018_v19 = vperm.slane %v5064_v20, 4  ;;  %vm6073_vm12 = vcmp.eq.s32.totalorder %v3528_v62, 1  ;;  %vm11723_vm3 = vcmp.eq.f32.partialorder %v5986_v29, %v6090_v14 }
 0x33b   :  { %v4026_v35 = vsel %vm3898_vm1, %v5908_v60, 0.0  ;;  %vm2903_vm13 = vmand %vm12017_vm14, %vm5882_vm8  ;;  %v2090_v60 = vrot.slane %v5839_v43, 6  ;;  %vm12024_vm1 = vnez %v11823_v30  ;;  %vm6094_vm5 = vcmp.eq.s32.totalorder %v2654_v53, 1  ;;  %v6116_v53 = vpop.permute.xlu2 %945 }
 0x33c   :  { %1099 = vperm.xlu2 %4737, %v12018_v19   ;;  %v12025_v21 = vsel %vm12024_vm1, %v5044_v61, 0.0  ;;  %vm3031_vm8 = vmor %vm11724_vm9, %vm2903_vm13  ;;  %v3279_v62 = vadd.s32 %v3275_v41, %v3155_v0  ;;  %v2541_v61 = vsel %vm6046_vm10, 1, %v11991_v52  ;;  %vm12028_vm14 = vcmp.gt.f32.partialorder %v5829_v39, %v4977_v1 }
 0x33d   :  { %v4154_v19 = vadd.f32 %v12025_v21, %v4026_v35  ;;  %vm6109_vm13 = vmor %vm12028_vm14, %vm6000_vm4  ;;  %v3159_v3 = vsel %vm3031_vm8, 1, %v11991_v52  ;;  %vm11726_vm1 = vcmp.gt.f32.partialorder %v5986_v29, %v6090_v14  ;;  %vm12031_vm10 = vnez %v11835_v56  ;;  %1519 = vperm.xlu1 %4736, %v1514_v63  }
 0x33e   :  { %v12032_v24 = vsel %vm12031_vm10, %v5067_v22, 0.0  ;;  %v3283_v0 = vadd.s32 %v3279_v62, %v3159_v3  ;;  %vm12033_vm4 = vcmp.eq.f32.partialorder %v5984_v28, %v4977_v1  ;;  %v3565_v12 = vperm.slane %v3446_v16, 0  ;;  %vm2908_vm8 = vmand %vm11723_vm3, %vm6004_vm7 }
 0x33f   :  { %v4155_v41 = vadd.f32 %v4154_v19, %v12032_v24  ;;  %vm6128_vm14 = vmand %vm12033_vm4, %vm5951_vm11  ;;  %v3420_v35 = vsel %vm6077_vm2, 1, %v11991_v52  ;;  %v4041_v22 = vsel %vm5977_vm15, %v5827_v5, 0.0  ;;  %vm6143_vm10 = vcmp.eq.s32.totalorder %v3533_v36, 1 }
 0x340   :  { %v2656_v16 = vperm.slane %v2541_v61, 0  ;;  %vm6149_vm11 = vcmp.ne.s32.totalorder %v2090_v60, 0  ;;  %vm6153_vm2 = vcmp.ne.s32.totalorder %v2346_v8, 0  ;;  %vm12042_vm4 = vnez %v11889_v33  ;;  %vm3036_vm7 = vmor %vm11726_vm1, %vm2908_vm8 }
 0x341   :  { %v12043_v51 = vsel %vm12042_vm4, %v5258_v46, 0.0  ;;  %v3290_v36 = vadd.s32 %v3285_v55, %v3283_v0  ;;  %vm6166_vm9 = vcmp.eq.s32.totalorder %v2686_v57, 1  ;;  %v6171_v8 = vadd.s32 56, %v4981_v2 }
 0x342   :  { %v4156_v62 = vadd.f32 %v4155_v41, %v12043_v51  ;;  %vm12046_vm4 = vcmp.gt.f32.partialorder %v5984_v28, %v4977_v1  ;;  %v3164_v33 = vsel %vm3036_vm7, 1, %v11991_v52  ;;  %vm11728_vm8 = vcmp.gt.f32.partialorder %v6116_v53, %v6090_v14 }
 0x343   :  { %vm6178_vm15 = vmor %vm12046_vm4, %vm6128_vm14  ;;  %v3535_v55 = vperm.slane %v3420_v35, 0  ;;  %v2063_v57 = vrot.slane %v5683_v37, 7  ;;  %vm12049_vm1 = vnez %v11865_v11  ;;  %v3292_v24 = vadd.s32 %v3290_v36, %v3164_v33 }
 0x344   :  { %v12050_v61 = vsel %vm12049_vm1, %v5134_v59, 0.0  ;;  %vm12051_vm3 = vnez %v12006_v45  ;;  %vm12052_vm14 = vcmp.eq.f32.partialorder %v5986_v29, %v6090_v14  ;;  %vm6199_vm7 = vcmp.eq.s32.totalorder %v3565_v12, 1  ;;  %v6213_v45 = vpop.permute.xlu1 %1204 }
 0x345   :  { %v4157_v3 = vadd.f32 %v4156_v62, %v12050_v61  ;;  %vm6195_vm4 = vmand %vm12052_vm14, %vm12051_vm3  ;;  %v12055_v41 = vmov 0  ;;  %v2651_v35 = vperm.slane %v5683_v37, 0  ;;  %v2319_v11 = vrot.slane %v5688_v13, 7 }
 0x346   :  { %v12056_v41 = vsel %vm6199_vm7, 4294967295, %v12055_v41  ;;  %v4036_v59 = vsel %vm6109_vm13, %v5829_v39, 0.0  ;;  %vm12057_vm3 = vcmp.eq.f32.partialorder %v6116_v53, %v6090_v14  ;;  %v12058_v12 = vperm.slane %v5064_v20, 6 }
 0x347   :  { %vm2905_vm1 = vmand %vm12057_vm3, %vm6033_vm0  ;;  %v12059_v0 = vperm.slane %v5003_v27, 1  ;;  %v3530_v21 = vperm.slane %v5688_v13, 0  ;;  %v2570_v51 = vsel %vm6149_vm11, 1, %v11991_v52  ;;  %v6226_v18 = vsel %vm6153_vm2, 1, %v11991_v52 }
 0x348   :  { %1113 = vperm.xlu2 %4737, %v12058_v12   ;;  %vm12060_vm0 = vnez %v11896_v48  ;;  %vm3033_vm14 = vmor %vm11728_vm8, %vm2905_vm1  ;;  %vm6237_vm13 = vcmp.eq.s32.totalorder %v2656_v16, 1  ;;  %v12062_v32 = vmov 0  ;;  %v2058_v19 = vrot.slane %v5683_v37, 2  ;;  %v6318_v12 = vpop.permute.xlu0 %994 }
 0x349   :  { %1190 = vperm.xlu0 %4738, %v12059_v0   ;;  %v12061_v62 = vsel %vm12060_vm0, %v5260_v47, 0.0  ;;  %v12063_v32 = vsel %vm6237_vm13, 4294967295, %v12062_v32  ;;  %vm2018_vm11 = vcmp.lt.s32.totalorder %v6171_v8, %v4970_v42  ;;  %vm12064_vm2 = vcmp.gt.f32.partialorder %v5986_v29, %v6090_v14  ;;  %v6320_v0 = vpop.permute.xlu2 %959 }
 0x34a   :  { %v4158_v20 = vadd.f32 %v4157_v3, %v12061_v62  ;;  %vm6249_vm0 = vmor %vm12064_vm2, %vm6195_vm4  ;;  %v3161_v48 = vsel %vm3033_vm14, 1, %v11991_v52  ;;  %vm6256_vm8 = vcmp.ne.s32.totalorder %v2063_v57, 0  ;;  %v2314_v16 = vrot.slane %v5688_v13, 2 }
 0x34b   :  { %vm12069_vm3 = vnez %v11906_v10  ;;  %v3287_v61 = vadd.s32 %v3292_v24, %v3161_v48  ;;  %vm12071_vm4 = vcmp.eq.f32.partialorder %v6116_v53, %v6090_v14  ;;  %vm6270_vm2 = vcmp.eq.s32.totalorder %v3535_v55, 1 }
 0x34c   :  { %v12070_v36 = vsel %vm12069_vm3, %v5405_v38, 0.0  ;;  %vm3784_vm14 = vmand %vm12071_vm4, %vm6073_vm12  ;;  %v12072_v3 = vmov 0  ;;  %vm6274_vm1 = vcmp.ne.s32.totalorder %v2319_v11, 0  ;;  %vm12076_vm3 = vcmp.eq.f32.partialorder %v6147_v40, %v6090_v14  ;;  %v6394_v57 = vpop.permute.xlu1 %1225 }
 0x34d   :  { %v4159_v33 = vadd.f32 %v4158_v20, %v12070_v36  ;;  %v12073_v3 = vsel %vm6270_vm2, 4294967295, %v12072_v3  ;;  %vm2910_vm13 = vmand %vm12076_vm3, %vm6094_vm5  ;;  %v2689_v38 = vperm.slane %v2570_v51, 0  ;;  %v3568_v10 = vperm.slane %v6226_v18, 0 }
 0x34e   :  { %v1535_v4 = vperm.slane %v6061_v9, 3  ;;  %v6286_v55 = vsel %vm2018_vm11, 1, %v11991_v52  ;;  %vm12077_vm12 = vnez %v11945_v17  ;;  %vm12079_vm4 = vcmp.gt.f32.partialorder %v6147_v40, %v6090_v14 }
 0x34f   :  { %v12078_v24 = vsel %vm12077_vm12, %v5534_v58, 0.0  ;;  %vm3038_vm2 = vmor %vm12079_vm4, %vm2910_vm13  ;;  %vm1917_vm5 = vcmp.eq.f32.partialorder %v6213_v45, %v6090_v14  ;;  %vm6297_vm3 = vcmp.eq.s32.totalorder %v2651_v35, 1  ;;  %v2543_v11 = vsel %vm6256_vm8, 1, %v11991_v52 }
 0x350   :  { %v4160_v1 = vadd.f32 %v4159_v33, %v12078_v24  ;;  %vm6304_vm11 = vcmp.ne.s32.totalorder %v2058_v19, 0  ;;  %vm12084_vm12 = vcmp.gt.f32.partialorder %v6116_v53, %v6090_v14  ;;  %v3166_v35 = vsel %vm3038_vm2, 1, %v11991_v52  ;;  %1540 = vperm.xlu1 %4736, %v1535_v4  }
 0x351   :  { %vm6311_vm7 = vmor %vm12084_vm12, %vm3784_vm14  ;;  %vm1789_vm13 = vcmp.gt.f32.partialorder %v6213_v45, %v6090_v14  ;;  %v3422_v51 = vsel %vm6274_vm1, 1, %v11991_v52  ;;  %vm6325_vm8 = vcmp.ne.s32.totalorder %v2314_v16, 0  ;;  %v12089_v62 = vsel %vm5922_vm6, %v5674_v44, 0.0 }
 0x352   :  { %v4161_v20 = vadd.f32 %v4160_v1, %v12089_v62  ;;  %v3294_v19 = vadd.s32 %v3287_v61, %v3166_v35  ;;  %vm12090_vm14 = vcmp.eq.f32.partialorder %v6147_v40, %v6090_v14  ;;  %v2092_v63 = vrot.slane %v6286_v55, 1  ;;  %vm2942_vm6 = vmand %vm1917_vm5, %vm6166_vm9 }
 0x353   :  { %vm6338_vm2 = vmand %vm12090_vm14, %vm6143_vm10  ;;  %vm2274_vm1 = vcmp.le.s32.totalorder %v6171_v8, %v4970_v42  ;;  %v4038_v6 = vsel %vm6178_vm15, %v5984_v28, 0.0  ;;  %vm6353_vm4 = vcmp.eq.s32.totalorder %v3530_v21, 1  ;;  %v12095_v56 = vperm.slane %v5152_v7, 0 }
 0x354   :  { %v12096_v16 = vperm.slane %v5003_v27, 4  ;;  %v2658_v36 = vperm.slane %v2543_v11, 0  ;;  %v2538_v28 = vsel %vm6304_vm11, 1, %v11991_v52  ;;  %vm12097_vm15 = vnez %v11924_v34  ;;  %vm6371_vm9 = vmor %vm1789_vm13, %vm2942_vm6 }
 0x355   :  { %1127 = vperm.xlu2 %4737, %v12095_v56   ;;  %v12098_v60 = vsel %vm12097_vm15, %v5407_v54, 0.0  ;;  %vm1887_vm10 = vcmp.eq.f32.partialorder %v6318_v12, %v6090_v14  ;;  %vm6377_vm12 = vcmp.eq.s32.totalorder %v2689_v38, 1  ;;  %v3537_v61 = vperm.slane %v3422_v51, 0 }
 0x356   :  { %1211 = vperm.xlu0 %4738, %v12096_v16   ;;  %v4162_v46 = vadd.f32 %v4161_v20, %v12098_v60  ;;  %v3417_v54 = vsel %vm6325_vm8, 1, %v11991_v52  ;;  %v4043_v34 = vsel %vm6249_vm0, %v5986_v29, 0.0  ;;  %vm12103_vm11 = vnez %v12056_v41 }
 0x357   :  { %vm3821_vm14 = vmand %vm1917_vm5, %vm12103_vm11  ;;  %vm11730_vm6 = vcmp.gt.f32.partialorder %v6318_v12, %v6090_v14  ;;  %v6400_v38 = vsel %vm2274_vm1, 1, %v11991_v52  ;;  %v2060_v4 = vrot.slane %v5683_v37, 4  ;;  %v12105_v24 = vmov 0 }
 0x358   :  { %v4163_v41 = vadd.f32 %v4162_v46, %v4036_v59  ;;  %vm6410_vm5 = vmor %vm1789_vm13, %vm3821_vm14  ;;  %vm6414_vm15 = vcmp.eq.s32.totalorder %v3568_v10, 1  ;;  %v2653_v8 = vperm.slane %v2538_v28, 0  ;;  %vm6418_vm1 = vcmp.ne.s32.totalorder %v2092_v63, 0  ;;  %v6518_v46 = vpop.permute.xlu0 %1008 }
 0x359   :  { %v12106_v24 = vsel %vm6410_vm5, 4294967295, %v12105_v24  ;;  %v813_v30 = vadd.s32 24, %v4981_v2  ;;  %v3198_v39 = vsel %vm6371_vm9, 1, %v11991_v52  ;;  %vm12111_vm13 = vnez %v12063_v32 }
 0x35a   :  { %vm2912_vm11 = vmand %vm1887_vm10, %vm12111_vm13  ;;  %vm11731_vm14 = vcmp.eq.f32.partialorder %v6320_v0, %v6090_v14  ;;  %v3532_v10 = vperm.slane %v3417_v54, 0  ;;  %vm12112_vm8 = vnez %v11950_v50  ;;  %v3289_v51 = vadd.s32 %v3294_v19, %v3198_v39 }
 0x35b   :  { %v12113_v17 = vsel %vm12112_vm8, %v5536_v26, 0.0  ;;  %vm3040_vm9 = vmor %vm11730_vm6, %vm2912_vm11  ;;  %vm6443_vm5 = vcmp.eq.s32.totalorder %v2658_v36, 1  ;;  %v2348_v18 = vrot.slane %v6400_v38, 1  ;;  %v1556_v62 = vperm.slane %v6061_v9, 6 }
 0x35c   :  { %v4164_v35 = vadd.f32 %v4163_v41, %v12113_v17  ;;  %v3168_v20 = vsel %vm3040_vm9, 1, %v11991_v52  ;;  %vm12116_vm13 = vnez %v12073_v3  ;;  %vm11732_vm11 = vcmp.gt.f32.partialorder %v6320_v0, %v6090_v14 }
 0x35d   :  { %vm6455_vm8 = vmand %vm1887_vm10, %vm12116_vm13  ;;  %v2572_v50 = vsel %vm6418_vm1, 1, %v11991_v52  ;;  %vm6464_vm6 = vcmp.ne.s32.totalorder %v2060_v4, 0  ;;  %vm12121_vm10 = vcmp.gt.f32.partialorder %v6147_v40, %v6090_v14  ;;  %v3291_v63 = vadd.s32 %v3289_v51, %v3168_v20  ;;  %1561 = vperm.xlu1 %4736, %v1556_v62  }
 0x35e   :  { %v4165_v19 = vadd.f32 %v4164_v35, %v4038_v6  ;;  %vm6473_vm9 = vmor %vm12121_vm10, %vm6338_vm2  ;;  %v2316_v56 = vrot.slane %v5688_v13, 4  ;;  %vm2014_vm13 = vcmp.lt.s32.totalorder %v813_v30, %v4970_v42  ;;  %v4040_v16 = vsel %vm6311_vm7, %v6116_v53, 0.0  ;;  %v6493_v6 = vpop.permute.xlu2 %973  ;;  %v6570_v35 = vpop.permute.xlu1 %1246 }
 0x35f   :  { %vm2907_vm1 = vmand %vm11731_vm14, %vm6297_vm3  ;;  %vm6489_vm10 = vcmp.eq.s32.totalorder %v3537_v61, 1  ;;  %v12126_v36 = vperm.slane %v5152_v7, 2  ;;  %v12127_v53 = vperm.slane %v5003_v27, 7  ;;  %v6500_v23 = vsel %vm2014_vm13, 1, %v11991_v52 }
 0x360   :  { %vm12128_vm7 = vnez %v11959_v31  ;;  %vm12130_vm3 = vcmp.gt.f32.partialorder %v6318_v12, %v6090_v14  ;;  %vm3035_vm14 = vmor %vm11732_vm11, %vm2907_vm1  ;;  %vm6520_vm13 = vcmp.eq.s32.totalorder %v2653_v8, 1  ;;  %v12133_v31 = vmov 0 }
 0x361   :  { %1141 = vperm.xlu2 %4737, %v12126_v36   ;;  %1232 = vperm.xlu0 %4738, %v12127_v53   ;;  %v12129_v58 = vsel %vm12128_vm7, %v5672_v15, 0.0  ;;  %vm6511_vm2 = vmor %vm12130_vm3, %vm6455_vm8  ;;  %v12134_v31 = vsel %vm6520_vm13, 4294967295, %v12133_v31  ;;  %vm6524_vm7 = vcmp.ne.s32.totalorder %v2348_v18, 0  ;;  %v2540_v21 = vsel %vm6464_vm6, 1, %v11991_v52  ;;  %v6633_v53 = vld [vmem:[#allocation3 + $0x68] sm:$0xff] }
 0x362   :  { %v4166_v28 = vadd.f32 %v4165_v19, %v12129_v58  ;;  %vm2270_vm8 = vcmp.le.s32.totalorder %v813_v30, %v4970_v42  ;;  %v3163_v61 = vsel %vm3035_vm14, 1, %v11991_v52  ;;  %vm12137_vm1 = vcmp.eq.f32.partialorder %v6320_v0, %v6090_v14 }
 0x363   :  { %vm3786_vm3 = vmand %vm12137_vm1, %vm6353_vm4  ;;  %vm1792_vm11 = vcmp.gt.f32.partialorder %v6394_v57, %v6090_v14  ;;  %v2692_v54 = vperm.slane %v2572_v50, 0  ;;  %v6541_v4 = vsel %vm2270_vm8, 1, %v11991_v52  ;;  %v3296_v8 = vadd.s32 %v3291_v63, %v3163_v61 }
 0x364   :  { %v4167_v41 = vadd.f32 %v4166_v28, %v4040_v16  ;;  %vm12138_vm6 = vcmp.gt.f32.partialorder %v6320_v0, %v6090_v14  ;;  %vm6550_vm14 = vcmp.eq.s32.totalorder %v3532_v10, 1  ;;  %vm6554_vm4 = vcmp.ne.s32.totalorder %v2316_v56, 0  ;;  %v12157_v16 = vld [vmem:[#allocation18_spill] sm:$0xff] }
 0x365   :  { %vm6546_vm13 = vmor %vm12138_vm6, %vm3786_vm3  ;;  %v2064_v39 = vrot.slane %v6500_v23, 1  ;;  %v4045_v17 = vsel %vm6473_vm9, %v6147_v40, 0.0  ;;  %vm12145_vm8 = vcmp.eq.f32.partialorder %v6394_v57, %v6090_v14  ;;  %v3451_v10 = vsel %vm6524_vm7, 1, %v11991_v52 }
 0x366   :  { %vm2945_vm1 = vmand %vm12145_vm8, %vm6377_vm12  ;;  %v2655_v51 = vperm.slane %v2540_v21, 0  ;;  %v2320_v18 = vrot.slane %v6541_v4, 1  ;;  %v4168_v62 = vadd.f32 %v4167_v41, %v4041_v22  ;;  %v2095_v33 = vrot.slane %v6286_v55, 4  ;;  %v6656_v29 = vpop.permute.xlu2 %987  ;;  %v6675_v41 = vpop.permute.xlu0 %1022 }
 0x367   :  { %vm3073_vm6 = vmor %vm1792_vm11, %vm2945_vm1  ;;  %v4042_v20 = vsel %vm6546_vm13, %v6320_v0, 0.0  ;;  %v3419_v5 = vsel %vm6554_vm4, 1, %v11991_v52  ;;  %v12147_v22 = vmov 0  ;;  %vm6607_vm7 = vcmp.eq.s32.totalorder %v2692_v54, 1 }
 0x368   :  { %vm3824_vm3 = vmand %vm12145_vm8, %vm6414_vm15  ;;  %v4169_v25 = vadd.f32 %v4168_v62, %v4042_v20  ;;  %v3571_v1 = vperm.slane %v3451_v10, 0  ;;  %vm6611_vm15 = vcmp.ne.s32.totalorder %v2064_v39, 0  ;;  %v3201_v50 = vsel %vm3073_vm6, 1, %v11991_v52  ;;  %v6713_v20 = vpop.permute.xlu1 %1267 }
 0x369   :  { %vm6603_vm13 = vmor %vm1792_vm11, %vm3824_vm3  ;;  %vm12153_vm11 = vcmp.eq.f32.partialorder %v6518_v46, %v6090_v14  ;;  %vm6624_vm8 = vcmp.ne.s32.totalorder %v2320_v18, 0  ;;  %v2351_v63 = vrot.slane %v6400_v38, 4  ;;  %v12156_v56 = vperm.slane %v5152_v7, 4 }
 0x36a   :  { %v12148_v22 = vsel %vm6603_vm13, 4294967295, %v12147_v22  ;;  %vm2914_vm4 = vmand %vm12153_vm11, %vm6443_vm5  ;;  %v12158_v36 = vperm.slane %v12157_v16, 2  ;;  %v4170_v32 = vadd.f32 %v4169_v25, %v4043_v34  ;;  %v3293_v58 = vadd.s32 %v3296_v8, %v3201_v50 }
 0x36b   :  { %1155 = vperm.xlu2 %4737, %v12156_v56   ;;  %vm12159_vm5 = vcmp.gt.f32.partialorder %v6518_v46, %v6090_v14  ;;  %v3534_v28 = vperm.slane %v3419_v5, 0  ;;  %vm6642_vm3 = vcmp.ne.s32.totalorder %v2095_v33, 0  ;;  %vm3793_vm1 = vmand %vm12153_vm11, %vm6489_vm10  ;;  %v2544_v47 = vsel %vm6611_vm15, 1, %v11991_v52 }
 0x36c   :  { %1253 = vperm.xlu0 %4738, %v12158_v36   ;;  %vm3042_vm6 = vmor %vm12159_vm5, %vm2914_vm4  ;;  %vm6668_vm10 = vcmp.eq.s32.totalorder %v2655_v51, 1  ;;  %v3423_v54 = vsel %vm6624_vm8, 1, %v11991_v52  ;;  %v1577_v8 = vperm.slane %v6633_v53, 1  ;;  %v4047_v11 = vsel %vm6511_vm2, %v6318_v12, 0.0 }
 0x36d   :  { %v3170_v21 = vsel %vm3042_vm6, 1, %v11991_v52  ;;  %vm12162_vm4 = vmmov %vm12159_vm5  ;;  %vm12168_vm15 = vcmp.eq.f32.partialorder %v6493_v6, %v6090_v14  ;;  %vm6686_vm11 = vcmp.eq.s32.totalorder %v3571_v1, 1  ;;  %v2575_v10 = vsel %vm6642_vm3, 1, %v11991_v52 }
 0x36e   :  { %v3298_v34 = vadd.s32 %v3293_v58, %v3170_v21  ;;  %vm6664_vm5 = vmor %vm12162_vm4, %vm3793_vm1  ;;  %vm12167_vm1 = vnez %v12134_v31  ;;  %vm6690_vm4 = vcmp.ne.s32.totalorder %v2351_v63, 0  ;;  %vm12173_vm8 = vcmp.gt.f32.partialorder %v6493_v6, %v6090_v14  ;;  %1582 = vperm.xlu1 %4736, %v1577_v8   ;;  %v6811_v8 = vpop.permute.xlu0 %1036 }
 0x36f   :  { %vm2909_vm6 = vmand %vm12168_vm15, %vm12167_vm1  ;;  %vm6700_vm12 = vcmp.eq.s32.totalorder %v3534_v28, 1  ;;  %v2660_v51 = vperm.slane %v2544_v47, 0  ;;  %v2062_v18 = vrot.slane %v5683_v37, 6  ;;  %v3539_v33 = vperm.slane %v3423_v54, 0 }
 0x370   :  { %vm3037_vm0 = vmor %vm12173_vm8, %vm2909_vm6  ;;  %v2318_v5 = vrot.slane %v5688_v13, 6  ;;  %v2066_v25 = vrot.slane %v6500_v23, 3  ;;  %v2695_v37 = vperm.slane %v2575_v10, 0  ;;  %v3454_v44 = vsel %vm6690_vm4, 1, %v11991_v52  ;;  %v6823_v10 = vpop.permute.xlu2 %1001 }
 0x371   :  { %v3165_v62 = vsel %vm3037_vm0, 1, %v11991_v52  ;;  %vm12176_vm3 = vmmov %vm12168_vm15  ;;  %v2322_v26 = vrot.slane %v6541_v4, 3  ;;  %v12179_v13 = vperm.slane %v5152_v7, 6  ;;  %vm12181_vm4 = vcmp.gt.f32.partialorder %v6570_v35, %v6090_v14 }
 0x372   :  { %vm3788_vm15 = vmand %vm12176_vm3, %vm6550_vm14  ;;  %v3300_v1 = vadd.s32 %v3298_v34, %v3165_v62  ;;  %vm12178_vm14 = vcmp.eq.f32.partialorder %v6570_v35, %v6090_v14  ;;  %vm6758_vm3 = vcmp.eq.s32.totalorder %v3539_v33, 1  ;;  %v3574_v56 = vperm.slane %v3454_v44, 0 }
 0x373   :  { %vm12177_vm6 = vmmov %vm12173_vm8  ;;  %1169 = vperm.xlu2 %4737, %v12179_v13   ;;  %vm6779_vm13 = vcmp.eq.s32.totalorder %v2695_v37, 1  ;;  %v2098_v3 = vrot.slane %v6286_v55, 7  ;;  %vm12198_vm9 = vcmp.eq.f32.partialorder %v6656_v29, %v6090_v14  ;;  %v2354_v21 = vrot.slane %v6400_v38, 7 }
 0x374   :  { %vm3916_vm8 = vmor %vm12177_vm6, %vm3788_vm15  ;;  %vm6749_vm15 = vcmp.ne.s32.totalorder %v2062_v18, 0  ;;  %v4049_v47 = vsel %vm6664_vm5, %v6518_v46, 0.0  ;;  %v1598_v18 = vperm.slane %v6633_v53, 4  ;;  %v2324_v19 = vrot.slane %v6541_v4, 5 }
 0x375   :  { %v4044_v50 = vsel %vm3916_vm8, %v6493_v6, 0.0  ;;  %vm2948_vm0 = vmand %vm12178_vm14, %vm6607_vm7  ;;  %v12180_v6 = vperm.slane %v12157_v16, 5  ;;  %vm6743_vm8 = vcmp.eq.s32.totalorder %v2660_v51, 1  ;;  %v2542_v15 = vsel %vm6749_vm15, 1, %v11991_v52 }
 0x376   :  { %v4171_v0 = vadd.f32 %v4170_v32, %v4044_v50  ;;  %vm3076_vm7 = vmor %vm12181_vm4, %vm2948_vm0  ;;  %vm6764_vm4 = vcmp.ne.s32.totalorder %v2318_v5, 0  ;;  %v12192_v32 = vmov 0  ;;  %vm6783_vm0 = vcmp.ne.s32.totalorder %v2322_v26, 0  ;;  %1603 = vperm.xlu1 %4736, %v1598_v18   ;;  %v6942_v39 = vpop.permute.xlu0 %1050 }
 0x377   :  { %1274 = vperm.xlu0 %4738, %v12180_v6   ;;  %vm12186_vm6 = vmmov %vm12178_vm14  ;;  %vm2178_vm14 = vcmp.ne.s32.totalorder %v2066_v25, 0  ;;  %v3204_v40 = vsel %vm3076_vm7, 1, %v11991_v52  ;;  %vm12199_vm7 = vcmp.gt.f32.partialorder %v6656_v29, %v6090_v14  ;;  %v3421_v61 = vsel %vm6764_vm4, 1, %v11991_v52 }
 0x378   :  { %vm3827_vm1 = vmand %vm12186_vm6, %vm6686_vm11  ;;  %v4172_v36 = vadd.f32 %v4171_v0, %v4045_v17  ;;  %vm12191_vm11 = vcmp.gt.f32.partialorder %v6570_v35, %v6090_v14  ;;  %v3295_v34 = vadd.s32 %v3300_v1, %v3204_v40  ;;  %v2546_v54 = vsel %vm2178_vm14, 1, %v11991_v52  ;;  %v6867_v0 = vpop.permute.xlu1 %1288 }
 0x379   :  { %vm6775_vm6 = vmor %vm12191_vm11, %vm3827_vm1  ;;  %v3425_v51 = vsel %vm6783_vm0, 1, %v11991_v52  ;;  %v2657_v31 = vperm.slane %v2542_v15, 0  ;;  %v2068_v5 = vrot.slane %v6500_v23, 5  ;;  %v3536_v1 = vperm.slane %v3421_v61, 0 }
 0x37a   :  { %v12193_v32 = vsel %vm6775_vm6, 4294967295, %v12192_v32  ;;  %vm2911_vm1 = vmand %vm12198_vm9, %vm6668_vm10  ;;  %v2662_v37 = vperm.slane %v2546_v54, 0  ;;  %v12209_v26 = vperm.slane %v5003_v27, 0  ;;  %vm12217_vm2 = vcmp.eq.f32.partialorder %v6713_v20, %v6090_v14 }
 0x37b   :  { %vm3039_vm11 = vmor %vm12199_vm7, %vm2911_vm1  ;;  %vm6832_vm1 = vcmp.ne.s32.totalorder %v2098_v3, 0  ;;  %v818_v3 = vadd.s32 64, %v4981_v2  ;;  %v2070_v33 = vrot.slane %v6500_v23, 7 }
 0x37c   :  { %v3167_v30 = vsel %vm3039_vm11, 1, %v11991_v52  ;;  %vm12200_vm10 = vmmov %vm12198_vm9  ;;  %vm6819_vm9 = vcmp.eq.s32.totalorder %v3574_v56, 1  ;;  %1183 = vperm.xlu2 %4737, %v12209_v26   ;;  %vm12210_vm11 = vcmp.gt.f32.partialorder %v6675_v41, %v6090_v14  ;;  %v2578_v6 = vsel %vm6832_vm1, 1, %v11991_v52 }
 0x37d   :  { %vm3790_vm15 = vmand %vm12200_vm10, %vm6700_vm12  ;;  %v3302_v62 = vadd.s32 %v3295_v34, %v3167_v30  ;;  %vm12206_vm12 = vcmp.eq.f32.partialorder %v6675_v41, %v6090_v14  ;;  %v2698_v28 = vperm.slane %v2578_v6, 0  ;;  %v6931_v34 = vld [vmem:[#allocation3 + $0x40] sm:$0xff]  ;;  %v12231_v30 = vmov 0 }
 0x37e   :  { %vm12203_vm14 = vmmov %vm12199_vm7  ;;  %vm6843_vm7 = vcmp.ne.s32.totalorder %v2354_v21, 0  ;;  %v1290_v61 = vperm.slane %v6931_v34, 0  ;;  %v2659_v6 = vperm.slane %v6500_v23, 0  ;;  %v12270_v26 = vmov 0 }
 0x37f   :  { %vm3918_vm4 = vmor %vm12203_vm14, %vm3790_vm15  ;;  %v3457_v56 = vsel %vm6843_vm7, 1, %v11991_v52  ;;  %vm6897_vm7 = vcmp.eq.s32.totalorder %v3536_v1, 1 }
 0x380   :  { %v4046_v25 = vsel %vm3918_vm4, %v6656_v29, 0.0  ;;  %vm2916_vm0 = vmand %vm12206_vm12, %vm6743_vm8  ;;  %vm1888_vm8 = vcmp.eq.f32.partialorder %v6823_v10, %v6090_v14  ;;  %v3541_v29 = vperm.slane %v3425_v51, 0  ;;  %v3577_v40 = vperm.slane %v3457_v56, 0  ;;  %1295 = vperm.xlu0 %4738, %v1290_v61  }
 0x381   :  { %v4173_v50 = vadd.f32 %v4172_v36, %v4046_v25  ;;  %vm3044_vm10 = vmor %vm12210_vm11, %vm2916_vm0  ;;  %v1619_v51 = vperm.slane %v6633_v53, 7  ;;  %v12233_v53 = vperm.slane %v5003_v27, 2  ;;  %v7100_v27 = vld [vmem:[#allocation3 + $0x70] sm:$0xff] }
 0x382   :  { %v3172_v13 = vsel %vm3044_vm10, 1, %v11991_v52  ;;  %vm12211_vm14 = vmmov %vm12206_vm12  ;;  %vm6893_vm10 = vcmp.eq.s32.totalorder %v2657_v31, 1 }
 0x383   :  { %vm3795_vm4 = vmand %vm12211_vm14, %vm6758_vm3  ;;  %v4174_v63 = vadd.f32 %v4173_v50, %v4047_v11  ;;  %v3297_v7 = vadd.s32 %v3302_v62, %v3172_v13  ;;  %vm6877_vm3 = vcmp.ne.s32.totalorder %v2068_v5, 0  ;;  %vm6901_vm14 = vcmp.eq.s32.totalorder %v2662_v37, 1  ;;  %1624 = vperm.xlu1 %4736, %v1619_v51   ;;  %v6986_v50 = vpop.permute.xlu2 %1015 }
 0x384   :  { %vm12214_vm1 = vmmov %vm12210_vm11  ;;  %v2548_v21 = vsel %vm6877_vm3, 1, %v11991_v52  ;;  %1197 = vperm.xlu2 %4737, %v12233_v53   ;;  %vm12234_vm3 = vcmp.gt.f32.partialorder %v6823_v10, %v6090_v14  ;;  %v2326_v37 = vrot.slane %v6541_v4, 7  ;;  %v2065_v11 = vrot.slane %v6500_v23, 2 }
 0x385   :  { %vm6884_vm0 = vmor %vm12214_vm1, %vm3795_vm4  ;;  %vm12224_vm1 = vcmp.gt.f32.partialorder %v6713_v20, %v6090_v14  ;;  %v2664_v56 = vperm.slane %v2548_v21, 0 }
 0x386   :  { %vm2951_vm11 = vmand %vm12217_vm2, %vm6779_vm13  ;;  %vm6910_vm13 = vcmp.eq.s32.totalorder %v3541_v29, 1 }
 0x387   :  { %vm3079_vm12 = vmor %vm12224_vm1, %vm2951_vm11  ;;  %vm6924_vm1 = vcmp.ne.s32.totalorder %v2324_v19, 0  ;;  %vm2019_vm11 = vcmp.lt.s32.totalorder %v818_v3, %v4970_v42  ;;  %v3538_v19 = vperm.slane %v6541_v4, 0 }
 0x388   :  { %vm12227_vm15 = vmmov %vm12217_vm2  ;;  %v3207_v54 = vsel %vm3079_vm12, 1, %v11991_v52  ;;  %vm2275_vm2 = vcmp.le.s32.totalorder %v818_v3, %v4970_v42  ;;  %v6956_v62 = vsel %vm2019_vm11, 1, %v11991_v52  ;;  %vm6980_vm11 = vcmp.eq.s32.totalorder %v3577_v40, 1 }
 0x389   :  { %vm3830_vm4 = vmand %vm12227_vm15, %vm6819_vm9  ;;  %vm12230_vm9 = vcmp.gt.f32.partialorder %v6713_v20, %v6090_v14  ;;  %v6959_v31 = vsel %vm2275_vm2, 1, %v11991_v52  ;;  %v3299_v5 = vadd.s32 %v3297_v7, %v3207_v54  ;;  %v2100_v25 = vrot.slane %v6956_v62, 2 }
 0x38a   :  { %vm6938_vm15 = vmor %vm12230_vm9, %vm3830_vm4  ;;  %v2356_v1 = vrot.slane %v6959_v31, 2  ;;  %vm6976_vm2 = vcmp.eq.s32.totalorder %v2698_v28, 1  ;;  %v3427_v13 = vsel %vm6924_vm1, 1, %v11991_v52  ;;  %vm12245_vm1 = vcmp.gt.f32.partialorder %v6811_v8, %v6090_v14 }
 0x38b   :  { %v12232_v30 = vsel %vm6938_vm15, 4294967295, %v12231_v30  ;;  %vm2913_vm12 = vmand %vm1888_vm8, %vm6893_vm10  ;;  %vm7013_vm9 = vcmp.ne.s32.totalorder %v2326_v37, 0  ;;  %v2321_v3 = vrot.slane %v6541_v4, 2  ;;  %v4051_v40 = vsel %vm6884_vm0, %v6675_v41, 0.0 }
 0x38c   :  { %vm3041_vm4 = vmor %vm12234_vm3, %vm2913_vm12  ;;  %v3429_v51 = vsel %vm7013_vm9, 1, %v11991_v52  ;;  %vm12269_vm15 = vcmp.gt.f32.partialorder %v6867_v0, %v6090_v14 }
 0x38d   :  { %v3169_v44 = vsel %vm3041_vm4, 1, %v11991_v52  ;;  %vm3792_vm10 = vmand %vm1888_vm8, %vm6897_vm7  ;;  %vm12240_vm8 = vcmp.eq.f32.partialorder %v6811_v8, %v6090_v14  ;;  %vm7002_vm4 = vcmp.ne.s32.totalorder %v2100_v25, 0  ;;  %vm7083_vm9 = vcmp.ne.s32.totalorder %v2321_v3, 0 }
 0x38e   :  { %v3304_v29 = vadd.s32 %v3299_v5, %v3169_v44  ;;  %vm12239_vm12 = vmmov %vm12234_vm3  ;;  %v2580_v61 = vsel %vm7002_vm4, 1, %v11991_v52  ;;  %vm12255_vm4 = vcmp.gt.f32.partialorder %v6867_v0, %v6090_v14  ;;  %v1640_v3 = vperm.slane %v7100_v27, 2 }
 0x38f   :  { %vm3920_vm3 = vmor %vm12239_vm12, %vm3792_vm10  ;;  %vm7006_vm10 = vcmp.ne.s32.totalorder %v2070_v33, 0  ;;  %v2701_v44 = vperm.slane %v2580_v61, 0  ;;  %v819_v25 = vadd.s32 72, %v4981_v2 }
 0x390   :  { %v4048_v7 = vsel %vm3920_vm3, %v6823_v10, 0.0  ;;  %vm2918_vm7 = vmand %vm12240_vm8, %vm6901_vm14  ;;  %vm2468_vm3 = vcmp.ne.s32.totalorder %v2356_v1, 0  ;;  %v2550_v54 = vsel %vm7006_vm10, 1, %v11991_v52  ;;  %vm7079_vm10 = vcmp.ne.s32.totalorder %v2065_v11, 0  ;;  %v7129_v10 = vpop.permute.xlu2 %1029  ;;  %1645 = vperm.xlu1 %4736, %v1640_v3  }
 0x391   :  { %v4175_v60 = vadd.f32 %v4174_v63, %v4048_v7  ;;  %vm3046_vm12 = vmor %vm12245_vm1, %vm2918_vm7  ;;  %v3543_v63 = vperm.slane %v3427_v13, 0  ;;  %v3459_v48 = vsel %vm2468_vm3, 1, %v11991_v52  ;;  %vm7075_vm3 = vcmp.eq.s32.totalorder %v3538_v19, 1  ;;  %v7109_v19 = vpop.permute.xlu0 %1064 }
 0x392   :  { %v3174_v28 = vsel %vm3046_vm12, 1, %v11991_v52  ;;  %vm12248_vm14 = vmmov %vm12240_vm8  ;;  %vm7051_vm12 = vcmp.eq.s32.totalorder %v2659_v6, 1  ;;  %v2666_v13 = vperm.slane %v2550_v54, 0  ;;  %v3545_v6 = vperm.slane %v3429_v51, 0 }
 0x393   :  { %vm3797_vm8 = vmand %vm12248_vm14, %vm6910_vm13  ;;  %v7034_v15 = vadd.f32 %v4175_v60, %v4049_v47  ;;  %v3301_v58 = vadd.s32 %v3304_v29, %v3174_v28  ;;  %v7056_v47 = vpop.permute.xlu1 %1309  ;;  %vm7071_vm14 = vcmp.eq.s32.totalorder %v2664_v56, 1  ;;  %v3580_v29 = vperm.slane %v3459_v48, 0 }
 0x394   :  { %vm12249_vm13 = vmmov %vm12245_vm1  ;;  %vm12252_vm1 = vcmp.eq.f32.partialorder %v6867_v0, %v6090_v14  ;;  %v2103_v7 = vrot.slane %v6956_v62, 5  ;;  %v2545_v12 = vsel %vm7079_vm10, 1, %v11991_v52  ;;  %v3424_v60 = vsel %vm7083_vm9, 1, %v11991_v52 }
 0x395   :  { %vm7039_vm7 = vmor %vm12249_vm13, %vm3797_vm8  ;;  %v2359_v28 = vrot.slane %v6959_v31, 5  ;;  %v2661_v54 = vperm.slane %v2545_v12, 0  ;;  %v3540_v51 = vperm.slane %v3424_v60, 0  ;;  %vm7181_vm9 = vcmp.eq.s32.totalorder %v2666_v13, 1 }
 0x396   :  { %vm2954_vm5 = vmand %vm12252_vm1, %vm6976_vm2  ;;  %v4053_v53 = vsel %vm7039_vm7, %v6811_v8, 0.0  ;;  %vm12304_vm0 = vcmp.eq.f32.partialorder %v7109_v19, %v6090_v14  ;;  %vm2276_vm7 = vcmp.le.s32.totalorder %v819_v25, %v4970_v42  ;;  %v2325_v60 = vrot.slane %v6541_v4, 6 }
 0x397   :  { %vm7067_vm2 = vmor %vm12255_vm4, %vm2954_vm5  ;;  %vm11737_vm5 = vcmp.gt.f32.partialorder %v6986_v50, %v6090_v14  ;;  %vm11736_vm4 = vcmp.eq.f32.partialorder %v6986_v50, %v6090_v14 }
 0x398   :  { %vm12266_vm8 = vmmov %vm12252_vm1  ;;  %vm7092_vm1 = vcmp.eq.s32.totalorder %v3543_v63, 1  ;;  %v3210_v56 = vsel %vm7067_vm2, 1, %v11991_v52  ;;  %vm12273_vm2 = vcmp.gt.f32.partialorder %v6942_v39, %v6090_v14  ;;  %v1311_v63 = vperm.slane %v6931_v34, 3 }
 0x399   :  { %vm3833_vm13 = vmand %vm12266_vm8, %vm6980_vm11  ;;  %v3306_v11 = vadd.s32 %v3301_v58, %v3210_v56  ;;  %v814_v56 = vadd.s32 32, %v4981_v2 }
 0x39a   :  { %vm7105_vm6 = vmor %vm12269_vm15, %vm3833_vm13  ;;  %vm12272_vm15 = vcmp.eq.f32.partialorder %v6942_v39, %v6090_v14  ;;  %1316 = vperm.xlu0 %4738, %v1311_v63  }
 0x39b   :  { %v12271_v26 = vsel %vm7105_vm6, 4294967295, %v12270_v26  ;;  %vm2920_vm11 = vmand %vm12272_vm15, %vm7071_vm14  ;;  %vm7213_vm6 = vcmp.eq.s32.totalorder %v2661_v54, 1  ;;  %v7256_v54 = vpop.permute.xlu2 %1043 }
 0x39c   :  { %vm3048_vm8 = vmor %vm12273_vm2, %vm2920_vm11 }
 0x39d   :  { %v3176_v61 = vsel %vm3048_vm8, 1, %v11991_v52  ;;  %vm12274_vm14 = vmmov %vm12272_vm15 }
 0x39e   :  { %vm3799_vm10 = vmand %vm12274_vm14, %vm7092_vm1  ;;  %v3308_v58 = vadd.s32 %v3306_v11, %v3176_v61  ;;  %vm7156_vm1 = vcmp.ne.s32.totalorder %v2103_v7, 0  ;;  %vm7168_vm14 = vcmp.eq.s32.totalorder %v2701_v44, 1  ;;  %v2067_v7 = vrot.slane %v6500_v23, 4 }
 0x39f   :  { %vm12275_vm11 = vmmov %vm12273_vm2  ;;  %v2583_v13 = vsel %vm7156_vm1, 1, %v11991_v52  ;;  %v2323_v11 = vrot.slane %v6541_v4, 4  ;;  %vm12296_vm1 = vcmp.eq.f32.partialorder %v7056_v47, %v6090_v14 }
 0x3a0   :  { %vm7152_vm2 = vmor %vm12275_vm11, %vm3799_vm10  ;;  %vm7172_vm10 = vcmp.eq.s32.totalorder %v3580_v29, 1 }
 0x3a1   :  { %vm2915_vm8 = vmand %vm11736_vm4, %vm7051_vm12  ;;  %vm7185_vm12 = vcmp.eq.s32.totalorder %v3545_v6, 1  ;;  %vm7191_vm4 = vcmp.ne.s32.totalorder %v2359_v28, 0  ;;  %v7206_v6 = vpop.permute.xlu1 %1330  ;;  %v4055_v41 = vsel %vm7152_vm2, %v6942_v39, 0.0 }
 0x3a2   :  { %vm3043_vm15 = vmor %vm11737_vm5, %vm2915_vm8  ;;  %vm12290_vm8 = vcmp.eq.f32.partialorder %v6986_v50, %v6090_v14  ;;  %v3462_v63 = vsel %vm7191_vm4, 1, %v11991_v52  ;;  %vm12297_vm5 = vcmp.gt.f32.partialorder %v7056_v47, %v6090_v14 }
 0x3a3   :  { %v3171_v29 = vsel %vm3043_vm15, 1, %v11991_v52  ;;  %vm3794_vm11 = vmand %vm12290_vm8, %vm7075_vm3  ;;  %vm12291_vm15 = vcmp.gt.f32.partialorder %v6986_v50, %v6090_v14  ;;  %vm7217_vm3 = vcmp.eq.s32.totalorder %v3540_v51, 1 }
 0x3a4   :  { %v3303_v12 = vadd.s32 %v3308_v58, %v3171_v29  ;;  %vm3922_vm13 = vmor %vm12291_vm15, %vm3794_vm11  ;;  %vm2015_vm11 = vcmp.lt.s32.totalorder %v814_v56, %v4970_v42  ;;  %vm2271_vm15 = vcmp.le.s32.totalorder %v814_v56, %v4970_v42  ;;  %v12302_v29 = vmov 0 }
 0x3a5   :  { %v4050_v28 = vsel %vm3922_vm13, %v6986_v50, 0.0  ;;  %vm2957_vm8 = vmand %vm12296_vm1, %vm7168_vm14  ;;  %v2704_v50 = vperm.slane %v2583_v13, 0  ;;  %v7240_v61 = vsel %vm2015_vm11, 1, %v11991_v52  ;;  %v7243_v58 = vsel %vm2271_vm15, 1, %v11991_v52 }
 0x3a6   :  { %v4177_v3 = vadd.f32 %v7034_v15, %v4050_v28  ;;  %vm3085_vm13 = vmor %vm12297_vm5, %vm2957_vm8  ;;  %vm7252_vm5 = vcmp.ne.s32.totalorder %v2067_v7, 0  ;;  %v2071_v51 = vrot.slane %v7240_v61, 1  ;;  %v2327_v33 = vrot.slane %v7243_v58, 1 }
 0x3a7   :  { %vm12298_vm4 = vmmov %vm12296_vm1  ;;  %v3213_v44 = vsel %vm3085_vm13, 1, %v11991_v52  ;;  %v3583_v13 = vperm.slane %v3462_v63, 0  ;;  %vm2435_vm11 = vcmp.ne.s32.totalorder %v2323_v11, 0  ;;  %vm2020_vm1 = vcmp.lt.s32.totalorder %v819_v25, %v4970_v42 }
 0x3a8   :  { %vm3836_vm14 = vmand %vm12298_vm4, %vm7172_vm10  ;;  %v4178_v1 = vadd.f32 %v4177_v3, %v4051_v40  ;;  %vm12301_vm10 = vcmp.gt.f32.partialorder %v7056_v47, %v6090_v14  ;;  %vm2183_vm13 = vcmp.ne.s32.totalorder %v2071_v51, 0  ;;  %vm2439_vm4 = vcmp.ne.s32.totalorder %v2327_v33, 0  ;;  %v7309_v3 = vpop.permute.xlu0 %1078  ;;  %v4748_v51 = vld [vmem:[#allocation3 + $0x30] sm:$0xff] }
 0x3a9   :  { %vm7269_vm8 = vmor %vm12301_vm10, %vm3836_vm14  ;;  %v3310_v36 = vadd.s32 %v3303_v12, %v3213_v44  ;;  %vm12305_vm14 = vcmp.gt.f32.partialorder %v7109_v19, %v6090_v14  ;;  %v2547_v40 = vsel %vm7252_vm5, 1, %v11991_v52  ;;  %v3426_v56 = vsel %vm2435_vm11, 1, %v11991_v52 }
 0x3aa   :  { %v12303_v29 = vsel %vm7269_vm8, 4294967295, %v12302_v29  ;;  %vm2922_vm15 = vmand %vm12304_vm0, %vm7181_vm9  ;;  %vm1894_vm9 = vcmp.eq.f32.partialorder %v7256_v54, %v6090_v14  ;;  %v2551_v12 = vsel %vm2183_vm13, 1, %v11991_v52  ;;  %v3430_v63 = vsel %vm2439_vm4, 1, %v11991_v52 }
 0x3ab   :  { %vm3050_vm10 = vmor %vm12305_vm14, %vm2922_vm15  ;;  %v7312_v15 = vsel %vm2020_vm1, 1, %v11991_v52  ;;  %v1213_v33 = vperm.slane %v4748_v51, 5  ;;  %vm12309_vm11 = vcmp.eq.f32.partialorder %v7129_v10, %v6090_v14  ;;  %vm7319_vm14 = vcmp.eq.s32.totalorder %v2704_v50, 1 }
 0x3ac   :  { %v3178_v46 = vsel %vm3050_vm10, 1, %v11991_v52  ;;  %vm12306_vm5 = vmmov %vm12304_vm0  ;;  %v2663_v44 = vperm.slane %v2547_v40, 0  ;;  %vm12314_vm1 = vcmp.gt.f32.partialorder %v7129_v10, %v6090_v14  ;;  %v3542_v5 = vperm.slane %v3426_v56, 0 }
 0x3ad   :  { %v3305_v11 = vadd.s32 %v3310_v36, %v3178_v46  ;;  %vm7304_vm15 = vmand %vm12306_vm5, %vm7185_vm12  ;;  %vm7323_vm12 = vcmp.eq.s32.totalorder %v3583_v13, 1  ;;  %v1332_v36 = vperm.slane %v6931_v34, 6  ;;  %v7332_v46 = vsel %vm2276_vm7, 1, %v11991_v52  ;;  %1218 = vperm.xlu2 %4737, %v1213_v33  }
 0x3ae   :  { %vm2917_vm13 = vmand %vm12309_vm11, %vm7213_vm6  ;;  %v1661_v50 = vperm.slane %v7100_v27, 5  ;;  %v2069_v51 = vrot.slane %v6500_v23, 6  ;;  %v2668_v40 = vperm.slane %v2551_v12, 0  ;;  %v3547_v7 = vperm.slane %v3430_v63, 0  ;;  %v7346_v27 = vpop.permute.xlu1 %1351 }
 0x3af   :  { %vm3045_vm4 = vmor %vm12314_vm1, %vm2917_vm13  ;;  %v2707_v56 = vperm.slane %v7312_v15, 0  ;;  %1337 = vperm.xlu0 %4738, %v1332_v36   ;;  %12317 = vst [vmem:[#allocation18_spill] sm:$0xff] %v7346_v27  ;;  %v2073_v12 = vrot.slane %v7240_v61, 3  ;;  %v2329_v33 = vrot.slane %v7243_v58, 3  ;;  %v7470_v36 = vld [vmem:[#allocation3 + $0x78] sm:$0xff] }
 0x3b0   :  { %v3173_v13 = vsel %vm3045_vm4, 1, %v11991_v52  ;;  %vm12315_vm6 = vmmov %vm12309_vm11  ;;  %1666 = vperm.xlu1 %4736, %v1661_v50   ;;  %vm7348_vm11 = vcmp.ne.s32.totalorder %v2069_v51, 0  ;;  %vm12321_vm4 = vcmp.gt.f32.partialorder %v7109_v19, %v6090_v14  ;;  %v12337_v50 = vmov 0 }
 0x3b1   :  { %vm3796_vm10 = vmand %vm12315_vm6, %vm7217_vm3  ;;  %v3307_v16 = vadd.s32 %v3305_v11, %v3173_v13  ;;  %vm12320_vm3 = vcmp.eq.f32.partialorder %v7206_v6, %v6090_v14  ;;  %v3586_v11 = vperm.slane %v7332_v46, 0  ;;  %v2549_v25 = vsel %vm7348_vm11, 1, %v11991_v52 }
 0x3b2   :  { %vm12316_vm7 = vmmov %vm12314_vm1  ;;  %vm7423_vm1 = vcmp.eq.s32.totalorder %v2707_v56, 1  ;;  %vm2185_vm11 = vcmp.ne.s32.totalorder %v2073_v12, 0  ;;  %v2665_v23 = vperm.slane %v2549_v25, 0  ;;  %v2108_v12 = vrot.slane %v7312_v15, 3 }
 0x3b3   :  { %vm3924_vm5 = vmor %vm12316_vm7, %vm3796_vm10  ;;  %vm7380_vm7 = vcmp.eq.s32.totalorder %v2663_v44, 1  ;;  %v12353_v44 = vmov 0  ;;  %v12370_v51 = vmov 0 }
 0x3b4   :  { %v4052_v63 = vsel %vm3924_vm5, %v7129_v10, 0.0  ;;  %vm2960_vm13 = vmand %vm12320_vm3, %vm7319_vm14  ;;  %vm12324_vm14 = vcmp.gt.f32.partialorder %v7206_v6, %v6090_v14  ;;  %vm7384_vm5 = vcmp.eq.s32.totalorder %v3542_v5, 1  ;;  %v7403_v5 = vld [vmem:[#allocation11] sm:$0xff] }
 0x3b5   :  { %vm7369_vm6 = vmor %vm12321_vm4, %vm7304_vm15  ;;  %v4179_v10 = vadd.f32 %v4178_v1, %v4052_v63  ;;  %vm7395_vm4 = vcmp.eq.s32.totalorder %v2668_v40, 1  ;;  %vm7427_vm15 = vcmp.ne.s32.totalorder %v2325_v60, 0  ;;  %v7453_v60 = vpop.permute.xlu0 %1092  ;;  %v2364_v63 = vrot.slane %v7332_v46, 3  ;;  %v7492_v1 = vpop.permute.xlu2 %1057 }
 0x3b6   :  { %vm7376_vm10 = vmor %vm12324_vm14, %vm2960_vm13  ;;  %vm7399_vm14 = vcmp.eq.s32.totalorder %v3547_v7, 1  ;;  %v4057_v48 = vsel %vm7369_vm6, %v7109_v19, 0.0  ;;  %vm12356_vm2 = vcmp.eq.f32.partialorder %v7346_v27, %v7403_v5  ;;  %vm7537_vm6 = vcmp.eq.s32.totalorder %v2665_v23, 1 }
 0x3b7   :  { %vm3839_vm13 = vmand %vm12320_vm3, %vm7323_vm12  ;;  %v4180_v7 = vadd.f32 %v4179_v10, %v4053_v53  ;;  %vm12336_vm3 = vcmp.gt.f32.partialorder %v7206_v6, %v6090_v14  ;;  %v3216_v8 = vsel %vm7376_vm10, 1, %v11991_v52  ;;  %vm7442_vm12 = vcmp.eq.s32.totalorder %v3586_v11, 1  ;;  %v7467_v10 = vld [vmem:[#allocation3 + $0x38] sm:$0xff] }
 0x3b8   :  { %vm7419_vm0 = vmor %vm12336_vm3, %vm3839_vm13  ;;  %vm7446_vm3 = vcmp.ne.s32.totalorder %v2329_v33, 0  ;;  %v3312_v56 = vadd.s32 %v3307_v16, %v3216_v8  ;;  %vm12347_vm10 = vcmp.gt.f32.partialorder %v7256_v54, %v6090_v14  ;;  %v3428_v16 = vsel %vm7427_vm15, 1, %v11991_v52 }
 0x3b9   :  { %v12338_v50 = vsel %vm7419_vm0, 4294967295, %v12337_v50  ;;  %vm2919_vm13 = vmand %vm1894_vm9, %vm7380_vm7  ;;  %v2553_v33 = vsel %vm2185_vm11, 1, %v11991_v52  ;;  %v1234_v37 = vperm.slane %v7467_v10, 0  ;;  %v3432_v28 = vsel %vm7446_vm3, 1, %v11991_v52 }
 0x3ba   :  { %vm3047_vm8 = vmor %vm12347_vm10, %vm2919_vm13  ;;  %vm12349_vm15 = vcmp.eq.f32.partialorder %v7309_v3, %v6090_v14  ;;  %vm12350_vm3 = vcmp.gt.f32.partialorder %v7309_v3, %v6090_v14  ;;  %v2077_v19 = vrot.slane %v7240_v61, 7  ;;  %v12402_v23 = vmov 0 }
 0x3bb   :  { %v3175_v11 = vsel %vm3047_vm8, 1, %v11991_v52  ;;  %vm3798_vm7 = vmand %vm1894_vm9, %vm7384_vm5  ;;  %vm2220_vm9 = vcmp.ne.s32.totalorder %v2108_v12, 0  ;;  %vm2476_vm5 = vcmp.ne.s32.totalorder %v2364_v63, 0  ;;  %1239 = vperm.xlu2 %4737, %v1234_v37   ;;  %v2670_v12 = vperm.slane %v2553_v33, 0 }
 0x3bc   :  { %v3309_v25 = vadd.s32 %v3312_v56, %v3175_v11  ;;  %vm12348_vm8 = vmmov %vm12347_vm10  ;;  %v2588_v8 = vsel %vm2220_vm9, 1, %v11991_v52  ;;  %v3467_v56 = vsel %vm2476_vm5, 1, %v11991_v52  ;;  %v7486_v11 = vld [vmem:[#allocation3 + $0x48] sm:$0xff]  ;;  %v1682_v63 = vperm.slane %v7470_v36, 0 }
 0x3bd   :  { %vm3926_vm13 = vmor %vm12348_vm8, %vm3798_vm7  ;;  %v1353_v40 = vperm.slane %v7486_v11, 1  ;;  %v3549_v37 = vperm.slane %v3432_v28, 0  ;;  %v2710_v17 = vperm.slane %v2588_v8, 0  ;;  %v3589_v28 = vperm.slane %v3467_v56, 0  ;;  %v7622_v39 = vpop.permute.xlu2 %1071 }
 0x3be   :  { %v4054_v13 = vsel %vm3926_vm13, %v7256_v54, 0.0  ;;  %vm2924_vm11 = vmand %vm12349_vm15, %vm7395_vm4  ;;  %v3544_v54 = vperm.slane %v3428_v16, 0  ;;  %1687 = vperm.xlu1 %4736, %v1682_v63   ;;  %vm1896_vm5 = vcmp.eq.f32.partialorder %v7492_v1, %v7403_v5 }
 0x3bf   :  { %v4181_v21 = vadd.f32 %v4180_v7, %v4054_v13  ;;  %vm3052_vm10 = vmor %vm12350_vm3, %vm2924_vm11  ;;  %1358 = vperm.xlu0 %4738, %v1353_v40   ;;  %v2075_v7 = vrot.slane %v7240_v61, 5  ;;  %v2331_v13 = vrot.slane %v7243_v58, 5  ;;  %v7514_v40 = vpop.permute.xlu1 %1372  ;;  %vm12357_vm11 = vcmp.gt.f32.partialorder %v7346_v27, %v7403_v5 }
 0x3c0   :  { %v3180_v18 = vsel %vm3052_vm10, 1, %v11991_v52  ;;  %vm12351_vm4 = vmmov %vm12349_vm15  ;;  %12355 = vst [vmem:[#allocation19_spill] sm:$0xff] %v7514_v40 }
 0x3c1   :  { %vm3803_vm7 = vmand %vm12351_vm4, %vm7399_vm14  ;;  %v4182_v16 = vadd.f32 %v4181_v21, %v4055_v41  ;;  %v3314_v33 = vadd.s32 %v3309_v25, %v3180_v18  ;;  %vm7547_vm4 = vcmp.ne.s32.totalorder %v2075_v7, 0  ;;  %vm2443_vm15 = vcmp.ne.s32.totalorder %v2331_v13, 0  ;;  %v7586_v25 = vpop.permute.xlu0 %1106 }
 0x3c2   :  { %vm12352_vm8 = vmmov %vm12350_vm3  ;;  %v3434_v63 = vsel %vm2443_vm15, 1, %v11991_v52  ;;  %v1255_v7 = vperm.slane %v7467_v10, 3 }
 0x3c3   :  { %vm7510_vm13 = vmor %vm12352_vm8, %vm3803_vm7 }
 0x3c4   :  { %v12354_v44 = vsel %vm7510_vm13, 4294967295, %v12353_v44  ;;  %vm2963_vm14 = vmand %vm12356_vm2, %vm7423_vm1  ;;  %vm7541_vm1 = vcmp.eq.s32.totalorder %v3544_v54, 1  ;;  %v2111_v54 = vrot.slane %v7312_v15, 6  ;;  %1260 = vperm.xlu2 %4737, %v1255_v7   ;;  %v3551_v7 = vperm.slane %v3434_v63, 0 }
 0x3c5   :  { %vm7533_vm3 = vmor %vm12357_vm11, %vm2963_vm14  ;;  %vm7582_vm14 = vcmp.eq.s32.totalorder %v3589_v28, 1  ;;  %v1703_v28 = vperm.slane %v7470_v36, 3 }
 0x3c6   :  { %vm12366_vm7 = vmmov %vm12356_vm2  ;;  %vm7556_vm2 = vcmp.eq.s32.totalorder %v2670_v12, 1  ;;  %v3219_v8 = vsel %vm7533_vm3, 1, %v11991_v52  ;;  %vm12379_vm3 = vcmp.gt.f32.partialorder %v7492_v1, %v7403_v5 }
 0x3c7   :  { %vm3842_vm8 = vmand %vm12366_vm7, %vm7442_vm12  ;;  %vm7574_vm12 = vcmp.eq.s32.totalorder %v3549_v37, 1  ;;  %vm7578_vm7 = vcmp.eq.s32.totalorder %v2710_v17, 1  ;;  %v2555_v17 = vsel %vm7547_vm4, 1, %v11991_v52  ;;  %v3316_v12 = vadd.s32 %v3314_v33, %v3219_v8  ;;  %1708 = vperm.xlu1 %4736, %v1703_v28   ;;  %v7657_v28 = vpop.permute.xlu1 %1393 }
 0x3c8   :  { %vm12369_vm10 = vmmov %vm12357_vm11  ;;  %v2367_v37 = vrot.slane %v7332_v46, 6  ;;  %vm2223_vm11 = vcmp.ne.s32.totalorder %v2111_v54, 0  ;;  %v1374_v33 = vperm.slane %v7486_v11, 4  ;;  %v2667_v54 = vperm.slane %v7240_v61, 0  ;;  %12387 = vst [vmem:[#allocation21_spill] sm:$0xff] %v7657_v28 }
 0x3c9   :  { %vm7570_vm9 = vmor %vm12369_vm10, %vm3842_vm8  ;;  %v2591_v18 = vsel %vm2223_vm11, 1, %v11991_v52  ;;  %vm12382_vm11 = vcmp.gt.f32.partialorder %v7453_v60, %v7403_v5  ;;  %v7719_v56 = vpop.permute.xlu0 %1120 }
 0x3ca   :  { %v12371_v51 = vsel %vm7570_vm9, 4294967295, %v12370_v51  ;;  %vm2921_vm10 = vmand %vm1896_vm5, %vm7537_vm6  ;;  %1379 = vperm.xlu0 %4738, %v1374_v33  }
 0x3cb   :  { %12372 = vst [vmem:[#allocation20_spill] sm:$0xff] %v12371_v51  ;;  %vm3049_vm8 = vmor %vm12379_vm3, %vm2921_vm10 }
 0x3cc   :  { %v3177_v13 = vsel %vm3049_vm8, 1, %v11991_v52  ;;  %vm3800_vm6 = vmand %vm1896_vm5, %vm7541_vm1  ;;  %vm12381_vm5 = vcmp.eq.f32.partialorder %v7453_v60, %v7403_v5 }
 0x3cd   :  { %v3311_v14 = vadd.s32 %v3316_v12, %v3177_v13  ;;  %vm12380_vm15 = vmmov %vm12379_vm3  ;;  %vm2479_vm3 = vcmp.ne.s32.totalorder %v2367_v37, 0  ;;  %v3546_v12 = vperm.slane %v7243_v58, 0 }
 0x3ce   :  { %vm3928_vm10 = vmor %vm12380_vm15, %vm3800_vm6  ;;  %v3470_v13 = vsel %vm2479_vm3, 1, %v11991_v52  ;;  %vm2189_vm6 = vcmp.ne.s32.totalorder %v2077_v19, 0  ;;  %v2333_v19 = vrot.slane %v7243_v58, 7 }
 0x3cf   :  { %v4056_v8 = vsel %vm3928_vm10, %v7492_v1, 0.0  ;;  %vm2926_vm1 = vmand %vm12381_vm5, %vm7556_vm2  ;;  %v2672_v1 = vperm.slane %v2555_v17, 0  ;;  %v3592_v21 = vperm.slane %v3470_v13, 0  ;;  %v7818_v51 = vpop.permute.xlu1 %1414 }
 0x3d0   :  { %v4183_v37 = vadd.f32 %v4182_v16, %v4056_v8  ;;  %vm3054_vm8 = vmor %vm12382_vm11, %vm2926_vm1  ;;  %v2713_v16 = vperm.slane %v2591_v18, 0  ;;  %v2557_v18 = vsel %vm2189_vm6, 1, %v11991_v52  ;;  %v2072_v8 = vrot.slane %v7240_v61, 2  ;;  %12428 = vst [vmem:[#allocation23_spill] sm:$0xff] %v7818_v51 }
 0x3d1   :  { %v3182_v41 = vsel %vm3054_vm8, 1, %v11991_v52  ;;  %vm12383_vm2 = vmmov %vm12381_vm5  ;;  %vm7665_vm8 = vcmp.eq.s32.totalorder %v2667_v54, 1  ;;  %vm7678_vm3 = vcmp.eq.s32.totalorder %v2672_v1, 1 }
 0x3d2   :  { %vm3805_vm15 = vmand %vm12383_vm2, %vm7574_vm12  ;;  %v7648_v33 = vadd.f32 %v4183_v37, %v4057_v48  ;;  %v3318_v17 = vadd.s32 %v3311_v14, %v3182_v41  ;;  %vm12388_vm12 = vcmp.eq.f32.partialorder %v7514_v40, %v7403_v5  ;;  %vm7669_vm2 = vcmp.eq.s32.totalorder %v3546_v12, 1 }
 0x3d3   :  { %vm12384_vm5 = vmmov %vm12382_vm11  ;;  %v2328_v12 = vrot.slane %v7243_v58, 2  ;;  %v820_v37 = vadd.s32 80, %v4981_v2 }
 0x3d4   :  { %vm7653_vm1 = vmor %vm12384_vm5, %vm3805_vm15  ;;  %vm12393_vm15 = vcmp.gt.f32.partialorder %v7514_v40, %v7403_v5  ;;  %v1724_v40 = vperm.slane %v7470_v36, 6 }
 0x3d5   :  { %vm2966_vm11 = vmand %vm12388_vm12, %vm7578_vm7  ;;  %vm7682_vm7 = vcmp.eq.s32.totalorder %v3551_v7, 1  ;;  %vm2021_vm10 = vcmp.lt.s32.totalorder %v820_v37, %v4970_v42 }
 0x3d6   :  { %vm3094_vm5 = vmor %vm12393_vm15, %vm2966_vm11  ;;  %vm7694_vm11 = vcmp.eq.s32.totalorder %v2713_v16, 1  ;;  %v2674_v16 = vperm.slane %v2557_v18, 0  ;;  %1729 = vperm.xlu1 %4736, %v1724_v40  }
 0x3d7   :  { %vm12398_vm6 = vmmov %vm12388_vm12  ;;  %v3222_v1 = vsel %vm3094_vm5, 1, %v11991_v52 }
 0x3d8   :  { %vm3845_vm4 = vmand %vm12398_vm6, %vm7582_vm14  ;;  %vm7711_vm14 = vcmp.eq.s32.totalorder %v3592_v21, 1  ;;  %vm7715_vm6 = vcmp.ne.s32.totalorder %v2333_v19, 0  ;;  %v3313_v9 = vadd.s32 %v3318_v17, %v3222_v1  ;;  %v1276_v21 = vperm.slane %v7467_v10, 6 }
 0x3d9   :  { %vm12401_vm12 = vmmov %vm12393_vm15  ;;  %vm7733_vm15 = vcmp.ne.s32.totalorder %v2328_v12, 0  ;;  %v3436_v17 = vsel %vm7715_vm6, 1, %v11991_v52  ;;  %v7759_v12 = vpop.permute.xlu2 %1085  ;;  %v1395_v19 = vperm.slane %v7486_v11, 7 }
 0x3da   :  { %vm7707_vm9 = vmor %vm12401_vm12, %vm3845_vm4  ;;  %vm12409_vm4 = vcmp.eq.f32.partialorder %v7586_v25, %v7403_v5  ;;  %vm7729_vm12 = vcmp.ne.s32.totalorder %v2072_v8, 0  ;;  %v7745_v8 = vsel %vm2021_vm10, 1, %v11991_v52  ;;  %v3431_v41 = vsel %vm7733_vm15, 1, %v11991_v52  ;;  %1281 = vperm.xlu2 %4737, %v1276_v21  }
 0x3db   :  { %v12403_v23 = vsel %vm7707_vm9, 4294967295, %v12402_v23  ;;  %vm2928_vm5 = vmand %vm12409_vm4, %vm7678_vm3  ;;  %vm12414_vm9 = vcmp.gt.f32.partialorder %v7586_v25, %v7403_v5  ;;  %vm2277_vm3 = vcmp.le.s32.totalorder %v820_v37, %v4970_v42  ;;  %v2113_v1 = vrot.slane %v7745_v8, 1  ;;  %1400 = vperm.xlu0 %4738, %v1395_v19  }
 0x3dc   :  { %12404 = vst [vmem:[#allocation22_spill] sm:$0xff] %v12403_v23  ;;  %vm3056_vm0 = vmor %vm12414_vm9, %vm2928_vm5  ;;  %vm1777_vm9 = vcmp.gt.f32.partialorder %v7719_v56, %v7403_v5  ;;  %v7763_v37 = vsel %vm2277_vm3, 1, %v11991_v52  ;;  %v2552_v54 = vsel %vm7729_vm12, 1, %v11991_v52  ;;  %vm1905_vm5 = vcmp.eq.f32.partialorder %v7719_v56, %v7403_v5 }
 0x3dd   :  { %v3184_v53 = vsel %vm3056_vm0, 1, %v11991_v52  ;;  %vm3807_vm13 = vmand %vm12409_vm4, %vm7682_vm7  ;;  %v2369_v18 = vrot.slane %v7763_v37, 1  ;;  %vm12415_vm0 = vcmp.gt.f32.partialorder %v7586_v25, %v7403_v5  ;;  %vm12418_vm7 = vcmp.eq.f32.partialorder %v7622_v39, %v7403_v5 }
 0x3de   :  { %v3315_v59 = vadd.s32 %v3313_v9, %v3184_v53  ;;  %vm7775_vm10 = vmor %vm12415_vm0, %vm3807_vm13  ;;  %vm7786_vm12 = vcmp.ne.s32.totalorder %v2113_v1, 0  ;;  %vm12421_vm13 = vcmp.gt.f32.partialorder %v7622_v39, %v7403_v5  ;;  %v3553_v48 = vperm.slane %v3436_v17, 0 }
 0x3df   :  { %vm2923_vm6 = vmand %vm12418_vm7, %vm7665_vm8  ;;  %vm7795_vm3 = vcmp.ne.s32.totalorder %v2369_v18, 0  ;;  %v2074_v1 = vrot.slane %v7240_v61, 4  ;;  %v2669_v10 = vperm.slane %v2552_v54, 0  ;;  %v3548_v27 = vperm.slane %v3431_v41, 0 }
 0x3e0   :  { %vm3051_vm15 = vmor %vm12421_vm13, %vm2923_vm6  ;;  %v2330_v18 = vrot.slane %v7243_v58, 4  ;;  %vm7811_vm6 = vcmp.eq.s32.totalorder %v2674_v16, 1  ;;  %v2593_v14 = vsel %vm7786_vm12, 1, %v11991_v52  ;;  %vm12432_vm12 = vcmp.gt.f32.partialorder %v7657_v28, %v7403_v5 }
 0x3e1   :  { %v3179_v23 = vsel %vm3051_vm15, 1, %v11991_v52  ;;  %vm12424_vm8 = vmmov %vm12418_vm7  ;;  %v2716_v41 = vperm.slane %v2593_v14, 0  ;;  %v815_v9 = vadd.s32 40, %v4981_v2  ;;  %v12443_v19 = vmov 0 }
 0x3e2   :  { %vm3802_vm4 = vmand %vm12424_vm8, %vm7669_vm2  ;;  %v3320_v17 = vadd.s32 %v3315_v59, %v3179_v23  ;;  %vm2186_vm2 = vcmp.ne.s32.totalorder %v2074_v1, 0  ;;  %v3472_v59 = vsel %vm7795_vm3, 1, %v11991_v52  ;;  %vm7829_vm8 = vcmp.ne.s32.totalorder %v2330_v18, 0 }
 0x3e3   :  { %vm12425_vm0 = vmmov %vm12421_vm13  ;;  %vm12429_vm13 = vcmp.eq.f32.partialorder %v7657_v28, %v7403_v5  ;;  %v2554_v16 = vsel %vm2186_vm2, 1, %v11991_v52  ;;  %vm1900_vm3 = vcmp.eq.f32.partialorder %v7759_v12, %v7403_v5  ;;  %v3433_v53 = vsel %vm7829_vm8, 1, %v11991_v52 }
 0x3e4   :  { %vm3930_vm7 = vmor %vm12425_vm0, %vm3802_vm4  ;;  %vm7838_vm0 = vcmp.eq.s32.totalorder %v3553_v48, 1  ;;  %v2671_v48 = vperm.slane %v2554_v16, 0  ;;  %v2116_v14 = vrot.slane %v7745_v8, 4  ;;  %v2372_v23 = vrot.slane %v7763_v37, 4 }
 0x3e5   :  { %v4058_v54 = vsel %vm3930_vm7, %v7622_v39, 0.0  ;;  %vm2969_vm15 = vmand %vm12429_vm13, %vm7694_vm11  ;;  %vm12440_vm11 = vnez %v12354_v44  ;;  %v7885_v44 = vpop.permute.xlu2 %1099 }
 0x3e6   :  { %v4185_v40 = vadd.f32 %v7648_v33, %v4058_v54  ;;  %vm3097_vm4 = vmor %vm12432_vm12, %vm2969_vm15  ;;  %vm7855_vm15 = vcmp.eq.s32.totalorder %v3548_v27, 1  ;;  %v12441_v7 = vsel %vm12440_vm11, %v7309_v3, 0.0  ;;  %v3595_v27 = vperm.slane %v3472_v59, 0 }
 0x3e7   :  { %vm12435_vm7 = vmmov %vm12429_vm13  ;;  %vm7851_vm13 = vcmp.eq.s32.totalorder %v2669_v10, 1  ;;  %v3225_v1 = vsel %vm3097_vm4, 1, %v11991_v52  ;;  %v2332_v33 = vrot.slane %v7243_v58, 6 }
 0x3e8   :  { %vm3848_vm2 = vmand %vm12435_vm7, %vm7711_vm14  ;;  %v4186_v21 = vadd.f32 %v4185_v40, %v12441_v7  ;;  %v3317_v10 = vadd.s32 %v3320_v17, %v3225_v1  ;;  %v3550_v1 = vperm.slane %v3433_v53, 0 }
 0x3e9   :  { %vm12442_vm14 = vmmov %vm12432_vm12 }
 0x3ea   :  { %vm7869_vm7 = vmor %vm12442_vm14, %vm3848_vm2  ;;  %vm2016_vm2 = vcmp.lt.s32.totalorder %v815_v9, %v4970_v42  ;;  %vm2272_vm14 = vcmp.le.s32.totalorder %v815_v9, %v4970_v42  ;;  %v7922_v9 = vpop.permute.xlu0 %1134 }
 0x3eb   :  { %v12444_v19 = vsel %vm7869_vm7, 4294967295, %v12443_v19  ;;  %vm2930_vm11 = vmand %vm1905_vm5, %vm7811_vm6  ;;  %v7893_v18 = vsel %vm2016_vm2, 1, %v11991_v52  ;;  %v7896_v36 = vsel %vm2272_vm14, 1, %v11991_v52  ;;  %vm7929_vm2 = vcmp.eq.s32.totalorder %v2716_v41, 1 }
 0x3ec   :  { %vm3058_vm8 = vmor %vm1777_vm9, %vm2930_vm11  ;;  %v2078_v17 = vrot.slane %v7893_v18, 1  ;;  %v2334_v59 = vrot.slane %v7896_v36, 1  ;;  %vm1779_vm12 = vcmp.gt.f32.partialorder %v7922_v9, %v7403_v5  ;;  %vm12458_vm7 = vcmp.gt.f32.partialorder %v7759_v12, %v7403_v5 }
 0x3ed   :  { %v3186_v54 = vsel %vm3058_vm8, 1, %v11991_v52  ;;  %vm3809_vm6 = vmand %vm1905_vm5, %vm7838_vm0  ;;  %vm12449_vm8 = vcmp.gt.f32.partialorder %v7759_v12, %v7403_v5  ;;  %vm7936_vm0 = vcmp.eq.s32.totalorder %v3595_v27, 1  ;;  %vm7942_vm5 = vcmp.ne.s32.totalorder %v2116_v14, 0 }
 0x3ee   :  { %v3322_v40 = vadd.s32 %v3317_v10, %v3186_v54  ;;  %vm7914_vm4 = vmor %vm1777_vm9, %vm3809_vm6  ;;  %vm2190_vm9 = vcmp.ne.s32.totalorder %v2078_v17, 0  ;;  %vm2446_vm14 = vcmp.ne.s32.totalorder %v2334_v59, 0  ;;  %v7967_v17 = vpop.permute.xlu1 %1435  ;;  %v1297_v59 = vperm.slane %v6931_v34, 1 }
 0x3ef   :  { %vm2925_vm11 = vmand %vm1900_vm3, %vm7851_vm13  ;;  %vm7946_vm13 = vcmp.ne.s32.totalorder %v2372_v23, 0  ;;  %v2558_v14 = vsel %vm2190_vm9, 1, %v11991_v52  ;;  %v3437_v13 = vsel %vm2446_vm14, 1, %v11991_v52  ;;  %12459 = vst [vmem:[#allocation24_spill] sm:$0xff] %v7967_v17  ;;  %vm7979_vm9 = vcmp.eq.s32.totalorder %v3550_v1, 1 }
 0x3f0   :  { %vm3053_vm6 = vmor %vm12449_vm8, %vm2925_vm11  ;;  %vm7956_vm8 = vcmp.eq.s32.totalorder %v2671_v48, 1  ;;  %v7970_v48 = vld [vmem:[#allocation3 + $0x50] sm:$0xff]  ;;  %v2596_v34 = vsel %vm7942_vm5, 1, %v11991_v52  ;;  %v2676_v7 = vperm.slane %v2558_v14, 0  ;;  %1302 = vperm.xlu2 %4737, %v1297_v59   ;;  %v2076_v1 = vrot.slane %v7240_v61, 6 }
 0x3f1   :  { %v3181_v53 = vsel %vm3053_vm6, 1, %v11991_v52  ;;  %vm3804_vm11 = vmand %vm1900_vm3, %vm7855_vm15  ;;  %v1416_v23 = vperm.slane %v7970_v48, 2  ;;  %vm12460_vm3 = vcmp.eq.f32.partialorder %v7818_v51, %v7403_v5  ;;  %v12467_v61 = vsel %vm7653_vm1, %v7453_v60, 0.0 }
 0x3f2   :  { %v3326_v54 = vadd.s32 %v3322_v40, %v3181_v53  ;;  %vm3932_vm6 = vmor %vm12458_vm7, %vm3804_vm11  ;;  %v3475_v53 = vsel %vm7946_vm13, 1, %v11991_v52  ;;  %vm12463_vm7 = vcmp.gt.f32.partialorder %v7818_v51, %v7403_v5  ;;  %vm1907_vm13 = vcmp.eq.f32.partialorder %v7922_v9, %v7403_v5 }
 0x3f3   :  { %v4060_v3 = vsel %vm3932_vm6, %v7759_v12, 0.0  ;;  %vm2972_vm15 = vmand %vm12460_vm3, %vm7929_vm2  ;;  %1421 = vperm.xlu0 %4738, %v1416_v23   ;;  %v12469_v10 = vmov 0  ;;  %v2719_v41 = vperm.slane %v2596_v34, 0  ;;  %vm12474_vm1 = vcmp.eq.f32.partialorder %v7885_v44, %v7403_v5 }
 0x3f4   :  { %v4187_v16 = vadd.f32 %v4186_v21, %v4060_v3  ;;  %vm7992_vm14 = vmor %vm12463_vm7, %vm2972_vm15  ;;  %v3555_v21 = vperm.slane %v3437_v13, 0  ;;  %v2080_v3 = vrot.slane %v7893_v18, 3  ;;  %vm2444_vm15 = vcmp.ne.s32.totalorder %v2332_v33, 0 }
 0x3f5   :  { %vm12466_vm5 = vmmov %vm12460_vm3  ;;  %v3228_v63 = vsel %vm7992_vm14, 1, %v11991_v52  ;;  %vm2804_vm14 = vcmp.eq.s32.totalorder %v2676_v7, 1  ;;  %v2336_v59 = vrot.slane %v7896_v36, 3  ;;  %v4065_v27 = vsel %vm7914_vm4, %v7719_v56, 0.0 }
 0x3f6   :  { %vm3851_vm2 = vmand %vm12466_vm5, %vm7936_vm0  ;;  %v4188_v58 = vadd.f32 %v4187_v16, %v12467_v61  ;;  %vm8019_vm0 = vcmp.ne.s32.totalorder %v2076_v1, 0  ;;  %v3598_v16 = vperm.slane %v3475_v53, 0  ;;  %v3319_v13 = vadd.s32 %v3326_v54, %v3228_v63  ;;  %v8083_v63 = vpop.permute.xlu0 %1148 }
 0x3f7   :  { %vm12468_vm6 = vmmov %vm12463_vm7  ;;  %vm2192_vm11 = vcmp.ne.s32.totalorder %v2080_v3, 0  ;;  %v2556_v54 = vsel %vm8019_vm0, 1, %v11991_v52  ;;  %v3435_v34 = vsel %vm2444_vm15, 1, %v11991_v52  ;;  %vm8056_vm5 = vcmp.eq.s32.totalorder %v3555_v21, 1 }
 0x3f8   :  { %vm8015_vm3 = vmor %vm12468_vm6, %vm3851_vm2  ;;  %vm12475_vm2 = vcmp.gt.f32.partialorder %v7885_v44, %v7403_v5  ;;  %vm8072_vm15 = vcmp.eq.s32.totalorder %v3598_v16, 1  ;;  %v2560_v21 = vsel %vm2192_vm11, 1, %v11991_v52  ;;  %v2119_v3 = vrot.slane %v7745_v8, 7 }
 0x3f9   :  { %v12470_v10 = vsel %vm8015_vm3, 4294967295, %v12469_v10  ;;  %vm2927_vm7 = vmand %vm12474_vm1, %vm7956_vm8  ;;  %v3552_v14 = vperm.slane %v3435_v34, 0  ;;  %v2375_v16 = vrot.slane %v7763_v37, 7  ;;  %v12488_v34 = vsel %vm7775_vm10, %v7586_v25, 0.0 }
 0x3fa   :  { %12471 = vst [vmem:[#allocation25_spill] sm:$0xff] %v12470_v10  ;;  %vm3055_vm6 = vmor %vm12475_vm2, %vm2927_vm7  ;;  %v2678_v60 = vperm.slane %v2560_v21, 0  ;;  %v1437_v4 = vperm.slane %v7970_v48, 5  ;;  %v12502_v33 = vmov 0  ;;  %v821_v40 = vadd.s32 88, %v4981_v2 }
 0x3fb   :  { %v3183_v23 = vsel %vm3055_vm6, 1, %v11991_v52  ;;  %vm12476_vm8 = vmmov %vm12474_vm1  ;;  %vm8060_vm6 = vcmp.eq.s32.totalorder %v2719_v41, 1  ;;  %v2673_v41 = vperm.slane %v2556_v54, 0  ;;  %v2340_v39 = vrot.slane %v7896_v36, 7 }
 0x3fc   :  { %vm3806_vm1 = vmand %vm12476_vm8, %vm7979_vm9  ;;  %v3321_v53 = vadd.s32 %v3319_v13, %v3183_v23  ;;  %vm8064_vm9 = vcmp.ne.s32.totalorder %v2336_v59, 0  ;;  %v8099_v23 = vld [vmem:[#allocation3 + $0x40] sm:$0xff]  ;;  %1442 = vperm.xlu0 %4738, %v1437_v4   ;;  %v2079_v56 = vrot.slane %v7893_v18, 2 }
 0x3fd   :  { %vm12477_vm7 = vmmov %vm12475_vm2  ;;  %v3439_v59 = vsel %vm8064_vm9, 1, %v11991_v52  ;;  %v1318_v54 = vperm.slane %v8099_v23, 4  ;;  %vm8132_vm9 = vcmp.eq.s32.totalorder %v2673_v41, 1  ;;  %v8153_v41 = vpop.permute.xlu1 %1456 }
 0x3fe   :  { %vm3934_vm2 = vmor %vm12477_vm7, %vm3806_vm1  ;;  %v3557_v21 = vperm.slane %v3439_v59, 0  ;;  %12500 = vst [vmem:[#allocation26_spill] sm:$0xff] %v8153_v41 }
 0x3ff   :  { %v4062_v1 = vsel %vm3934_vm2, %v7885_v44, 0.0  ;;  %vm2932_vm0 = vmand %vm1907_vm13, %vm2804_vm14  ;;  %v8081_v44 = vpop.permute.xlu2 %1113  ;;  %vm2231_vm14 = vcmp.ne.s32.totalorder %v2119_v3, 0  ;;  %1323 = vperm.xlu2 %4737, %v1318_v54   ;;  %vm12492_vm2 = vcmp.gt.f32.partialorder %v7967_v17, %v7403_v5 }
 0x400   :  { %v4189_v61 = vadd.f32 %v4188_v58, %v4062_v1  ;;  %vm3060_vm8 = vmor %vm1779_vm12, %vm2932_vm0  ;;  %vm1904_vm7 = vcmp.eq.f32.partialorder %v8081_v44, %v7403_v5  ;;  %v2599_v7 = vsel %vm2231_vm14, 1, %v11991_v52  ;;  %vm8181_vm14 = vcmp.eq.s32.totalorder %v3557_v21, 1 }
 0x401   :  { %v3188_v13 = vsel %vm3060_vm8, 1, %v11991_v52  ;;  %vm8092_vm11 = vmand %vm1907_vm13, %vm8056_vm5  ;;  %vm2487_vm13 = vcmp.ne.s32.totalorder %v2375_v16, 0  ;;  %vm12489_vm5 = vcmp.eq.f32.partialorder %v7967_v17, %v7403_v5  ;;  %v2338_v16 = vrot.slane %v7896_v36, 5 }
 0x402   :  { %v4190_v12 = vadd.f32 %v4189_v61, %v12488_v34  ;;  %v3325_v1 = vadd.s32 %v3321_v53, %v3188_v13  ;;  %vm2975_vm1 = vmand %vm12489_vm5, %vm8060_vm6  ;;  %v3478_v3 = vsel %vm2487_vm13, 1, %v11991_v52  ;;  %v2082_v61 = vrot.slane %v7893_v18, 5 }
 0x403   :  { %vm8121_vm10 = vmor %vm1779_vm12, %vm8092_vm11  ;;  %vm8143_vm8 = vcmp.eq.s32.totalorder %v3552_v14, 1  ;;  %vm1776_vm11 = vcmp.gt.f32.partialorder %v8081_v44, %v7403_v5  ;;  %v2722_v58 = vperm.slane %v2599_v7, 0  ;;  %v3601_v59 = vperm.slane %v3478_v3, 0 }
 0x404   :  { %vm8128_vm6 = vmor %vm12492_vm2, %vm2975_vm1  ;;  %vm8162_vm1 = vcmp.eq.s32.totalorder %v2678_v60, 1  ;;  %vm1953_vm13 = vcmp.eq.f32.partialorder %v8153_v41, %v7403_v5  ;;  %v2675_v53 = vperm.slane %v7893_v18, 0  ;;  %v12616_v3 = vmov 0 }
 0x405   :  { %vm12497_vm12 = vmmov %vm12489_vm5  ;;  %v3231_v54 = vsel %vm8128_vm6, 1, %v11991_v52 }
 0x406   :  { %vm3854_vm0 = vmand %vm12497_vm12, %vm8072_vm15  ;;  %v3329_v7 = vadd.s32 %v3325_v1, %v3231_v54  ;;  %v8209_v54 = vpop.permute.xlu0 %1162 }
 0x407   :  { %vm12501_vm5 = vmmov %vm12492_vm2  ;;  %vm2194_vm2 = vcmp.ne.s32.totalorder %v2082_v61, 0 }
 0x408   :  { %vm8158_vm15 = vmor %vm12501_vm5, %vm3854_vm0  ;;  %vm2450_vm0 = vcmp.ne.s32.totalorder %v2338_v16, 0  ;;  %v2562_v60 = vsel %vm2194_vm2, 1, %v11991_v52  ;;  %v12526_v16 = vmov 0 }
 0x409   :  { %v12503_v33 = vsel %vm8158_vm15, 4294967295, %v12502_v33  ;;  %vm2929_vm12 = vmand %vm1904_vm7, %vm8132_vm9  ;;  %v3441_v1 = vsel %vm2450_vm0, 1, %v11991_v52  ;;  %v2680_v13 = vperm.slane %v2562_v60, 0  ;;  %vm2278_vm0 = vcmp.le.s32.totalorder %v821_v40, %v4970_v42 }
 0x40a   :  { %12504 = vst [vmem:[#allocation27_spill] sm:$0xff] %v12503_v33  ;;  %vm3057_vm5 = vmor %vm1776_vm11, %vm2929_vm12  ;;  %vm8201_vm12 = vcmp.eq.s32.totalorder %v2722_v58, 1  ;;  %v3554_v58 = vperm.slane %v7896_v36, 0  ;;  %v3559_v60 = vperm.slane %v3441_v1, 0  ;;  %v8229_v14 = vsel %vm2278_vm0, 1, %v11991_v52  ;;  %v8253_v33 = vld [vmem:[#allocation3 + $0x58] sm:$0xff] }
 0x40b   :  { %v3185_v4 = vsel %vm3057_vm5, 1, %v11991_v52  ;;  %vm3808_vm9 = vmand %vm1904_vm7, %vm8143_vm8  ;;  %vm8205_vm5 = vcmp.eq.s32.totalorder %v3601_v59, 1  ;;  %vm12513_vm7 = vcmp.eq.f32.partialorder %v8083_v63, %v7403_v5  ;;  %v1339_v1 = vperm.slane %v8099_v23, 7 }
 0x40c   :  { %v3324_v21 = vadd.s32 %v3329_v7, %v3185_v4  ;;  %vm3936_vm2 = vmor %vm1776_vm11, %vm3808_vm9  ;;  %vm2022_vm11 = vcmp.lt.s32.totalorder %v821_v40, %v4970_v42  ;;  %vm12514_vm9 = vcmp.gt.f32.partialorder %v8083_v63, %v7403_v5  ;;  %v8223_v7 = vpop.permute.xlu2 %1127  ;;  %v1458_v51 = vperm.slane %v8253_v33, 0 }
 0x40d   :  { %v4064_v34 = vsel %vm3936_vm2, %v8081_v44, 0.0  ;;  %vm2934_vm8 = vmand %vm12513_vm7, %vm8162_vm1  ;;  %v8226_v44 = vsel %vm2022_vm11, 1, %v11991_v52  ;;  %v2084_v23 = vrot.slane %v7893_v18, 7  ;;  %1344 = vperm.xlu2 %4737, %v1339_v1   ;;  %vm12519_vm11 = vcmp.gt.f32.partialorder %v8153_v41, %v7403_v5 }
 0x40e   :  { %v4191_v59 = vadd.f32 %v4190_v12, %v4064_v34  ;;  %vm3062_vm6 = vmor %vm12514_vm9, %vm2934_vm8  ;;  %v2121_v12 = vrot.slane %v8226_v44, 2  ;;  %v2377_v34 = vrot.slane %v8229_v14, 2  ;;  %1463 = vperm.xlu0 %4738, %v1458_v51  }
 0x40f   :  { %v3190_v4 = vsel %vm3062_vm6, 1, %v11991_v52  ;;  %vm12515_vm1 = vmmov %vm12513_vm7 }
 0x410   :  { %vm3813_vm2 = vmand %vm12515_vm1, %vm8181_vm14  ;;  %v8244_v40 = vadd.f32 %v4191_v59, %v4065_v27  ;;  %v3328_v17 = vadd.s32 %v3324_v21, %v3190_v4  ;;  %vm2233_vm14 = vcmp.ne.s32.totalorder %v2121_v12, 0  ;;  %vm2489_vm8 = vcmp.ne.s32.totalorder %v2377_v34, 0  ;;  %v8312_v12 = vpop.permute.xlu1 %1477  ;;  %v8332_v27 = vpop.permute.xlu0 %1176 }
 0x411   :  { %vm12516_vm6 = vmmov %vm12514_vm9  ;;  %vm8269_vm9 = vcmp.eq.s32.totalorder %v2680_v13, 1  ;;  %v2601_v21 = vsel %vm2233_vm14, 1, %v11991_v52  ;;  %v3480_v51 = vsel %vm2489_vm8, 1, %v11991_v52  ;;  %12533 = vst [vmem:[#allocation29_spill] sm:$0xff] %v8312_v12 }
 0x412   :  { %vm8249_vm7 = vmor %vm12516_vm6, %vm3813_vm2  ;;  %vm1783_vm6 = vcmp.gt.f32.partialorder %v8209_v54, %v7403_v5  ;;  %v3604_v34 = vperm.slane %v3480_v51, 0 }
 0x413   :  { %vm2978_vm4 = vmand %vm1953_vm13, %vm8201_vm12  ;;  %vm8276_vm12 = vcmp.ne.s32.totalorder %v2084_v23, 0 }
 0x414   :  { %vm3106_vm0 = vmor %vm12519_vm11, %vm2978_vm4  ;;  %vm8287_vm4 = vcmp.eq.s32.totalorder %v2675_v53, 1  ;;  %v2564_v1 = vsel %vm8276_vm12, 1, %v11991_v52  ;;  %v8357_v41 = vpop.permute.xlu2 %1141  ;;  %vm8378_vm15 = vcmp.eq.s32.totalorder %v3604_v34, 1 }
 0x415   :  { %vm3857_vm2 = vmand %vm1953_vm13, %vm8205_vm5  ;;  %v3234_v59 = vsel %vm3106_vm0, 1, %v11991_v52  ;;  %vm8302_vm13 = vcmp.eq.s32.totalorder %v3559_v60, 1  ;;  %vm8306_vm5 = vcmp.eq.s32.totalorder %v3554_v58, 1  ;;  %vm12534_vm0 = vcmp.eq.f32.partialorder %v8209_v54, %v7403_v5 }
 0x416   :  { %vm8298_vm1 = vmor %vm12519_vm11, %vm3857_vm2  ;;  %v2725_v60 = vperm.slane %v2601_v21, 0  ;;  %vm8322_vm11 = vcmp.ne.s32.totalorder %v2340_v39, 0  ;;  %v3332_v23 = vadd.s32 %v3328_v17, %v3234_v59  ;;  %v2335_v21 = vrot.slane %v7896_v36, 2 }
 0x417   :  { %v12527_v16 = vsel %vm8298_vm1, 4294967295, %v12526_v16  ;;  %vm2936_vm2 = vmand %vm12534_vm0, %vm8269_vm9  ;;  %v2124_v17 = vrot.slane %v8226_v44, 5  ;;  %v2682_v59 = vperm.slane %v2564_v1, 0  ;;  %v3443_v4 = vsel %vm8322_vm11, 1, %v11991_v52 }
 0x418   :  { %12528 = vst [vmem:[#allocation28_spill] sm:$0xff] %v12527_v16  ;;  %vm3064_vm14 = vmor %vm1783_vm6, %vm2936_vm2  ;;  %vm2447_vm11 = vcmp.ne.s32.totalorder %v2335_v21, 0  ;;  %vm8374_vm1 = vcmp.eq.s32.totalorder %v2725_v60, 1  ;;  %v2380_v58 = vrot.slane %v8229_v14, 5  ;;  %v12556_v16 = vsel %vm8121_vm10, %v7922_v9, 0.0  ;;  %v8442_v28 = vpop.permute.xlu1 %1498 }
 0x419   :  { %v3192_v39 = vsel %vm3064_vm14, 1, %v11991_v52  ;;  %vm12537_vm9 = vmmov %vm12534_vm0  ;;  %vm2191_vm14 = vcmp.ne.s32.totalorder %v2079_v56, 0  ;;  %vm12541_vm0 = vcmp.gt.f32.partialorder %v8223_v7, %v7403_v5  ;;  %vm8395_vm3 = vcmp.eq.s32.totalorder %v2682_v59, 1  ;;  %12561 = vst [vmem:[#allocation31_spill] sm:$0xff] %v8442_v28 }
 0x41a   :  { %vm3815_vm12 = vmand %vm12537_vm9, %vm8302_vm13  ;;  %v3323_v61 = vadd.s32 %v3332_v23, %v3192_v39  ;;  %v3561_v23 = vperm.slane %v3443_v4, 0  ;;  %v2559_v60 = vsel %vm2191_vm14, 1, %v11991_v52  ;;  %v3438_v53 = vsel %vm2447_vm11, 1, %v11991_v52 }
 0x41b   :  { %vm8350_vm8 = vmor %vm1783_vm6, %vm3815_vm12  ;;  %vm12540_vm6 = vcmp.eq.f32.partialorder %v8223_v7, %v7403_v5  ;;  %v1360_v59 = vperm.slane %v7486_v11, 2  ;;  %v1479_v56 = vperm.slane %v8253_v33, 3  ;;  %vm12562_vm10 = vcmp.eq.f32.partialorder %v8332_v27, %v7403_v5 }
 0x41c   :  { %vm2931_vm13 = vmand %vm12540_vm6, %vm8287_vm4  ;;  %vm2236_vm4 = vcmp.ne.s32.totalorder %v2124_v17, 0  ;;  %v2341_v21 = vrot.slane %v5894_v49, 1  ;;  %v1500_v9 = vperm.slane %v8253_v33, 6 }
 0x41d   :  { %vm3059_vm2 = vmor %vm12541_vm0, %vm2931_vm13  ;;  %vm1780_vm0 = vcmp.gt.f32.partialorder %v8357_v41, %v7403_v5  ;;  %vm12546_vm13 = vcmp.gt.f32.partialorder %v8223_v7, %v7403_v5  ;;  %v2604_v17 = vsel %vm2236_vm4, 1, %v11991_v52  ;;  %vm8424_vm4 = vcmp.eq.s32.totalorder %v3561_v23, 1  ;;  %1365 = vperm.xlu2 %4737, %v1360_v59   ;;  %1484 = vperm.xlu0 %4738, %v1479_v56   ;;  %v8462_v59 = vpop.permute.xlu2 %1155 }
 0x41e   :  { %v3187_v1 = vsel %vm3059_vm2, 1, %v11991_v52  ;;  %vm3810_vm9 = vmand %vm12540_vm6, %vm8306_vm5  ;;  %vm2492_vm2 = vcmp.ne.s32.totalorder %v2380_v58, 0  ;;  %vm12549_vm5 = vcmp.eq.f32.partialorder %v8312_v12, %v7403_v5  ;;  %vm1908_vm6 = vcmp.eq.f32.partialorder %v8357_v41, %v7403_v5 }
 0x41f   :  { %v3327_v34 = vadd.s32 %v3323_v61, %v3187_v1  ;;  %vm3938_vm12 = vmor %vm12546_vm13, %vm3810_vm9  ;;  %v3483_v61 = vsel %vm2492_vm2, 1, %v11991_v52  ;;  %vm12550_vm9 = vcmp.gt.f32.partialorder %v8312_v12, %v7403_v5  ;;  %v2081_v1 = vrot.slane %v7893_v18, 4 }
 0x420   :  { %v4066_v39 = vsel %vm3938_vm12, %v8223_v7, 0.0  ;;  %vm2981_vm14 = vmand %vm12549_vm5, %vm8374_vm1  ;;  %v2677_v7 = vperm.slane %v2559_v60, 0  ;;  %v2337_v60 = vrot.slane %v7896_v36, 4  ;;  %v12558_v23 = vmov 0 }
 0x421   :  { %v4193_v4 = vadd.f32 %v8244_v40, %v4066_v39  ;;  %vm8413_vm11 = vmor %vm12550_vm9, %vm2981_vm14  ;;  %v3556_v39 = vperm.slane %v3438_v53, 0  ;;  %v2728_v10 = vperm.slane %v2604_v17, 0  ;;  %v3607_v53 = vperm.slane %v3483_v61, 0 }
 0x422   :  { %vm12553_vm1 = vmmov %vm12549_vm5  ;;  %vm2193_vm2 = vcmp.ne.s32.totalorder %v2081_v1, 0  ;;  %v3237_v25 = vsel %vm8413_vm11, 1, %v11991_v52  ;;  %vm2449_vm14 = vcmp.ne.s32.totalorder %v2337_v60, 0  ;;  %v2339_v40 = vrot.slane %v7896_v36, 6 }
 0x423   :  { %vm3860_vm12 = vmand %vm12553_vm1, %vm8378_vm15  ;;  %v4194_v13 = vadd.f32 %v4193_v4, %v12556_v16  ;;  %v2085_v16 = vrot.slane %v5839_v43, 1  ;;  %v3331_v61 = vadd.s32 %v3327_v34, %v3237_v25  ;;  %vm2805_vm1 = vcmp.eq.s32.totalorder %v2677_v7, 1 }
 0x424   :  { %vm12557_vm13 = vmmov %vm12550_vm9  ;;  %vm12563_vm9 = vcmp.gt.f32.partialorder %v8332_v27, %v7403_v5  ;;  %v2561_v58 = vsel %vm2193_vm2, 1, %v11991_v52  ;;  %v3440_v56 = vsel %vm2449_vm14, 1, %v11991_v52  ;;  %v12583_v60 = vmov 0 }
 0x425   :  { %vm8438_vm15 = vmor %vm12557_vm13, %vm3860_vm12  ;;  %vm2197_vm2 = vcmp.ne.s32.totalorder %v2085_v16, 0  ;;  %v3558_v25 = vperm.slane %v3440_v56, 0  ;;  %1505 = vperm.xlu0 %4738, %v1500_v9   ;;  %v2083_v56 = vrot.slane %v7893_v18, 6 }
 0x426   :  { %v12559_v23 = vsel %vm8438_vm15, 4294967295, %v12558_v23  ;;  %vm2938_vm5 = vmand %vm12562_vm10, %vm8395_vm3  ;;  %vm2453_vm3 = vcmp.ne.s32.totalorder %v2341_v21, 0 }
 0x427   :  { %12560 = vst [vmem:[#allocation30_spill] sm:$0xff] %v12559_v23  ;;  %vm3066_vm11 = vmor %vm12563_vm9, %vm2938_vm5  ;;  %vm8488_vm9 = vcmp.eq.s32.totalorder %v2728_v10, 1  ;;  %v2679_v10 = vperm.slane %v2561_v58, 0 }
 0x428   :  { %v3194_v4 = vsel %vm3066_vm11, 1, %v11991_v52  ;;  %vm12564_vm12 = vmmov %vm12562_vm10  ;;  %vm8479_vm10 = vcmp.eq.s32.totalorder %v3556_v39, 1  ;;  %v8500_v39 = vpop.permute.xlu0 %1190 }
 0x429   :  { %v3335_v1 = vadd.s32 %v3331_v61, %v3194_v4  ;;  %vm8475_vm13 = vmand %vm12564_vm12, %vm8424_vm4  ;;  %vm8492_vm4 = vcmp.eq.s32.totalorder %v3607_v53, 1  ;;  %v822_v53 = vadd.s32 96, %v4981_v2  ;;  %v2565_v61 = vsel %vm2197_vm2, 1, %v11991_v52 }
 0x42a   :  { %vm2933_vm14 = vmand %vm1908_vm6, %vm2805_vm1  ;;  %v1381_v4 = vperm.slane %v7486_v11, 5  ;;  %v3444_v11 = vsel %vm2453_vm3, 1, %v11991_v52  ;;  %v2684_v7 = vperm.slane %v2565_v61, 0  ;;  %v8572_v61 = vpop.permute.xlu1 %1519 }
 0x42b   :  { %vm3061_vm1 = vmor %vm1780_vm0, %vm2933_vm14  ;;  %vm2023_vm12 = vcmp.lt.s32.totalorder %v822_v53, %v4970_v42  ;;  %vm2279_vm5 = vcmp.le.s32.totalorder %v822_v53, %v4970_v42  ;;  %12587 = vst [vmem:[#allocation35_spill] sm:$0xff] %v8572_v61 }
 0x42c   :  { %v3189_v16 = vsel %vm3061_vm1, 1, %v11991_v52  ;;  %vm3812_vm11 = vmand %vm1908_vm6, %vm8479_vm10  ;;  %vm12573_vm6 = vcmp.eq.f32.partialorder %v8442_v28, %v7403_v5  ;;  %v8530_v58 = vsel %vm2023_vm12, 1, %v11991_v52  ;;  %1386 = vperm.xlu2 %4737, %v1381_v4   ;;  %vm8546_vm12 = vcmp.eq.s32.totalorder %v3558_v25, 1 }
 0x42d   :  { %v3330_v17 = vadd.s32 %v3335_v1, %v3189_v16  ;;  %vm3940_vm14 = vmor %vm1780_vm0, %vm3812_vm11  ;;  %12574 = vst [vmem:[#allocation32_spill] sm:$0xff] %v8530_v58  ;;  %vm12575_vm0 = vcmp.gt.f32.partialorder %v8442_v28, %v7403_v5  ;;  %vm8536_vm11 = vcmp.eq.s32.totalorder %v2679_v10, 1  ;;  %v8557_v9 = vsel %vm2279_vm5, 1, %v11991_v52 }
 0x42e   :  { %v4068_v21 = vsel %vm3940_vm14, %v8357_v41, 0.0  ;;  %vm2984_vm10 = vmand %vm12573_vm6, %vm8488_vm9  ;;  %12581 = vst [vmem:[#allocation33_spill] sm:$0xff] %v8557_v9  ;;  %v12586_v10 = vsel %vm8249_vm7, %v8083_v63, 0.0  ;;  %v3563_v16 = vperm.slane %v3444_v11, 0  ;;  %v2731_v53 = vperm.slane %v8530_v58, 0 }
 0x42f   :  { %v4195_v1 = vadd.f32 %v4194_v13, %v4068_v21  ;;  %vm3112_vm2 = vmor %vm12575_vm0, %vm2984_vm10  ;;  %v8550_v13 = vld [vmem:[#allocation11] sm:$0xff]  ;;  %vm12588_vm5 = vcmp.eq.f32.partialorder %v8462_v59, %v7403_v5  ;;  %v8587_v21 = vpop.permute.xlu2 %1169  ;;  %v2088_v11 = vrot.slane %v5839_v43, 4  ;;  %vm12591_vm7 = vcmp.gt.f32.partialorder %v8332_v27, %v7403_v5 }
 0x430   :  { %vm12578_vm3 = vmmov %vm12573_vm6  ;;  %vm1915_vm14 = vcmp.eq.f32.partialorder %v8500_v39, %v8550_v13  ;;  %vm2195_vm6 = vcmp.ne.s32.totalorder %v2083_v56, 0  ;;  %v3240_v36 = vsel %vm3112_vm2, 1, %v11991_v52  ;;  %vm8582_vm2 = vcmp.ne.s32.totalorder %v2339_v40, 0  ;;  %v8660_v4 = vpop.permute.xlu0 %1211 }
 0x431   :  { %vm3863_vm9 = vmand %vm12578_vm3, %vm8492_vm4  ;;  %v4196_v25 = vadd.f32 %v4195_v1, %v12586_v10  ;;  %v2563_v63 = vsel %vm2195_vm6, 1, %v11991_v52  ;;  %v3334_v1 = vadd.s32 %v3330_v17, %v3240_v36  ;;  %v3610_v41 = vperm.slane %v8557_v9, 0  ;;  %v8680_v36 = vld [vmem:[#allocation3 + $0x60] sm:$0xff] }
 0x432   :  { %vm12582_vm4 = vmmov %vm12575_vm0  ;;  %v2344_v40 = vrot.slane %v5894_v49, 4  ;;  %v2681_v17 = vperm.slane %v2563_v63, 0  ;;  %vm3691_vm1 = vcmp.eq.s32.totalorder %v3563_v16, 1 }
 0x433   :  { %vm8563_vm10 = vmor %vm12582_vm4, %vm3863_vm9  ;;  %vm2812_vm4 = vcmp.eq.s32.totalorder %v2684_v7, 1  ;;  %v3442_v7 = vsel %vm8582_vm2, 1, %v11991_v52 }
 0x434   :  { %v12584_v60 = vsel %vm8563_vm10, 4294967295, %v12583_v60  ;;  %vm2935_vm0 = vmand %vm12588_vm5, %vm8536_vm11  ;;  %vm12594_vm11 = vcmp.gt.f32.partialorder %v8462_v59, %v7403_v5 }
 0x435   :  { %12585 = vst [vmem:[#allocation34_spill] sm:$0xff] %v12584_v60  ;;  %vm8595_vm3 = vmor %vm12591_vm7, %vm8475_vm13  ;;  %vm8633_vm7 = vcmp.eq.s32.totalorder %v3610_v41, 1  ;;  %v8705_v60 = vpop.permute.xlu1 %1540 }
 0x436   :  { %vm3063_vm9 = vmor %vm12594_vm11, %vm2935_vm0  ;;  %12619 = vst [vmem:[#allocation37_spill] sm:$0xff] %v8705_v60 }
 0x437   :  { %v3191_v10 = vsel %vm3063_vm9, 1, %v11991_v52  ;;  %vm12595_vm13 = vmmov %vm12588_vm5  ;;  %vm2200_vm9 = vcmp.ne.s32.totalorder %v2088_v11, 0  ;;  %vm1912_vm5 = vcmp.eq.f32.partialorder %v8587_v21, %v8550_v13  ;;  %v3560_v11 = vperm.slane %v3442_v7, 0 }
 0x438   :  { %vm3814_vm6 = vmand %vm12595_vm13, %vm8546_vm12  ;;  %v3338_v34 = vadd.s32 %v3334_v1, %v3191_v10  ;;  %vm8624_vm13 = vcmp.eq.s32.totalorder %v2731_v53, 1  ;;  %v2385_v53 = vrot.slane %v8557_v9, 3  ;;  %v2568_v1 = vsel %vm2200_vm9, 1, %v11991_v52 }
 0x439   :  { %vm12596_vm0 = vmmov %vm12594_vm11  ;;  %v12607_v10 = vsel %vm8350_vm8, %v8209_v54, 0.0  ;;  %v1402_v54 = vperm.slane %v7970_v48, 0  ;;  %vm12609_vm8 = vcmp.gt.f32.partialorder %v8572_v61, %v8550_v13  ;;  %v2687_v7 = vperm.slane %v2568_v1, 0 }
 0x43a   :  { %vm3942_vm11 = vmor %vm12596_vm0, %vm3814_vm6  ;;  %vm2456_vm6 = vcmp.ne.s32.totalorder %v2344_v40, 0  ;;  %vm12599_vm0 = vcmp.gt.f32.partialorder %v8500_v39, %v7403_v5  ;;  %v2347_v1 = vrot.slane %v5894_v49, 7 }
 0x43b   :  { %v4070_v18 = vsel %vm3942_vm11, %v8462_v59, 0.0  ;;  %vm2940_vm12 = vmand %vm1915_vm14, %vm2812_vm4  ;;  %v2129_v59 = vrot.slane %v8530_v58, 3  ;;  %vm8643_vm11 = vcmp.eq.s32.totalorder %v2681_v17, 1  ;;  %v3447_v17 = vsel %vm2456_vm6, 1, %v11991_v52  ;;  %1407 = vperm.xlu2 %4737, %v1402_v54  }
 0x43c   :  { %v4197_v16 = vadd.f32 %v4196_v25, %v4070_v18  ;;  %vm3068_vm2 = vmor %vm12599_vm0, %vm2940_vm12  ;;  %v4073_v54 = vsel %vm8595_vm3, %v8332_v27, 0.0 }
 0x43d   :  { %v3196_v63 = vsel %vm3068_vm2, 1, %v11991_v52  ;;  %vm3819_vm4 = vmand %vm1915_vm14, %vm3691_vm1  ;;  %vm2241_vm1 = vcmp.ne.s32.totalorder %v2129_v59, 0  ;;  %vm12608_vm14 = vcmp.eq.f32.partialorder %v8572_v61, %v8550_v13  ;;  %vm2497_vm2 = vcmp.ne.s32.totalorder %v2385_v53, 0 }
 0x43e   :  { %v3333_v41 = vadd.s32 %v3338_v34, %v3196_v63  ;;  %vm12604_vm12 = vmmov %vm12599_vm0  ;;  %v4198_v18 = vadd.f32 %v4197_v16, %v12607_v10  ;;  %v2609_v5 = vsel %vm2241_vm1, 1, %v11991_v52  ;;  %v3488_v16 = vsel %vm2497_vm2, 1, %v11991_v52  ;;  %v8696_v10 = vpop.permute.xlu2 %1183 }
 0x43f   :  { %vm8651_vm0 = vmor %vm12604_vm12, %vm3819_vm4  ;;  %v1521_v59 = vperm.slane %v8680_v36, 1  ;;  %v2091_v53 = vrot.slane %v5839_v43, 7  ;;  %vm8689_vm12 = vcmp.eq.s32.totalorder %v3560_v11, 1  ;;  %vm1784_vm1 = vcmp.gt.f32.partialorder %v8587_v21, %v8550_v13 }
 0x440   :  { %vm2987_vm9 = vmand %vm12608_vm14, %vm8624_vm13  ;;  %v3566_v34 = vperm.slane %v3447_v17, 0  ;;  %v2734_v11 = vperm.slane %v2609_v5, 0  ;;  %v3613_v28 = vperm.slane %v3488_v16, 0  ;;  %v2388_v16 = vrot.slane %v8557_v9, 6 }
 0x441   :  { %vm8675_vm6 = vmor %vm12609_vm8, %vm2987_vm9  ;;  %1526 = vperm.xlu0 %4738, %v1521_v59   ;;  %v1423_v63 = vperm.slane %v7970_v48, 3  ;;  %v2089_v9 = vrot.slane %v5839_v43, 5  ;;  %v2101_v5 = vrot.slane %v6956_v62, 3 }
 0x442   :  { %vm12612_vm13 = vmmov %vm12608_vm14  ;;  %v3243_v12 = vsel %vm8675_vm6, 1, %v11991_v52  ;;  %vm8746_vm6 = vcmp.eq.s32.totalorder %v2734_v11, 1 }
 0x443   :  { %vm3866_vm4 = vmand %vm12612_vm13, %vm8633_vm7  ;;  %vm2203_vm7 = vcmp.ne.s32.totalorder %v2091_v53, 0  ;;  %v3337_v17 = vadd.s32 %v3333_v41, %v3243_v12  ;;  %vm2815_vm13 = vcmp.eq.s32.totalorder %v2687_v7, 1  ;;  %v8764_v53 = vpop.permute.xlu0 %1232  ;;  %1428 = vperm.xlu2 %4737, %v1423_v63   ;;  %v8821_v63 = vpop.permute.xlu1 %1561 }
 0x444   :  { %vm12615_vm14 = vmmov %vm12609_vm8  ;;  %vm1965_vm8 = vcmp.eq.f32.partialorder %v8705_v60, %v8550_v13  ;;  %v2571_v12 = vsel %vm2203_vm7, 1, %v11991_v52 }
 0x445   :  { %vm8701_vm9 = vmor %vm12615_vm14, %vm3866_vm4  ;;  %vm2459_vm4 = vcmp.ne.s32.totalorder %v2347_v1, 0  ;;  %vm1837_vm14 = vcmp.gt.f32.partialorder %v8705_v60, %v8550_v13  ;;  %v823_v60 = vadd.s32 104, %v4981_v2 }
 0x446   :  { %v12617_v3 = vsel %vm8701_vm9, 4294967295, %v12616_v3  ;;  %vm2937_vm2 = vmand %vm1912_vm5, %vm8643_vm11  ;;  %v3450_v7 = vsel %vm2459_vm4, 1, %v11991_v52 }
 0x447   :  { %12618 = vst [vmem:[#allocation36_spill] sm:$0xff] %v12617_v3  ;;  %vm3065_vm3 = vmor %vm1784_vm1, %vm2937_vm2  ;;  %vm2280_vm10 = vcmp.le.s32.totalorder %v823_v60, %v4970_v42 }
 0x448   :  { %v3193_v27 = vsel %vm3065_vm3, 1, %v11991_v52  ;;  %vm3816_vm11 = vmand %vm1912_vm5, %vm8689_vm12  ;;  %vm8742_vm3 = vcmp.eq.s32.totalorder %v3566_v34, 1  ;;  %vm8750_vm5 = vcmp.eq.s32.totalorder %v3613_v28, 1  ;;  %vm12626_vm12 = vcmp.eq.f32.partialorder %v8660_v4, %v8550_v13 }
 0x449   :  { %v3341_v56 = vadd.s32 %v3337_v17, %v3193_v27  ;;  %vm3944_vm2 = vmor %vm1784_vm1, %vm3816_vm11  ;;  %v2132_v34 = vrot.slane %v8530_v58, 6  ;;  %vm12627_vm1 = vcmp.gt.f32.partialorder %v8660_v4, %v8550_v13  ;;  %v2690_v28 = vperm.slane %v2571_v12, 0 }
 0x44a   :  { %v4072_v51 = vsel %vm3944_vm2, %v8587_v21, 0.0  ;;  %vm2943_vm7 = vmand %vm12626_vm12, %vm2815_vm13  ;;  %v2683_v21 = vperm.slane %v5839_v43, 0  ;;  %v3569_v27 = vperm.slane %v3450_v7, 0  ;;  %v8796_v7 = vpop.permute.xlu2 %1197 }
 0x44b   :  { %v4199_v59 = vadd.f32 %v4198_v18, %v4072_v51  ;;  %vm3071_vm11 = vmor %vm12627_vm1, %vm2943_vm7  ;;  %vm2244_vm2 = vcmp.ne.s32.totalorder %v2132_v34, 0  ;;  %v1542_v18 = vperm.slane %v8680_v36, 4  ;;  %v8891_v51 = vpop.permute.xlu0 %1253 }
 0x44c   :  { %v3199_v1 = vsel %vm3071_vm11, 1, %v11991_v52  ;;  %vm12628_vm13 = vmmov %vm12626_vm12  ;;  %vm2500_vm12 = vcmp.ne.s32.totalorder %v2388_v16, 0  ;;  %v2612_v25 = vsel %vm2244_vm2, 1, %v11991_v52 }
 0x44d   :  { %vm3822_vm4 = vmand %vm12628_vm13, %vm8742_vm3  ;;  %v3336_v11 = vadd.s32 %v3341_v56, %v3199_v1  ;;  %v8782_v12 = vadd.f32 %v4199_v59, %v4073_v54  ;;  %v3562_v56 = vperm.slane %v5894_v49, 0  ;;  %v3491_v34 = vsel %vm2500_vm12, 1, %v11991_v52  ;;  %1547 = vperm.xlu0 %4738, %v1542_v18  }
 0x44e   :  { %vm12629_vm7 = vmmov %vm12627_vm1  ;;  %v2086_v54 = vrot.slane %v5839_v43, 2  ;;  %vm8805_vm13 = vcmp.eq.s32.totalorder %v2690_v28, 1  ;;  %v2342_v59 = vrot.slane %v5894_v49, 2  ;;  %v2737_v28 = vperm.slane %v2612_v25, 0 }
 0x44f   :  { %vm8778_vm1 = vmor %vm12629_vm7, %vm3822_vm4  ;;  %vm1921_vm4 = vcmp.eq.f32.partialorder %v8764_v53, %v8550_v13  ;;  %v2093_v1 = vrot.slane %v6286_v55, 2  ;;  %v12636_v18 = vmov 0  ;;  %v3616_v25 = vperm.slane %v3491_v34, 0 }
 0x450   :  { %vm2990_vm3 = vmand %vm1965_vm8, %vm8746_vm6  ;;  %vm2198_vm7 = vcmp.ne.s32.totalorder %v2086_v54, 0  ;;  %vm8831_vm6 = vcmp.eq.s32.totalorder %v3569_v27, 1  ;;  %vm8849_vm12 = vcmp.eq.s32.totalorder %v3562_v56, 1  ;;  %v2349_v34 = vrot.slane %v6400_v38, 2 }
 0x451   :  { %vm8801_vm11 = vmor %vm1837_vm14, %vm2990_vm3  ;;  %v1444_v27 = vperm.slane %v7970_v48, 6 }
 0x452   :  { %vm3869_vm2 = vmand %vm1965_vm8, %vm8750_vm5  ;;  %vm2454_vm5 = vcmp.ne.s32.totalorder %v2342_v59, 0  ;;  %vm12645_vm8 = vcmp.gt.f32.partialorder %v8764_v53, %v8550_v13  ;;  %v3246_v56 = vsel %vm8801_vm11, 1, %v11991_v52  ;;  %vm12648_vm11 = vcmp.gt.f32.partialorder %v8764_v53, %v8550_v13 }
 0x453   :  { %vm8827_vm3 = vmor %vm1837_vm14, %vm3869_vm2  ;;  %vm8845_vm2 = vcmp.eq.s32.totalorder %v2683_v21, 1  ;;  %v2566_v21 = vsel %vm2198_vm7, 1, %v11991_v52  ;;  %v3445_v41 = vsel %vm2454_vm5, 1, %v11991_v52  ;;  %vm2205_vm5 = vcmp.ne.s32.totalorder %v2093_v1, 0  ;;  %1449 = vperm.xlu2 %4737, %v1444_v27   ;;  %v8968_v27 = vpop.permute.xlu1 %1582  ;;  %v9005_v61 = vpop.permute.xlu0 %1274 }
 0x454   :  { %v12637_v18 = vsel %vm8827_vm3, 4294967295, %v12636_v18  ;;  %vm2946_vm14 = vmand %vm1921_vm4, %vm8805_vm13  ;;  %v3340_v54 = vadd.s32 %v3336_v11, %v3246_v56  ;;  %v2685_v1 = vperm.slane %v2566_v21, 0  ;;  %v3564_v56 = vperm.slane %v3445_v41, 0  ;;  %v8926_v41 = vpop.permute.xlu2 %1218 }
 0x455   :  { %12638 = vst [vmem:[#allocation38_spill] sm:$0xff] %v12637_v18  ;;  %vm3074_vm3 = vmor %vm12645_vm8, %vm2946_vm14  ;;  %vm8871_vm14 = vcmp.eq.s32.totalorder %v2737_v28, 1  ;;  %v2573_v18 = vsel %vm2205_vm5, 1, %v11991_v52  ;;  %vm2024_vm7 = vcmp.lt.s32.totalorder %v823_v60, %v4970_v42  ;;  %v8924_v21 = vsel %vm2280_vm10, 1, %v11991_v52 }
 0x456   :  { %vm3825_vm8 = vmand %vm1921_vm4, %vm8831_vm6  ;;  %v3202_v16 = vsel %vm3074_vm3, 1, %v11991_v52  ;;  %vm8887_vm6 = vcmp.eq.s32.totalorder %v3616_v25, 1  ;;  %vm12653_vm4 = vcmp.eq.f32.partialorder %v8696_v10, %v8550_v13  ;;  %v2390_v60 = vrot.slane %v8924_v21, 1 }
 0x457   :  { %vm8883_vm13 = vmor %vm12648_vm11, %vm3825_vm8  ;;  %vm2461_vm8 = vcmp.ne.s32.totalorder %v2349_v34, 0  ;;  %vm12654_vm11 = vcmp.gt.f32.partialorder %v8696_v10, %v8550_v13  ;;  %v3344_v11 = vadd.s32 %v3340_v54, %v3202_v16  ;;  %v8921_v34 = vsel %vm2024_vm7, 1, %v11991_v52 }
 0x458   :  { %vm2939_vm3 = vmand %vm12653_vm4, %vm8845_vm2  ;;  %v3452_v48 = vsel %vm2461_vm8, 1, %v11991_v52  ;;  %v2134_v23 = vrot.slane %v8921_v34, 1  ;;  %v1563_v54 = vperm.slane %v8680_v36, 7  ;;  %vm12659_vm10 = vcmp.eq.f32.partialorder %v8821_v63, %v8550_v13 }
 0x459   :  { %vm8905_vm9 = vmor %vm12654_vm11, %vm2939_vm3  ;;  %vm8941_vm7 = vcmp.eq.s32.totalorder %v2685_v1, 1  ;;  %v2693_v3 = vperm.slane %v2573_v18, 0  ;;  %vm12662_vm8 = vcmp.gt.f32.partialorder %v8821_v63, %v8550_v13  ;;  %v2345_v59 = vrot.slane %v5894_v49, 5 }
 0x45a   :  { %vm12657_vm2 = vmmov %vm12653_vm4  ;;  %1568 = vperm.xlu0 %4738, %v1563_v54   ;;  %v3195_v18 = vsel %vm8905_vm9, 1, %v11991_v52  ;;  %v12669_v25 = vmov 0  ;;  %v12671_v28 = vsel %vm8651_vm0, %v8500_v39, 0.0  ;;  %v2096_v39 = vrot.slane %v6286_v55, 5 }
 0x45b   :  { %vm3818_vm4 = vmand %vm12657_vm2, %vm8849_vm12  ;;  %v3339_v49 = vadd.s32 %v3344_v11, %v3195_v18  ;;  %vm12673_vm0 = vcmp.gt.f32.partialorder %v8796_v7, %v8550_v13  ;;  %v2352_v54 = vrot.slane %v6400_v38, 5 }
 0x45c   :  { %vm12658_vm5 = vmmov %vm12654_vm11 }
 0x45d   :  { %vm3946_vm11 = vmor %vm12658_vm5, %vm3818_vm4  ;;  %vm2246_vm4 = vcmp.ne.s32.totalorder %v2134_v23, 0  ;;  %vm2502_vm5 = vcmp.ne.s32.totalorder %v2390_v60, 0 }
 0x45e   :  { %v4074_v16 = vsel %vm3946_vm11, %v8696_v10, 0.0  ;;  %vm2993_vm12 = vmand %vm12659_vm10, %vm8871_vm14  ;;  %v2614_v1 = vsel %vm2246_vm4, 1, %v11991_v52  ;;  %v3493_v23 = vsel %vm2502_vm5, 1, %v11991_v52 }
 0x45f   :  { %v4201_v58 = vadd.f32 %v8782_v12, %v4074_v16  ;;  %vm8950_vm2 = vmor %vm12662_vm8, %vm2993_vm12  ;;  %v3572_v12 = vperm.slane %v3452_v48, 0  ;;  %v2740_v40 = vperm.slane %v2614_v1, 0  ;;  %v3619_v11 = vperm.slane %v3493_v23, 0  ;;  %v9035_v1 = vpop.permute.xlu2 %1239 }
 0x460   :  { %vm12665_vm14 = vmmov %vm12659_vm10  ;;  %vm8963_vm10 = vcmp.eq.s32.totalorder %v3564_v56, 1  ;;  %v2137_v23 = vrot.slane %v8921_v34, 4  ;;  %v2094_v48 = vrot.slane %v6286_v55, 3 }
 0x461   :  { %vm3872_vm11 = vmand %vm12665_vm14, %vm8887_vm6  ;;  %v4202_v56 = vadd.f32 %v4201_v58, %v12671_v28  ;;  %vm2201_vm6 = vcmp.ne.s32.totalorder %v2089_v9, 0  ;;  %vm1924_vm14 = vcmp.eq.f32.partialorder %v8891_v51, %v8550_v13  ;;  %v3249_v58 = vsel %vm8950_vm2, 1, %v11991_v52 }
 0x462   :  { %vm12668_vm12 = vmmov %vm12662_vm8  ;;  %vm12672_vm8 = vcmp.eq.f32.partialorder %v8796_v7, %v8550_v13  ;;  %v2569_v60 = vsel %vm2201_vm6, 1, %v11991_v52  ;;  %v3343_v16 = vadd.s32 %v3339_v49, %v3249_v58  ;;  %vm3700_vm3 = vcmp.eq.s32.totalorder %v3572_v12, 1 }
 0x463   :  { %vm8973_vm9 = vmor %vm12668_vm12, %vm3872_vm11  ;;  %vm8999_vm11 = vcmp.eq.s32.totalorder %v2693_v3, 1  ;;  %vm2457_vm12 = vcmp.ne.s32.totalorder %v2345_v59, 0  ;;  %v2688_v49 = vperm.slane %v2569_v60, 0 }
 0x464   :  { %v12670_v25 = vsel %vm8973_vm9, 4294967295, %v12669_v25  ;;  %vm2941_vm4 = vmand %vm12672_vm8, %vm8941_vm7  ;;  %v3448_v43 = vsel %vm2457_vm12, 1, %v11991_v52  ;;  %vm9051_vm12 = vcmp.eq.s32.totalorder %v3619_v11, 1 }
 0x465   :  { %vm3069_vm5 = vmor %vm12673_vm0, %vm2941_vm4  ;;  %vm9013_vm4 = vcmp.ne.s32.totalorder %v2096_v39, 0  ;;  %v2393_v39 = vrot.slane %v8924_v21, 4  ;;  %v3567_v11 = vperm.slane %v3448_v43, 0 }
 0x466   :  { %vm3820_vm2 = vmand %vm12672_vm8, %vm8963_vm10  ;;  %v3197_v10 = vsel %vm3069_vm5, 1, %v11991_v52  ;;  %vm1971_vm10 = vcmp.eq.f32.partialorder %v8968_v27, %v8550_v13  ;;  %vm9030_vm8 = vcmp.eq.s32.totalorder %v2740_v40, 1  ;;  %vm2464_vm5 = vcmp.ne.s32.totalorder %v2352_v54, 0 }
 0x467   :  { %vm3948_vm7 = vmor %vm12673_vm0, %vm3820_vm2  ;;  %vm12680_vm2 = vcmp.gt.f32.partialorder %v8891_v51, %v8550_v13  ;;  %v2576_v28 = vsel %vm9013_vm4, 1, %v11991_v52  ;;  %v3347_v40 = vadd.s32 %v3343_v16, %v3197_v10  ;;  %v3455_v3 = vsel %vm2464_vm5, 1, %v11991_v52 }
 0x468   :  { %v4076_v59 = vsel %vm3948_vm7, %v8796_v7, 0.0  ;;  %vm2949_vm6 = vmand %vm1924_vm14, %vm8999_vm11  ;;  %vm2505_vm0 = vcmp.ne.s32.totalorder %v2393_v39, 0  ;;  %vm12690_vm5 = vcmp.gt.f32.partialorder %v8968_v27, %v8550_v13  ;;  %v3575_v7 = vperm.slane %v3455_v3, 0 }
 0x469   :  { %v4203_v12 = vadd.f32 %v4202_v56, %v4076_v59  ;;  %vm9040_vm7 = vmor %vm12680_vm2, %vm2949_vm6  ;;  %vm12685_vm6 = vnez %v12106_v24  ;;  %v12695_v59 = vsel %vm8778_vm1, %v8660_v4, 0.0  ;;  %v3496_v43 = vsel %vm2505_vm0, 1, %v11991_v52 }
 0x46a   :  { %vm3828_vm11 = vmand %vm1924_vm14, %vm3700_vm3  ;;  %v12686_v58 = vsel %vm12685_vm6, %v6213_v45, 0.0  ;;  %vm2249_vm3 = vcmp.ne.s32.totalorder %v2137_v23, 0  ;;  %vm1919_vm6 = vcmp.eq.f32.partialorder %v8926_v41, %v8550_v13  ;;  %v2696_v45 = vperm.slane %v2576_v28, 0  ;;  %v9102_v28 = vpop.permute.xlu1 %1603  ;;  %v9105_v23 = vld [vmem:[#allocation3 + $0x68] sm:$0xff] }
 0x46b   :  { %v4204_v9 = vadd.f32 %v4203_v12, %v12686_v58  ;;  %vm12687_vm4 = vmmov %vm12680_vm2  ;;  %v2617_v24 = vsel %vm2249_vm3, 1, %v11991_v52  ;;  %v3205_v54 = vsel %vm9040_vm7, 1, %v11991_v52  ;;  %12696 = vst [vmem:[#allocation39_spill] sm:$0xff] %v9102_v28  ;;  %v1584_v17 = vperm.slane %v9105_v23, 2  ;;  %v9119_v58 = vpop.permute.xlu0 %1295 }
 0x46c   :  { %vm9065_vm2 = vmor %vm12687_vm4, %vm3828_vm11  ;;  %vm9088_vm4 = vcmp.eq.s32.totalorder %v2688_v49, 1  ;;  %v3342_v12 = vadd.s32 %v3347_v40, %v3205_v54  ;;  %v1465_v49 = vperm.slane %v8253_v33, 1  ;;  %v12698_v4 = vmov 0 }
 0x46d   :  { %vm2996_vm14 = vmand %vm1971_vm10, %vm9030_vm8  ;;  %v4205_v18 = vadd.f32 %v4204_v9, %v12695_v59  ;;  %vm9115_vm0 = vcmp.eq.s32.totalorder %v3567_v11, 1  ;;  %v2743_v56 = vperm.slane %v2617_v24, 0  ;;  %v3622_v39 = vperm.slane %v3496_v43, 0  ;;  %1589 = vperm.xlu0 %4738, %v1584_v17   ;;  %v9161_v59 = vpop.permute.xlu2 %1260 }
 0x46e   :  { %vm9084_vm11 = vmor %vm12690_vm5, %vm2996_vm14  ;;  %vm1927_vm14 = vcmp.eq.f32.partialorder %v9005_v61, %v8550_v13  ;;  %1470 = vperm.xlu2 %4737, %v1465_v49   ;;  %vm9154_vm3 = vcmp.eq.s32.totalorder %v3575_v7, 1  ;;  %v2140_v16 = vrot.slane %v8921_v34, 7  ;;  %v3570_v7 = vperm.slane %v6400_v38, 0 }
 0x46f   :  { %vm3875_vm8 = vmand %vm1971_vm10, %vm9051_vm12  ;;  %vm9129_vm12 = vcmp.eq.s32.totalorder %v2696_v45, 1  ;;  %v3252_v24 = vsel %vm9084_vm11, 1, %v11991_v52  ;;  %v2691_v45 = vperm.slane %v6286_v55, 0  ;;  %v2396_v49 = vrot.slane %v8924_v21, 7 }
 0x470   :  { %vm12697_vm1 = vmmov %vm12690_vm5  ;;  %vm12704_vm5 = vcmp.gt.f32.partialorder %v8926_v41, %v8550_v13  ;;  %v3346_v54 = vadd.s32 %v3342_v12, %v3252_v24  ;;  %vm12712_vm11 = vcmp.gt.f32.partialorder %v9005_v61, %v8550_v13  ;;  %v1486_v24 = vperm.slane %v8253_v33, 4 }
 0x471   :  { %vm9111_vm7 = vmor %vm12697_vm1, %vm3875_vm8  ;;  %vm9166_vm8 = vcmp.eq.s32.totalorder %v2743_v56, 1  ;;  %v2099_v10 = vrot.slane %v6956_v62, 1 }
 0x472   :  { %v12699_v4 = vsel %vm9111_vm7, 4294967295, %v12698_v4  ;;  %vm2944_vm10 = vmand %vm1919_vm6, %vm9088_vm4 }
 0x473   :  { %vm3072_vm4 = vmor %vm12704_vm5, %vm2944_vm10 }
 0x474   :  { %vm3823_vm1 = vmand %vm1919_vm6, %vm9115_vm0  ;;  %vm9170_vm6 = vcmp.eq.s32.totalorder %v3622_v39, 1  ;;  %v3200_v17 = vsel %vm3072_vm4, 1, %v11991_v52  ;;  %vm9192_vm4 = vcmp.eq.s32.totalorder %v2691_v45, 1  ;;  %v1605_v45 = vperm.slane %v9105_v23, 5 }
 0x475   :  { %vm12707_vm10 = vmmov %vm12704_vm5 }
 0x476   :  { %vm3951_vm5 = vmor %vm12707_vm10, %vm3823_vm1  ;;  %vm2252_vm10 = vcmp.ne.s32.totalorder %v2140_v16, 0  ;;  %v3350_v16 = vadd.s32 %v3346_v54, %v3200_v17  ;;  %1491 = vperm.xlu2 %4737, %v1486_v24   ;;  %1610 = vperm.xlu0 %4738, %v1605_v45   ;;  %v2350_v54 = vrot.slane %v6400_v38, 3  ;;  %v12728_v17 = vsel %vm8883_vm13, %v8764_v53, 0.0  ;;  %v9247_v45 = vpop.permute.xlu1 %1624 }
 0x477   :  { %v4079_v40 = vsel %vm3951_vm5, %v8926_v41, 0.0  ;;  %vm2952_vm0 = vmand %vm1927_vm14, %vm9129_vm12  ;;  %vm2508_vm12 = vcmp.ne.s32.totalorder %v2396_v49, 0  ;;  %v2620_v3 = vsel %vm2252_vm10, 1, %v11991_v52  ;;  %vm9225_vm10 = vcmp.eq.s32.totalorder %v3570_v7, 1 }
 0x478   :  { %v4206_v56 = vadd.f32 %v4205_v18, %v4079_v40  ;;  %vm9188_vm7 = vmor %vm12712_vm11, %vm2952_vm0  ;;  %v2699_v18 = vperm.slane %v6956_v62, 0  ;;  %vm12717_vm11 = vnez %v12148_v22  ;;  %vm12719_vm0 = vcmp.gt.f32.partialorder %v9005_v61, %v8550_v13 }
 0x479   :  { %vm3831_vm1 = vmand %vm1927_vm14, %vm9154_vm3  ;;  %v12718_v40 = vsel %vm12717_vm11, %v6394_v57, 0.0  ;;  %v3499_v9 = vsel %vm2508_vm12, 1, %v11991_v52  ;;  %vm12722_vm3 = vcmp.eq.f32.partialorder %v9102_v28, %v8550_v13  ;;  %v3578_v22 = vperm.slane %v6959_v31, 0 }
 0x47a   :  { %v4207_v49 = vadd.f32 %v4206_v56, %v12718_v40  ;;  %vm9214_vm5 = vmor %vm12719_vm0, %vm3831_vm1  ;;  %v3208_v43 = vsel %vm9188_vm7, 1, %v11991_v52  ;;  %v2746_v24 = vperm.slane %v2620_v3, 0  ;;  %vm2206_vm11 = vcmp.ne.s32.totalorder %v2094_v48, 0  ;;  %v9249_v40 = vpop.permute.xlu0 %1316 }
 0x47b   :  { %vm2999_vm14 = vmand %vm12722_vm3, %vm9166_vm8  ;;  %vm12725_vm8 = vcmp.gt.f32.partialorder %v9102_v28, %v8550_v13  ;;  %v3625_v39 = vperm.slane %v3499_v9, 0  ;;  %v2574_v53 = vsel %vm2206_vm11, 1, %v11991_v52  ;;  %v3345_v3 = vadd.s32 %v3350_v16, %v3208_v43 }
 0x47c   :  { %vm9239_vm12 = vmor %vm12725_vm8, %vm2999_vm14  ;;  %v4208_v56 = vadd.f32 %v4207_v49, %v12728_v17  ;;  %v12733_v48 = vmov 0  ;;  %v2357_v9 = vrot.slane %v6959_v31, 3  ;;  %vm12738_vm11 = vcmp.eq.f32.partialorder %v9035_v1, %v8550_v13 }
 0x47d   :  { %vm12729_vm7 = vmmov %vm12722_vm3  ;;  %vm9256_vm3 = vcmp.ne.s32.totalorder %v2350_v54, 0  ;;  %v2694_v49 = vperm.slane %v2574_v53, 0  ;;  %v9290_v54 = vpop.permute.xlu2 %1281  ;;  %vm12741_vm1 = vcmp.gt.f32.partialorder %v9035_v1, %v8550_v13  ;;  %v3255_v53 = vsel %vm9239_vm12, 1, %v11991_v52 }
 0x47e   :  { %vm3878_vm0 = vmand %vm12729_vm7, %vm9170_vm6  ;;  %v3453_v17 = vsel %vm9256_vm3, 1, %v11991_v52  ;;  %v3349_v11 = vadd.s32 %v3345_v3, %v3255_v53  ;;  %vm12749_vm3 = vcmp.gt.f32.partialorder %v9035_v1, %v8550_v13  ;;  %vm2469_vm15 = vcmp.ne.s32.totalorder %v2357_v9, 0 }
 0x47f   :  { %vm12732_vm13 = vmmov %vm12725_vm8  ;;  %vm9269_vm8 = vcmp.eq.s32.totalorder %v2699_v18, 1  ;;  %v824_v57 = vadd.s32 112, %v4981_v2  ;;  %v1507_v3 = vperm.slane %v8253_v33, 7  ;;  %v3460_v33 = vsel %vm2469_vm15, 1, %v11991_v52 }
 0x480   :  { %vm9265_vm14 = vmor %vm12732_vm13, %vm3878_vm0  ;;  %vm9284_vm0 = vcmp.eq.s32.totalorder %v3578_v22, 1  ;;  %vm9319_vm13 = vcmp.eq.s32.totalorder %v3625_v39, 1  ;;  %vm12756_vm15 = vnez %v12193_v32  ;;  %v9394_v32 = vpop.permute.xlu1 %1645  ;;  %v2097_v41 = vrot.slane %v6286_v55, 6 }
 0x481   :  { %v12734_v48 = vsel %vm9265_vm14, 4294967295, %v12733_v48  ;;  %vm2947_vm7 = vmand %vm12738_vm11, %vm9192_vm4  ;;  %vm9302_vm4 = vcmp.eq.s32.totalorder %v2746_v24, 1  ;;  %vm2213_vm14 = vcmp.ne.s32.totalorder %v2101_v5, 0  ;;  %v3573_v5 = vperm.slane %v3453_v17, 0  ;;  %1512 = vperm.xlu2 %4737, %v1507_v3  }
 0x482   :  { %12735 = vst [vmem:[#allocation40_spill] sm:$0xff] %v12734_v48  ;;  %vm9298_vm6 = vmor %vm12741_vm1, %vm2947_vm7  ;;  %v9385_v28 = vpop.permute.xlu0 %1337  ;;  %v3581_v48 = vperm.slane %v3460_v33, 0 }
 0x483   :  { %vm12746_vm1 = vmmov %vm12738_vm11  ;;  %vm9337_vm11 = vcmp.eq.s32.totalorder %v2694_v49, 1  ;;  %v9366_v49 = vld [vmem:[#allocation3 + $0x70] sm:$0xff]  ;;  %v3203_v17 = vsel %vm9298_vm6, 1, %v11991_v52  ;;  %vm12761_vm6 = vcmp.eq.f32.partialorder %v9247_v45, %v8550_v13 }
 0x484   :  { %vm3826_vm7 = vmand %vm12746_vm1, %vm9225_vm10  ;;  %vm12750_vm10 = vcmp.eq.f32.partialorder %v9119_v58, %v8550_v13  ;;  %v1626_v18 = vperm.slane %v9366_v49, 0 }
 0x485   :  { %vm3954_vm9 = vmor %vm12749_vm3, %vm3826_vm7  ;;  %vm12753_vm7 = vcmp.gt.f32.partialorder %v9119_v58, %v8550_v13  ;;  %v9419_v60 = vpop.permute.xlu2 %1302 }
 0x486   :  { %v4082_v7 = vsel %vm3954_vm9, %v9035_v1, 0.0  ;;  %vm2955_vm1 = vmand %vm12750_vm10, %vm9269_vm8  ;;  %v2581_v1 = vsel %vm2213_vm14, 1, %v11991_v52  ;;  %vm2025_vm9 = vcmp.lt.s32.totalorder %v824_v57, %v4970_v42  ;;  %vm2281_vm8 = vcmp.le.s32.totalorder %v824_v57, %v4970_v42  ;;  %1631 = vperm.xlu0 %4738, %v1626_v18  }
 0x487   :  { %v4209_v53 = vadd.f32 %v4208_v56, %v4082_v7  ;;  %vm9345_vm3 = vmor %vm12753_vm7, %vm2955_vm1  ;;  %vm1805_vm1 = vcmp.gt.f32.partialorder %v9249_v40, %v8550_v13  ;;  %v9361_v56 = vsel %vm2025_vm9, 1, %v11991_v52  ;;  %v9364_v12 = vsel %vm2281_vm8, 1, %v11991_v52 }
 0x488   :  { %vm3834_vm12 = vmand %vm12750_vm10, %vm9284_vm0  ;;  %v12757_v57 = vsel %vm12756_vm15, %v6570_v35, 0.0  ;;  %v2142_v3 = vrot.slane %v9361_v56, 2  ;;  %v2398_v43 = vrot.slane %v9364_v12, 2  ;;  %v2702_v35 = vperm.slane %v2581_v1, 0 }
 0x489   :  { %v4210_v7 = vadd.f32 %v4209_v53, %v12757_v57  ;;  %vm12758_vm14 = vmmov %vm12753_vm7  ;;  %vm1933_vm9 = vcmp.eq.f32.partialorder %v9249_v40, %v8550_v13  ;;  %v2353_v53 = vrot.slane %v6400_v38, 6  ;;  %v12765_v1 = vsel %vm9065_vm2, %v8891_v51, 0.0 }
 0x48a   :  { %vm9379_vm0 = vmor %vm12758_vm14, %vm3834_vm12  ;;  %vm12762_vm12 = vcmp.gt.f32.partialorder %v9247_v45, %v8550_v13  ;;  %vm2510_vm10 = vcmp.ne.s32.totalorder %v2398_v43, 0  ;;  %v3353_v18 = vadd.s32 %v3349_v11, %v3203_v17  ;;  %v2104_v17 = vrot.slane %v6956_v62, 6 }
 0x48b   :  { %vm3002_vm7 = vmand %vm12761_vm6, %vm9302_vm4  ;;  %v4211_v57 = vadd.f32 %v4210_v7, %v12765_v1  ;;  %vm2254_vm4 = vcmp.ne.s32.totalorder %v2142_v3, 0  ;;  %v3501_v24 = vsel %vm2510_vm10, 1, %v11991_v52  ;;  %v3211_v7 = vsel %vm9345_vm3, 1, %v11991_v52 }
 0x48c   :  { %vm9401_vm8 = vmor %vm12762_vm12, %vm3002_vm7  ;;  %v2622_v38 = vsel %vm2254_vm4, 1, %v11991_v52  ;;  %vm2209_vm7 = vcmp.ne.s32.totalorder %v2097_v41, 0  ;;  %vm12772_vm4 = vcmp.eq.f32.partialorder %v9161_v59, %v8550_v13  ;;  %vm12775_vm10 = vcmp.gt.f32.partialorder %v9161_v59, %v8550_v13 }
 0x48d   :  { %vm12766_vm15 = vmmov %vm12761_vm6  ;;  %vm9414_vm6 = vcmp.eq.s32.totalorder %v3573_v5, 1  ;;  %v2749_v43 = vperm.slane %v2622_v38, 0  ;;  %v2577_v33 = vsel %vm2209_vm7, 1, %v11991_v52  ;;  %v3348_v41 = vadd.s32 %v3353_v18, %v3211_v7 }
 0x48e   :  { %vm3881_vm14 = vmand %vm12766_vm15, %vm9319_vm13  ;;  %vm2465_vm15 = vcmp.ne.s32.totalorder %v2353_v53, 0  ;;  %v3628_v9 = vperm.slane %v3501_v24, 0  ;;  %v2360_v53 = vrot.slane %v6959_v31, 6  ;;  %v3258_v1 = vsel %vm9401_vm8, 1, %v11991_v52 }
 0x48f   :  { %vm12769_vm2 = vmmov %vm12762_vm12  ;;  %vm9477_vm7 = vcmp.eq.s32.totalorder %v2749_v43, 1  ;;  %v2697_v55 = vperm.slane %v2577_v33, 0  ;;  %v2145_v5 = vrot.slane %v9361_v56, 5  ;;  %v2401_v7 = vrot.slane %v9364_v12, 5 }
 0x490   :  { %vm9424_vm12 = vmor %vm12769_vm2, %vm3881_vm14  ;;  %vm9439_vm2 = vcmp.eq.s32.totalorder %v2702_v35, 1  ;;  %v3456_v35 = vsel %vm2465_vm15, 1, %v11991_v52 }
 0x491   :  { %vm2950_vm14 = vmand %vm12772_vm4, %vm9337_vm11  ;;  %vm9455_vm11 = vcmp.eq.s32.totalorder %v3581_v48, 1  ;;  %v4090_v48 = vsel %vm9379_vm0, %v9119_v58, 0.0  ;;  %v3576_v24 = vperm.slane %v3456_v35, 0  ;;  %v9504_v35 = vpop.permute.xlu0 %1358 }
 0x492   :  { %vm9451_vm13 = vmor %vm12775_vm10, %vm2950_vm14  ;;  %vm2216_vm14 = vcmp.ne.s32.totalorder %v2104_v17, 0 }
 0x493   :  { %vm12780_vm3 = vmmov %vm12772_vm4  ;;  %v2584_v17 = vsel %vm2216_vm14, 1, %v11991_v52  ;;  %v3206_v43 = vsel %vm9451_vm13, 1, %v11991_v52  ;;  %vm9553_vm14 = vcmp.eq.s32.totalorder %v3576_v24, 1 }
 0x494   :  { %vm3829_vm4 = vmand %vm12780_vm3, %vm9414_vm6  ;;  %vm9487_vm3 = vcmp.ne.s32.totalorder %v2360_v53, 0  ;;  %v3352_v53 = vadd.s32 %v3348_v41, %v3258_v1 }
 0x495   :  { %vm12781_vm15 = vmmov %vm12775_vm10  ;;  %v3463_v1 = vsel %vm9487_vm3, 1, %v11991_v52  ;;  %vm12797_vm3 = vcmp.gt.f32.partialorder %v9394_v32, %v8550_v13 }
 0x496   :  { %vm3957_vm10 = vmor %vm12781_vm15, %vm3829_vm4  ;;  %vm12790_vm15 = vnez %v12232_v30  ;;  %v9544_v30 = vpop.permute.xlu2 %1323  ;;  %v3584_v24 = vperm.slane %v3463_v1, 0 }
 0x497   :  { %v4085_v38 = vsel %vm3957_vm10, %v9161_v59, 0.0  ;;  %vm2958_vm6 = vmand %vm1933_vm9, %vm9439_vm2  ;;  %vm9511_vm2 = vcmp.eq.s32.totalorder %v3628_v9, 1  ;;  %v12791_v39 = vsel %vm12790_vm15, %v6713_v20, 0.0  ;;  %v2705_v9 = vperm.slane %v2584_v17, 0 }
 0x498   :  { %v4212_v33 = vadd.f32 %v4211_v57, %v4085_v38  ;;  %vm9498_vm8 = vmor %vm1805_vm1, %vm2958_vm6  ;;  %v3356_v38 = vadd.s32 %v3352_v53, %v3206_v43  ;;  %vm9538_vm15 = vcmp.eq.s32.totalorder %v2697_v55, 1  ;;  %v12802_v55 = vsel %vm9214_vm5, %v9005_v61, 0.0 }
 0x499   :  { %vm3837_vm13 = vmand %vm1933_vm9, %vm9455_vm11  ;;  %vm2257_vm9 = vcmp.ne.s32.totalorder %v2145_v5, 0  ;;  %vm12794_vm11 = vcmp.eq.f32.partialorder %v9394_v32, %v8550_v13  ;;  %v1647_v5 = vperm.slane %v9366_v49, 3  ;;  %v3214_v61 = vsel %vm9498_vm8, 1, %v11991_v52 }
 0x49a   :  { %v4213_v41 = vadd.f32 %v4212_v33, %v12791_v39  ;;  %vm9526_vm10 = vmor %vm1805_vm1, %vm3837_vm13  ;;  %vm2513_vm13 = vcmp.ne.s32.totalorder %v2401_v7, 0  ;;  %v2625_v43 = vsel %vm2257_vm9, 1, %v11991_v52  ;;  %v1528_v33 = vperm.slane %v8680_v36, 2  ;;  %v9587_v39 = vpop.permute.xlu1 %1666 }
 0x49b   :  { %vm3005_vm6 = vmand %vm12794_vm11, %vm9477_vm7  ;;  %v12804_v7 = vmov 0  ;;  %v3504_v57 = vsel %vm2513_vm13, 1, %v11991_v52  ;;  %v3351_v1 = vadd.s32 %v3356_v38, %v3214_v61  ;;  %vm12808_vm8 = vcmp.eq.f32.partialorder %v9290_v54, %v8550_v13  ;;  %1652 = vperm.xlu0 %4738, %v1647_v5  }
 0x49c   :  { %vm9549_vm4 = vmor %vm12797_vm3, %vm3005_vm6  ;;  %v4214_v17 = vadd.f32 %v4213_v41, %v12802_v55  ;;  %v2355_v41 = vrot.slane %v6959_v31, 1  ;;  %1533 = vperm.xlu2 %4737, %v1528_v33   ;;  %vm12809_vm13 = vcmp.gt.f32.partialorder %v9290_v54, %v8550_v13  ;;  %v2106_v20 = vrot.slane %v7312_v15, 1 }
 0x49d   :  { %vm3884_vm6 = vmand %vm12794_vm11, %vm9511_vm2  ;;  %vm2211_vm11 = vcmp.ne.s32.totalorder %v2099_v10, 0  ;;  %v2362_v61 = vrot.slane %v7332_v46, 1  ;;  %v3631_v5 = vperm.slane %v3504_v57, 0  ;;  %v3261_v10 = vsel %vm9549_vm4, 1, %v11991_v52 }
 0x49e   :  { %vm12803_vm5 = vmmov %vm12797_vm3  ;;  %vm9582_vm3 = vcmp.eq.s32.totalorder %v2705_v9, 1  ;;  %v2752_v9 = vperm.slane %v2625_v43, 0  ;;  %v2579_v38 = vsel %vm2211_vm11, 1, %v11991_v52  ;;  %v4093_v43 = vsel %vm9526_vm10, %v9249_v40, 0.0 }
 0x49f   :  { %vm9578_vm9 = vmor %vm12803_vm5, %vm3884_vm6  ;;  %vm2467_vm5 = vcmp.ne.s32.totalorder %v2355_v41, 0  ;;  %vm1855_vm11 = vcmp.gt.f32.partialorder %v9587_v39, %v8550_v13  ;;  %vm1983_vm7 = vcmp.eq.f32.partialorder %v9587_v39, %v8550_v13  ;;  %vm12815_vm4 = vcmp.eq.f32.partialorder %v9385_v28, %v8550_v13 }
 0x4a0   :  { %v12805_v7 = vsel %vm9578_vm9, 4294967295, %v12804_v7  ;;  %vm2953_vm2 = vmand %vm12808_vm8, %vm9538_vm15  ;;  %v3458_v18 = vsel %vm2467_vm5, 1, %v11991_v52  ;;  %v2700_v22 = vperm.slane %v2579_v38, 0  ;;  %vm12818_vm5 = vcmp.gt.f32.partialorder %v9385_v28, %v8550_v13  ;;  %v9666_v38 = vpop.permute.xlu2 %1344 }
 0x4a1   :  { %vm9601_vm6 = vmor %vm12809_vm13, %vm2953_vm2  ;;  %vm9616_vm2 = vcmp.eq.s32.totalorder %v3584_v24, 1  ;;  %v9631_v24 = vpop.permute.xlu0 %1379  ;;  %v2102_v55 = vrot.slane %v6956_v62, 4 }
 0x4a2   :  { %vm12812_vm15 = vmmov %vm12808_vm8  ;;  %v3209_v57 = vsel %vm9601_vm6, 1, %v11991_v52 }
 0x4a3   :  { %vm3832_vm8 = vmand %vm12812_vm15, %vm9553_vm14  ;;  %vm2218_vm14 = vcmp.ne.s32.totalorder %v2106_v20, 0  ;;  %v3355_v20 = vadd.s32 %v3351_v1, %v3261_v10  ;;  %v825_v1 = vadd.s32 120, %v4981_v2 }
 0x4a4   :  { %vm3960_vm1 = vmor %vm12809_vm13, %vm3832_vm8  ;;  %vm9642_vm8 = vcmp.ne.s32.totalorder %v2362_v61, 0 }
 0x4a5   :  { %v4088_v41 = vsel %vm3960_vm1, %v9290_v54, 0.0  ;;  %vm2961_vm15 = vmand %vm12815_vm4, %vm9582_vm3  ;;  %vm2880_vm1 = vcmp.eq.s32.totalorder %v2752_v9, 1  ;;  %v2586_v54 = vsel %vm2218_vm14, 1, %v11991_v52  ;;  %v3359_v9 = vadd.s32 %v3355_v20, %v3209_v57  ;;  %v9734_v20 = vpop.permute.xlu1 %1687 }
 0x4a6   :  { %v4215_v11 = vadd.f32 %v4214_v17, %v4088_v41  ;;  %vm9649_vm13 = vmor %vm12818_vm5, %vm2961_vm15  ;;  %v3579_v17 = vperm.slane %v3458_v18, 0  ;;  %vm12824_vm14 = vnez %v12271_v26  ;;  %v3465_v2 = vsel %vm9642_vm8, 1, %v11991_v52 }
 0x4a7   :  { %vm12821_vm3 = vmmov %vm12815_vm4  ;;  %vm9659_vm4 = vcmp.eq.s32.totalorder %v3631_v5, 1  ;;  %v12825_v61 = vsel %vm12824_vm14, %v6867_v0, 0.0  ;;  %vm9687_vm14 = vcmp.eq.s32.totalorder %v2700_v22, 1  ;;  %v2708_v26 = vperm.slane %v2586_v54, 0 }
 0x4a8   :  { %vm3840_vm6 = vmand %vm12821_vm3, %vm9616_vm2  ;;  %v4216_v33 = vadd.f32 %v4215_v11, %v12825_v61  ;;  %vm1931_vm3 = vcmp.eq.f32.partialorder %v9419_v60, %v8550_v13  ;;  %v9691_v11 = vld [vmem:[#allocation11] sm:$0xff]  ;;  %v1549_v57 = vperm.slane %v8680_v36, 5  ;;  %v3217_v41 = vsel %vm9649_vm13, 1, %v11991_v52  ;;  %v9802_v59 = vpop.permute.xlu2 %1365 }
 0x4a9   :  { %vm12826_vm2 = vmmov %vm12818_vm5  ;;  %v3587_v16 = vperm.slane %v3465_v2, 0  ;;  %v3354_v22 = vadd.s32 %v3359_v9, %v3217_v41  ;;  %v12835_v36 = vmov 0  ;;  %v2358_v54 = vrot.slane %v6959_v31, 4 }
 0x4aa   :  { %vm9675_vm5 = vmor %vm12826_vm2, %vm3840_vm6  ;;  %vm2026_vm2 = vcmp.lt.s32.totalorder %v825_v1, %v4970_v42  ;;  %v4217_v10 = vadd.f32 %v4216_v33, %v4090_v48  ;;  %vm9720_vm6 = vcmp.eq.s32.totalorder %v3579_v17, 1  ;;  %v1668_v48 = vperm.slane %v9366_v49, 6  ;;  %1554 = vperm.xlu2 %4737, %v1549_v57  }
 0x4ab   :  { %vm3008_vm15 = vmand %vm1983_vm7, %vm2880_vm1  ;;  %v9708_v18 = vsel %vm2026_vm2, 1, %v11991_v52  ;;  %vm2282_vm1 = vcmp.le.s32.totalorder %v825_v1, %v4970_v42  ;;  %v2109_v2 = vrot.slane %v7312_v15, 4  ;;  %v2365_v0 = vrot.slane %v7332_v46, 4 }
 0x4ac   :  { %vm9699_vm8 = vmor %vm1855_vm11, %vm3008_vm15  ;;  %v9753_v9 = vsel %vm2282_vm1, 1, %v11991_v52  ;;  %v2755_v61 = vperm.slane %v9708_v18, 0  ;;  %1673 = vperm.xlu0 %4738, %v1668_v48   ;;  %v4096_v1 = vsel %vm9675_vm5, %v9385_v28, 0.0  ;;  %v12888_v28 = vmov 0 }
 0x4ad   :  { %vm3887_vm15 = vmand %vm1983_vm7, %vm9659_vm4  ;;  %vm12839_vm4 = vcmp.gt.f32.partialorder %v9419_v60, %v8550_v13  ;;  %v3264_v48 = vsel %vm9699_vm8, 1, %v11991_v52  ;;  %v3634_v58 = vperm.slane %v9753_v9, 0  ;;  %vm1986_vm8 = vcmp.eq.f32.partialorder %v9734_v20, %v9691_v11 }
 0x4ae   :  { %vm9728_vm0 = vmor %vm1855_vm11, %vm3887_vm15  ;;  %vm9746_vm11 = vcmp.eq.s32.totalorder %v2708_v26, 1  ;;  %vm2470_vm15 = vcmp.ne.s32.totalorder %v2358_v54, 0  ;;  %v9765_v26 = vpop.permute.xlu0 %1400 }
 0x4af   :  { %v12836_v36 = vsel %vm9728_vm0, 4294967295, %v12835_v36  ;;  %vm2956_vm7 = vmand %vm1931_vm3, %vm9687_vm14  ;;  %vm2214_vm14 = vcmp.ne.s32.totalorder %v2102_v55, 0  ;;  %v3358_v55 = vadd.s32 %v3354_v22, %v3264_v48  ;;  %v2406_v48 = vrot.slane %v9753_v9, 3 }
 0x4b0   :  { %vm9759_vm2 = vmor %vm12839_vm4, %vm2956_vm7  ;;  %vm9775_vm7 = vcmp.eq.s32.totalorder %v3587_v16, 1  ;;  %v2582_v41 = vsel %vm2214_vm14, 1, %v11991_v52  ;;  %v3461_v16 = vsel %vm2470_vm15, 1, %v11991_v52 }
 0x4b1   :  { %vm3835_vm1 = vmand %vm1931_vm3, %vm9720_vm6  ;;  %vm2221_vm3 = vcmp.ne.s32.totalorder %v2109_v2, 0  ;;  %vm12845_vm6 = vcmp.eq.f32.partialorder %v9504_v35, %v9691_v11  ;;  %v3212_v22 = vsel %vm9759_vm2, 1, %v11991_v52  ;;  %v2703_v2 = vperm.slane %v2582_v41, 0 }
 0x4b2   :  { %vm12844_vm13 = vmmov %vm12839_vm4  ;;  %vm9798_vm4 = vcmp.ne.s32.totalorder %v2365_v0, 0  ;;  %v3582_v0 = vperm.slane %v3461_v16, 0  ;;  %v2589_v33 = vsel %vm2221_vm3, 1, %v11991_v52  ;;  %vm12852_vm2 = vnez %v12303_v29 }
 0x4b3   :  { %vm3963_vm0 = vmor %vm12844_vm13, %vm3835_vm1  ;;  %v3468_v57 = vsel %vm9798_vm4, 1, %v11991_v52  ;;  %v3362_v41 = vadd.s32 %v3358_v55, %v3212_v22  ;;  %vm9850_vm3 = vcmp.eq.s32.totalorder %v2703_v2, 1  ;;  %v2711_v16 = vperm.slane %v2589_v33, 0 }
 0x4b4   :  { %v4091_v54 = vsel %vm3963_vm0, %v9419_v60, 0.0  ;;  %vm2964_vm14 = vmand %vm12845_vm6, %vm9746_vm11  ;;  %vm12848_vm0 = vcmp.gt.f32.partialorder %v9504_v35, %v9691_v11  ;;  %vm2883_vm11 = vcmp.eq.s32.totalorder %v2755_v61, 1  ;;  %v3590_v3 = vperm.slane %v3468_v57, 0 }
 0x4b5   :  { %v4218_v60 = vadd.f32 %v4217_v10, %v4091_v54  ;;  %vm9810_vm13 = vmor %vm12848_vm0, %vm2964_vm14  ;;  %v2150_v10 = vrot.slane %v9708_v18, 3  ;;  %v12853_v54 = vsel %vm12852_vm2, %v7056_v47, 0.0  ;;  %vm2518_vm2 = vcmp.ne.s32.totalorder %v2406_v48, 0 }
 0x4b6   :  { %vm12851_vm15 = vmmov %vm12845_vm6  ;;  %v3220_v55 = vsel %vm9810_vm13, 1, %v11991_v52  ;;  %v1570_v22 = vperm.slane %v9105_v23, 0  ;;  %v2105_v2 = vrot.slane %v6956_v62, 7  ;;  %vm1942_vm13 = vcmp.eq.f32.partialorder %v9631_v24, %v9691_v11 }
 0x4b7   :  { %vm3843_vm1 = vmand %vm12851_vm15, %vm9775_vm7  ;;  %v4219_v53 = vadd.f32 %v4218_v60, %v12853_v54  ;;  %vm3762_vm7 = vcmp.eq.s32.totalorder %v3634_v58, 1  ;;  %vm1934_vm15 = vcmp.eq.f32.partialorder %v9544_v30, %v9691_v11  ;;  %v9880_v60 = vld [vmem:[#allocation3 + $0x78] sm:$0xff]  ;;  %v3357_v33 = vadd.s32 %v3362_v41, %v3220_v55  ;;  %v9908_v41 = vpop.permute.xlu1 %1708 }
 0x4b8   :  { %vm12854_vm6 = vmmov %vm12848_vm0  ;;  %v1689_v17 = vperm.slane %v9880_v60, 1  ;;  %v2361_v48 = vrot.slane %v6959_v31, 7  ;;  %1575 = vperm.xlu2 %4737, %v1570_v22   ;;  %v2112_v29 = vrot.slane %v7312_v15, 7  ;;  %v2368_v55 = vrot.slane %v7332_v46, 7 }
 0x4b9   :  { %vm9829_vm14 = vmor %vm12854_vm6, %vm3843_vm1  ;;  %vm2262_vm1 = vcmp.ne.s32.totalorder %v2150_v10, 0  ;;  %vm12857_vm6 = vcmp.gt.f32.partialorder %v9734_v20, %v9691_v11  ;;  %v4220_v58 = vadd.f32 %v4219_v53, %v4093_v43  ;;  %v3509_v53 = vsel %vm2518_vm2, 1, %v11991_v52 }
 0x4ba   :  { %vm3011_vm0 = vmand %vm1986_vm8, %vm2883_vm11  ;;  %v2630_v40 = vsel %vm2262_vm1, 1, %v11991_v52  ;;  %vm9904_vm2 = vcmp.eq.s32.totalorder %v2711_v16, 1  ;;  %1694 = vperm.xlu0 %4738, %v1689_v17   ;;  %v3637_v31 = vperm.slane %v3509_v53, 0  ;;  %v4099_v22 = vsel %vm9829_vm14, %v9504_v35, 0.0 }
 0x4bb   :  { %vm9846_vm9 = vmor %vm12857_vm6, %vm3011_vm0  ;;  %vm9866_vm0 = vcmp.eq.s32.totalorder %v3582_v0, 1  ;;  %v9884_v0 = vpop.permute.xlu0 %1421  ;;  %v2758_v57 = vperm.slane %v2630_v40, 0  ;;  %v9918_v40 = vpop.permute.xlu2 %1386  ;;  %vm2480_vm4 = vcmp.ne.s32.totalorder %v2368_v55, 0  ;;  %v2153_v55 = vrot.slane %v9708_v18, 6 }
 0x4bc   :  { %vm3890_vm11 = vmand %vm1986_vm8, %vm3762_vm7  ;;  %vm12867_vm7 = vcmp.gt.f32.partialorder %v9544_v30, %v9691_v11  ;;  %v3267_v13 = vsel %vm9846_vm9, 1, %v11991_v52  ;;  %vm1989_vm9 = vcmp.eq.f32.partialorder %v9908_v41, %v9691_v11  ;;  %v2107_v54 = vrot.slane %v7312_v15, 2 }
 0x4bd   :  { %vm12864_vm10 = vmmov %vm12857_vm6  ;;  %v2117_v61 = vrot.slane %v7745_v8, 5 }
 0x4be   :  { %vm9874_vm6 = vmor %vm12864_vm10, %vm3890_vm11  ;;  %vm2473_vm10 = vcmp.ne.s32.totalorder %v2361_v48, 0 }
 0x4bf   :  { %v4146_v10 = vsel %vm9874_vm6, %v9734_v20, 0.0  ;;  %vm2959_vm8 = vmand %vm1934_vm15, %vm9850_vm3  ;;  %vm2217_vm3 = vcmp.ne.s32.totalorder %v2105_v2, 0  ;;  %v3464_v47 = vsel %vm2473_vm10, 1, %v11991_v52  ;;  %vm12877_vm10 = vnez %v12338_v50 }
 0x4c0   :  { %vm9900_vm1 = vmor %vm12867_vm7, %vm2959_vm8  ;;  %v2585_v16 = vsel %vm2217_vm3, 1, %v11991_v52  ;;  %v3585_v62 = vperm.slane %v3464_v47, 0  ;;  %v2114_v47 = vrot.slane %v7745_v8, 2 }
 0x4c1   :  { %vm3838_vm11 = vmand %vm1934_vm15, %vm9866_vm0  ;;  %vm9929_vm0 = vcmp.eq.s32.totalorder %v3590_v3, 1  ;;  %v2706_v3 = vperm.slane %v2585_v16, 0 }
 0x4c2   :  { %vm12872_vm8 = vmmov %vm12867_vm7  ;;  %vm2224_vm7 = vcmp.ne.s32.totalorder %v2112_v29, 0  ;;  %v3361_v29 = vadd.s32 %v3357_v33, %v3267_v13  ;;  %v2409_v13 = vrot.slane %v9753_v9, 6  ;;  %vm2226_vm6 = vcmp.ne.s32.totalorder %v2114_v47, 0 }
 0x4c3   :  { %vm3966_vm15 = vmor %vm12872_vm8, %vm3838_vm11  ;;  %vm2886_vm11 = vcmp.eq.s32.totalorder %v2758_v57, 1  ;;  %v2592_v48 = vsel %vm2224_vm7, 1, %v11991_v52  ;;  %vm9946_vm8 = vcmp.eq.s32.totalorder %v3637_v31, 1  ;;  %v3471_v31 = vsel %vm2480_vm4, 1, %v11991_v52  ;;  %v9966_v16 = vpop.permute.xlu0 %1442 }
 0x4c4   :  { %v4094_v17 = vsel %vm3966_vm15, %v9544_v30, 0.0  ;;  %vm2967_vm3 = vmand %vm1942_vm13, %vm9904_vm2  ;;  %v3215_v30 = vsel %vm9900_vm1, 1, %v11991_v52  ;;  %vm1861_vm2 = vcmp.gt.f32.partialorder %v9908_v41, %v9691_v11  ;;  %vm12879_vm15 = vcmp.gt.f32.partialorder %v9631_v24, %v9691_v11 }
 0x4c5   :  { %v4221_v2 = vadd.f32 %v4220_v58, %v4094_v17  ;;  %v12878_v58 = vsel %vm12877_vm10, %v7206_v6, 0.0  ;;  %vm9959_vm7 = vmor %vm12879_vm15, %vm2967_vm3  ;;  %vm1937_vm15 = vcmp.eq.f32.partialorder %v9666_v38, %v9691_v11  ;;  %v2714_v50 = vperm.slane %v2592_v48, 0 }
 0x4c6   :  { %vm9973_vm10 = vmand %vm1942_vm13, %vm9929_vm0  ;;  %v3365_v53 = vadd.s32 %v3361_v29, %v3215_v30  ;;  %vm9991_vm13 = vcmp.eq.s32.totalorder %v2706_v3, 1  ;;  %v1591_v48 = vperm.slane %v9105_v23, 3  ;;  %v3593_v29 = vperm.slane %v3471_v31, 0  ;;  %v10036_v31 = vpop.permute.xlu2 %1407 }
 0x4c7   :  { %v4222_v57 = vadd.f32 %v4221_v2, %v12878_v58  ;;  %vm3014_vm3 = vmand %vm1989_vm9, %vm2886_vm11  ;;  %vm2265_vm11 = vcmp.ne.s32.totalorder %v2153_v55, 0  ;;  %v1710_v3 = vperm.slane %v9880_v60, 4  ;;  %v3223_v5 = vsel %vm9959_vm7, 1, %v11991_v52 }
 0x4c8   :  { %vm9987_vm4 = vmor %vm1861_vm2, %vm3014_vm3  ;;  %vm2521_vm3 = vcmp.ne.s32.totalorder %v2409_v13, 0  ;;  %vm10016_vm1 = vcmp.eq.s32.totalorder %v3585_v62, 1  ;;  %v2633_v30 = vsel %vm2265_vm11, 1, %v11991_v52  ;;  %1596 = vperm.xlu2 %4737, %v1591_v48   ;;  %v2363_v62 = vrot.slane %v7332_v46, 2  ;;  %v10047_v13 = vpop.permute.xlu1 %1729 }
 0x4c9   :  { %v4223_v2 = vadd.f32 %v4222_v57, %v4096_v1  ;;  %vm3893_vm0 = vmand %vm1989_vm9, %vm9946_vm8  ;;  %vm10030_vm8 = vcmp.eq.s32.totalorder %v2714_v50, 1  ;;  %v3512_v33 = vsel %vm2521_vm3, 1, %v11991_v52  ;;  %1715 = vperm.xlu0 %4738, %v1710_v3   ;;  %v2761_v50 = vperm.slane %v2633_v30, 0 }
 0x4ca   :  { %vm10012_vm5 = vmor %vm1861_vm2, %vm3893_vm0  ;;  %vm12894_vm2 = vcmp.gt.f32.partialorder %v9666_v38, %v9691_v11  ;;  %vm2219_vm0 = vcmp.ne.s32.totalorder %v2107_v54, 0  ;;  %v3360_v48 = vadd.s32 %v3365_v53, %v3223_v5  ;;  %vm10055_vm3 = vcmp.eq.s32.totalorder %v3593_v29, 1 }
 0x4cb   :  { %v12889_v28 = vsel %vm10012_vm5, 4294967295, %v12888_v28  ;;  %vm2962_vm9 = vmand %vm1937_vm15, %vm9991_vm13  ;;  %vm12899_vm13 = vcmp.gt.f32.partialorder %v9666_v38, %v9691_v11  ;;  %v3640_v30 = vperm.slane %v3512_v33, 0  ;;  %v2587_v53 = vsel %vm2219_vm0, 1, %v11991_v52  ;;  %v10066_v1 = vpop.permute.xlu0 %1463 }
 0x4cc   :  { %vm10041_vm7 = vmor %vm12894_vm2, %vm2962_vm9  ;;  %vm1817_vm9 = vcmp.gt.f32.partialorder %v9765_v26, %v9691_v11  ;;  %vm2475_vm2 = vcmp.ne.s32.totalorder %v2363_v62, 0  ;;  %v2709_v33 = vperm.slane %v2587_v53, 0  ;;  %v2370_v62 = vrot.slane %v7763_v37, 2 }
 0x4cd   :  { %vm3841_vm11 = vmand %vm1937_vm15, %vm10016_vm1  ;;  %v3466_v5 = vsel %vm2475_vm2, 1, %v11991_v52  ;;  %vm12900_vm1 = vcmp.eq.f32.partialorder %v9765_v26, %v9691_v11  ;;  %v3270_v47 = vsel %vm9987_vm4, 1, %v11991_v52  ;;  %vm1992_vm0 = vcmp.eq.f32.partialorder %v10047_v13, %v9691_v11 }
 0x4ce   :  { %vm3969_vm5 = vmor %vm12899_vm13, %vm3841_vm11  ;;  %v3364_v57 = vadd.s32 %v3360_v48, %v3270_v47  ;;  %v3588_v58 = vperm.slane %v3466_v5, 0  ;;  %vm2482_vm2 = vcmp.ne.s32.totalorder %v2370_v62, 0  ;;  %v2594_v53 = vsel %vm2226_vm6, 1, %v11991_v52  ;;  %v12909_v48 = vld [vmem:[#allocation18_spill] sm:$0xff]  ;;  %v10158_v35 = vpop.permute.xlu2 %1428 }
 0x4cf   :  { %v4097_v29 = vsel %vm3969_vm5, %v9666_v38, 0.0  ;;  %vm10074_vm15 = vmand %vm12900_vm1, %vm10030_vm8  ;;  %vm2889_vm5 = vcmp.eq.s32.totalorder %v2761_v50, 1  ;;  %vm12904_vm4 = vcmp.gt.f32.partialorder %v9631_v24, %v9691_v11  ;;  %v12907_v50 = vld [vmem:[#allocation20_spill] sm:$0xff]  ;;  %v1612_v54 = vperm.slane %v9105_v23, 6 }
 0x4d0   :  { %v4224_v38 = vadd.f32 %v4223_v2, %v4097_v29  ;;  %vm12903_vm8 = vmmov %vm12900_vm1  ;;  %v3218_v2 = vsel %vm10041_vm7, 1, %v11991_v52  ;;  %vm12908_vm13 = vnez %v12907_v50  ;;  %v1731_v62 = vperm.slane %v9880_v60, 7 }
 0x4d1   :  { %vm3849_vm11 = vmand %vm12903_vm8, %vm10055_vm3  ;;  %v12910_v3 = vsel %vm12908_vm13, %v12909_v48, 0.0  ;;  %vm1940_vm3 = vcmp.eq.f32.partialorder %v9802_v59, %v9691_v11  ;;  %vm10129_vm8 = vcmp.eq.s32.totalorder %v2709_v33, 1  ;;  %v2110_v50 = vrot.slane %v7312_v15, 5  ;;  %1617 = vperm.xlu2 %4737, %v1612_v54  }
 0x4d2   :  { %vm10097_vm1 = vmor %vm12904_vm4, %vm9973_vm10  ;;  %v4225_v5 = vadd.f32 %v4224_v38, %v12910_v3  ;;  %vm3768_vm10 = vcmp.eq.s32.totalorder %v3640_v30, 1  ;;  %v3473_v30 = vsel %vm2482_vm2, 1, %v11991_v52  ;;  %v2717_v38 = vperm.slane %v2594_v53, 0  ;;  %1736 = vperm.xlu0 %4738, %v1731_v62  }
 0x4d3   :  { %vm10113_vm6 = vmor %vm1817_vm9, %vm10074_vm15  ;;  %v2366_v48 = vrot.slane %v7332_v46, 5  ;;  %v3368_v23 = vadd.s32 %v3364_v57, %v3218_v2  ;;  %vm1812_vm2 = vcmp.gt.f32.partialorder %v9802_v59, %v9691_v11  ;;  %v3596_v46 = vperm.slane %v3473_v30, 0 }
 0x4d4   :  { %vm10122_vm7 = vmor %vm1817_vm9, %vm3849_vm11  ;;  %vm12917_vm9 = vcmp.gt.f32.partialorder %v10047_v13, %v9691_v11  ;;  %v4226_v33 = vadd.f32 %v4225_v5, %v4099_v22  ;;  %vm10152_vm11 = vcmp.eq.s32.totalorder %v3588_v58, 1  ;;  %v10168_v22 = vpop.permute.xlu0 %1484  ;;  %v2373_v53 = vrot.slane %v7763_v37, 5  ;;  %v12954_v5 = vld [vmem:[#allocation21_spill] sm:$0xff] }
 0x4d5   :  { %vm3017_vm13 = vmand %vm1992_vm0, %vm2889_vm5  ;;  %v3226_v2 = vsel %vm10113_vm6, 1, %v11991_v52  ;;  %vm1820_vm6 = vcmp.gt.f32.partialorder %v9884_v0, %v9691_v11 }
 0x4d6   :  { %vm10139_vm15 = vmor %vm12917_vm9, %vm3017_vm13  ;;  %v3363_v30 = vadd.s32 %v3368_v23, %v3226_v2  ;;  %v1633_v23 = vperm.slane %v9366_v49, 1  ;;  %v12935_v2 = vld [vmem:[#allocation19_spill] sm:$0xff]  ;;  %v10264_v55 = vpop.permute.xlu2 %1449 }
 0x4d7   :  { %vm3896_vm5 = vmand %vm1992_vm0, %vm3768_vm10  ;;  %vm2222_vm0 = vcmp.ne.s32.totalorder %v2110_v50, 0  ;;  %vm2478_vm10 = vcmp.ne.s32.totalorder %v2366_v48, 0  ;;  %v3273_v54 = vsel %vm10139_vm15, 1, %v11991_v52 }
 0x4d8   :  { %vm12922_vm14 = vmmov %vm12917_vm9  ;;  %v2590_v58 = vsel %vm2222_vm0, 1, %v11991_v52  ;;  %v3469_v57 = vsel %vm2478_vm10, 1, %v11991_v52  ;;  %vm2485_vm10 = vcmp.ne.s32.totalorder %v2373_v53, 0  ;;  %vm3724_vm9 = vcmp.eq.s32.totalorder %v3596_v46, 1  ;;  %v12933_v53 = vld [vmem:[#allocation22_spill] sm:$0xff] }
 0x4d9   :  { %vm10163_vm4 = vmor %vm12922_vm14, %vm3896_vm5  ;;  %v2712_v29 = vperm.slane %v2590_v58, 0  ;;  %vm2229_vm14 = vcmp.ne.s32.totalorder %v2117_v61, 0  ;;  %v3591_v62 = vperm.slane %v3469_v57, 0  ;;  %v3476_v48 = vsel %vm2485_vm10, 1, %v11991_v52  ;;  %1638 = vperm.xlu2 %4737, %v1633_v23  }
 0x4da   :  { %vm2965_vm13 = vmand %vm1940_vm3, %vm10129_vm8  ;;  %vm2845_vm8 = vcmp.eq.s32.totalorder %v2717_v38, 1  ;;  %v2597_v6 = vsel %vm2229_vm14, 1, %v11991_v52  ;;  %v4102_v61 = vsel %vm10097_vm1, %v9631_v24, 0.0  ;;  %v3367_v58 = vadd.s32 %v3363_v30, %v3273_v54 }
 0x4db   :  { %vm10186_vm5 = vmor %vm1812_vm2, %vm2965_vm13  ;;  %v2720_v50 = vperm.slane %v2597_v6, 0  ;;  %v4105_v57 = vsel %vm10122_vm7, %v9765_v26, 0.0  ;;  %vm12934_vm10 = vnez %v12933_v53  ;;  %v2723_v46 = vperm.slane %v8226_v44, 0 }
 0x4dc   :  { %vm3844_vm0 = vmand %vm1940_vm3, %vm10152_vm11  ;;  %vm12927_vm3 = vcmp.eq.f32.partialorder %v9884_v0, %v9691_v11  ;;  %v3221_v47 = vsel %vm10186_vm5, 1, %v11991_v52  ;;  %v12936_v17 = vsel %vm12934_vm10, %v12935_v2, 0.0  ;;  %v10249_v30 = vpop.permute.xlu0 %1505  ;;  %v2122_v53 = vrot.slane %v8226_v44, 3 }
 0x4dd   :  { %vm3972_vm13 = vmor %vm1812_vm2, %vm3844_vm0  ;;  %vm10220_vm2 = vcmp.eq.s32.totalorder %v2712_v29, 1  ;;  %vm1815_vm0 = vcmp.gt.f32.partialorder %v9918_v40, %v9691_v11  ;;  %v3599_v29 = vperm.slane %v3476_v48, 0  ;;  %v3371_v6 = vadd.s32 %v3367_v58, %v3221_v47 }
 0x4de   :  { %v4100_v38 = vsel %vm3972_vm13, %v9802_v59, 0.0  ;;  %vm2973_vm11 = vmand %vm12927_vm3, %vm2845_vm8  ;;  %vm1943_vm8 = vcmp.eq.f32.partialorder %v9918_v40, %v9691_v11  ;;  %vm10256_vm13 = vcmp.eq.s32.totalorder %v2720_v50, 1  ;;  %v3594_v50 = vperm.slane %v7763_v37, 0 }
 0x4df   :  { %v4227_v3 = vadd.f32 %v4226_v33, %v4100_v38  ;;  %vm10216_vm15 = vmor %vm1820_vm6, %vm2973_vm11  ;;  %v2715_v33 = vperm.slane %v7745_v8, 0  ;;  %v2115_v48 = vrot.slane %v7745_v8, 3  ;;  %v2371_v47 = vrot.slane %v7763_v37, 3 }
 0x4e0   :  { %vm12932_vm5 = vmmov %vm12927_vm3  ;;  %vm1951_vm3 = vcmp.eq.f32.partialorder %v9966_v16, %v9691_v11  ;;  %v3229_v54 = vsel %vm10216_vm15, 1, %v11991_v52  ;;  %v1654_v59 = vperm.slane %v9366_v49, 4 }
 0x4e1   :  { %vm3852_vm14 = vmand %vm12932_vm5, %vm3724_vm9  ;;  %v4228_v24 = vadd.f32 %v4227_v3, %v12936_v17  ;;  %vm3719_vm9 = vcmp.eq.s32.totalorder %v3591_v62, 1  ;;  %vm10281_vm5 = vcmp.eq.s32.totalorder %v2715_v33, 1  ;;  %vm10305_vm15 = vcmp.ne.s32.totalorder %v2371_v47, 0  ;;  %v12976_v47 = vld [vmem:[#allocation23_spill] sm:$0xff]  ;;  %v13002_v62 = vld [vmem:[#allocation24_spill] sm:$0xff] }
 0x4e2   :  { %vm10245_vm1 = vmor %vm1820_vm6, %vm3852_vm14  ;;  %vm1823_vm6 = vcmp.gt.f32.partialorder %v9966_v16, %v9691_v11  ;;  %vm1946_vm14 = vcmp.eq.f32.partialorder %v10036_v31, %v9691_v11  ;;  %v3366_v2 = vadd.s32 %v3371_v6, %v3229_v54  ;;  %1659 = vperm.xlu2 %4737, %v1654_v59  }
 0x4e3   :  { %vm2968_vm7 = vmand %vm1943_vm8, %vm10220_vm2  ;;  %v4229_v38 = vadd.f32 %v4228_v24, %v4102_v61  ;;  %v3602_v24 = vperm.slane %v8229_v14, 0  ;;  %v4108_v26 = vsel %vm10245_vm1, %v9884_v0, 0.0 }
 0x4e4   :  { %vm10272_vm11 = vmor %vm1815_vm0, %vm2968_vm7  ;;  %vm10293_vm7 = vcmp.eq.s32.totalorder %v3599_v29, 1  ;;  %v2378_v29 = vrot.slane %v8229_v14, 3  ;;  %v10380_v58 = vpop.permute.xlu0 %1526 }
 0x4e5   :  { %vm3847_vm2 = vmand %vm1943_vm8, %vm3719_vm9  ;;  %vm2227_vm8 = vcmp.ne.s32.totalorder %v2115_v48, 0  ;;  %v3224_v6 = vsel %vm10272_vm11, 1, %v11991_v52  ;;  %v3474_v48 = vsel %vm10305_vm15, 1, %v11991_v52  ;;  %vm12962_vm15 = vcmp.gt.f32.partialorder %v10036_v31, %v9691_v11 }
 0x4e6   :  { %vm3975_vm10 = vmor %vm1815_vm0, %vm3847_vm2  ;;  %v2595_v33 = vsel %vm2227_vm8, 1, %v11991_v52  ;;  %vm10331_vm2 = vcmp.eq.s32.totalorder %v3594_v50, 1  ;;  %vm12953_vm8 = vnez %v12444_v19  ;;  %v3370_v59 = vadd.s32 %v3366_v2, %v3224_v6  ;;  %v10391_v2 = vpop.permute.xlu2 %1470  ;;  %v12974_v19 = vld [vmem:[#allocation25_spill] sm:$0xff] }
 0x4e7   :  { %v4103_v61 = vsel %vm3975_vm10, %v9918_v40, 0.0  ;;  %vm2976_vm9 = vmand %vm1951_vm3, %vm10256_vm13  ;;  %vm2234_vm10 = vcmp.ne.s32.totalorder %v2122_v53, 0  ;;  %v12955_v0 = vsel %vm12953_vm8, %v12954_v5, 0.0  ;;  %v2718_v50 = vperm.slane %v2595_v33, 0 }
 0x4e8   :  { %v4230_v17 = vadd.f32 %v4229_v38, %v4103_v61  ;;  %vm10314_vm0 = vmor %vm1823_vm6, %vm2976_vm9  ;;  %vm10362_vm9 = vcmp.ne.s32.totalorder %v2378_v29, 0  ;;  %v2602_v3 = vsel %vm2234_vm10, 1, %v11991_v52  ;;  %v3597_v33 = vperm.slane %v3474_v48, 0 }
 0x4e9   :  { %vm3855_vm13 = vmand %vm1951_vm3, %vm10293_vm7  ;;  %vm10356_vm7 = vcmp.eq.s32.totalorder %v2723_v46, 1  ;;  %v2374_v53 = vrot.slane %v7763_v37, 6  ;;  %vm10399_vm3 = vcmp.eq.s32.totalorder %v2718_v50, 1  ;;  %v2726_v29 = vperm.slane %v2602_v3, 0 }
 0x4ea   :  { %v4231_v38 = vadd.f32 %v4230_v17, %v12955_v0  ;;  %vm10342_vm1 = vmor %vm1823_vm6, %vm3855_vm13  ;;  %vm1954_vm6 = vcmp.eq.f32.partialorder %v10066_v1, %v9691_v11  ;;  %v3232_v17 = vsel %vm10314_vm0, 1, %v11991_v52  ;;  %v1675_v40 = vperm.slane %v9366_v49, 7 }
 0x4eb   :  { %vm2971_vm11 = vmand %vm1946_vm14, %vm10281_vm5  ;;  %vm10374_vm5 = vcmp.eq.s32.totalorder %v3602_v24, 1  ;;  %v2125_v0 = vrot.slane %v8226_v44, 6  ;;  %v2381_v48 = vrot.slane %v8229_v14, 6 }
 0x4ec   :  { %vm10370_vm13 = vmor %vm12962_vm15, %vm2971_vm11  ;;  %v4232_v46 = vadd.f32 %v4231_v38, %v4105_v57  ;;  %vm1949_vm11 = vcmp.eq.f32.partialorder %v10158_v35, %v9691_v11  ;;  %v2118_v57 = vrot.slane %v7745_v8, 6  ;;  %v3481_v8 = vsel %vm10362_vm9, 1, %v11991_v52  ;;  %1680 = vperm.xlu2 %4737, %v1675_v40  }
 0x4ed   :  { %vm3850_vm10 = vmand %vm1946_vm14, %vm10331_vm2  ;;  %vm2486_vm2 = vcmp.ne.s32.totalorder %v2374_v53, 0  ;;  %v3227_v6 = vsel %vm10370_vm13, 1, %v11991_v52  ;;  %vm12969_vm9 = vcmp.gt.f32.partialorder %v10066_v1, %v9691_v11  ;;  %v3374_v38 = vadd.s32 %v3370_v59, %v3232_v17 }
 0x4ee   :  { %vm3978_vm8 = vmor %vm12962_vm15, %vm3850_vm10  ;;  %vm2230_vm0 = vcmp.ne.s32.totalorder %v2118_v57, 0  ;;  %vm10430_vm13 = vcmp.eq.s32.totalorder %v3597_v33, 1  ;;  %v3605_v50 = vperm.slane %v3481_v8, 0  ;;  %v3477_v61 = vsel %vm2486_vm2, 1, %v11991_v52  ;;  %v10512_v49 = vpop.permute.xlu2 %1491 }
 0x4ef   :  { %v4106_v37 = vsel %vm3978_vm8, %v10036_v31, 0.0  ;;  %vm2979_vm14 = vmand %vm1954_vm6, %vm10356_vm7  ;;  %v2598_v5 = vsel %vm2230_vm0, 1, %v11991_v52  ;;  %vm12975_vm8 = vnez %v12974_v19  ;;  %v4111_v33 = vsel %vm10342_vm1, %v9966_v16, 0.0 }
 0x4f0   :  { %v4233_v54 = vadd.f32 %v4232_v46, %v4106_v37  ;;  %vm10419_vm10 = vmor %vm12969_vm9, %vm2979_vm14  ;;  %v12977_v3 = vsel %vm12975_vm8, %v12976_v47, 0.0  ;;  %v2721_v46 = vperm.slane %v2598_v5, 0  ;;  %v3369_v57 = vadd.s32 %v3374_v38, %v3227_v6 }
 0x4f1   :  { %vm3858_vm7 = vmand %vm1954_vm6, %vm10374_vm5  ;;  %vm2237_vm6 = vcmp.ne.s32.totalorder %v2125_v0, 0  ;;  %vm12981_vm2 = vcmp.gt.f32.partialorder %v10158_v35, %v9691_v11  ;;  %vm10466_vm1 = vcmp.eq.s32.totalorder %v2726_v29, 1  ;;  %vm10470_vm8 = vcmp.ne.s32.totalorder %v2381_v48, 0  ;;  %v12996_v48 = vld [vmem:[#allocation32_spill] sm:$0xff] }
 0x4f2   :  { %v4234_v23 = vadd.f32 %v4233_v54, %v12977_v3  ;;  %vm12978_vm15 = vmmov %vm12969_vm9  ;;  %vm1957_vm9 = vcmp.eq.f32.partialorder %v10168_v22, %v9691_v11  ;;  %v2605_v24 = vsel %vm2237_vm6, 1, %v11991_v52  ;;  %v3235_v29 = vsel %vm10419_vm10, 1, %v11991_v52  ;;  %v10500_v54 = vpop.permute.xlu0 %1547 }
 0x4f3   :  { %vm10442_vm14 = vmor %vm12978_vm15, %vm3858_vm7  ;;  %vm10480_vm15 = vcmp.eq.s32.totalorder %v3605_v50, 1  ;;  %vm12990_vm6 = vcmp.gt.f32.partialorder %v10158_v35, %v9691_v11  ;;  %v2120_v40 = vrot.slane %v8226_v44, 1  ;;  %v2376_v6 = vrot.slane %v8229_v14, 1 }
 0x4f4   :  { %vm2974_vm5 = vmand %vm1949_vm11, %vm10399_vm3  ;;  %v4235_v16 = vadd.f32 %v4234_v23, %v4108_v26  ;;  %v3600_v26 = vperm.slane %v3477_v61, 0  ;;  %v2729_v31 = vperm.slane %v2605_v24, 0  ;;  %v3484_v0 = vsel %vm10470_vm8, 1, %v11991_v52 }
 0x4f5   :  { %vm10462_vm7 = vmor %vm12981_vm2, %vm2974_vm5  ;;  %vm1824_vm5 = vcmp.gt.f32.partialorder %v10264_v55, %v9691_v11  ;;  %vm1952_vm2 = vcmp.eq.f32.partialorder %v10264_v55, %v9691_v11  ;;  %v1696_v38 = vperm.slane %v9880_v60, 2  ;;  %v2127_v19 = vrot.slane %v12996_v48, 1 }
 0x4f6   :  { %vm3853_vm3 = vmand %vm1949_vm11, %vm10430_vm13  ;;  %vm10494_vm11 = vcmp.eq.s32.totalorder %v2721_v46, 1  ;;  %vm12993_vm13 = vcmp.gt.f32.partialorder %v10168_v22, %v9691_v11  ;;  %v3373_v47 = vadd.s32 %v3369_v57, %v3235_v29  ;;  %vm10527_vm8 = vcmp.eq.s32.totalorder %v3600_v26, 1  ;;  %v12999_v46 = vld [vmem:[#allocation33_spill] sm:$0xff]  ;;  %v13000_v57 = vld [vmem:[#allocation27_spill] sm:$0xff] }
 0x4f7   :  { %vm3981_vm0 = vmor %vm12990_vm6, %vm3853_vm3  ;;  %vm2232_vm3 = vcmp.ne.s32.totalorder %v2120_v40, 0  ;;  %vm2488_vm6 = vcmp.ne.s32.totalorder %v2376_v6, 0  ;;  %1701 = vperm.xlu2 %4737, %v1696_v38   ;;  %v2383_v61 = vrot.slane %v12999_v46, 1  ;;  %v3608_v26 = vperm.slane %v3484_v0, 0 }
 0x4f8   :  { %v4109_v5 = vsel %vm3981_vm0, %v10158_v35, 0.0  ;;  %vm2982_vm10 = vmand %vm1957_vm9, %vm10466_vm1  ;;  %v2600_v23 = vsel %vm2232_vm3, 1, %v11991_v52  ;;  %v3479_v29 = vsel %vm2488_vm6, 1, %v11991_v52  ;;  %v4114_v53 = vsel %vm10442_vm14, %v10066_v1, 0.0 }
 0x4f9   :  { %v4236_v50 = vadd.f32 %v4235_v16, %v4109_v5  ;;  %vm10517_vm0 = vmor %vm12993_vm13, %vm2982_vm10  ;;  %v3230_v16 = vsel %vm10462_vm7, 1, %v11991_v52  ;;  %vm13001_vm10 = vnez %v13000_v57  ;;  %vm1960_vm3 = vcmp.eq.f32.partialorder %v10249_v30, %v9691_v11 }
 0x4fa   :  { %vm3861_vm1 = vmand %vm1957_vm9, %vm10480_vm15  ;;  %v13003_v17 = vsel %vm13001_vm10, %v13002_v62, 0.0  ;;  %vm2857_vm14 = vcmp.eq.s32.totalorder %v2729_v31, 1  ;;  %v2724_v59 = vperm.slane %v2600_v23, 0  ;;  %vm2495_vm10 = vcmp.ne.s32.totalorder %v2383_v61, 0  ;;  %v10606_v61 = vpop.permute.xlu0 %1568  ;;  %v10618_v62 = vpop.permute.xlu2 %1512 }
 0x4fb   :  { %v4237_v24 = vadd.f32 %v4236_v50, %v13003_v17  ;;  %vm13004_vm9 = vmmov %vm12993_vm13  ;;  %v3377_v37 = vadd.s32 %v3373_v47, %v3230_v16  ;;  %v3603_v6 = vperm.slane %v3479_v29, 0  ;;  %vm10581_vm13 = vcmp.eq.s32.totalorder %v3608_v26, 1  ;;  %v13020_v26 = vld [vmem:[#allocation26_spill] sm:$0xff] }
 0x4fc   :  { %vm10543_vm15 = vmor %vm13004_vm9, %vm3861_vm1  ;;  %vm2239_vm1 = vcmp.ne.s32.totalorder %v2127_v19, 0  ;;  %vm1827_vm9 = vcmp.gt.f32.partialorder %v10391_v2, %v9691_v11  ;;  %v2123_v0 = vrot.slane %v8226_v44, 4  ;;  %v3486_v50 = vsel %vm2495_vm10, 1, %v11991_v52 }
 0x4fd   :  { %vm2977_vm7 = vmand %vm1952_vm2, %vm10494_vm11  ;;  %v4238_v1 = vadd.f32 %v4237_v24, %v4111_v33  ;;  %v2607_v5 = vsel %vm2239_vm1, 1, %v11991_v52  ;;  %v3238_v33 = vsel %vm10517_vm0, 1, %v11991_v52  ;;  %v1717_v35 = vperm.slane %v9880_v60, 5  ;;  %v13018_v24 = vld [vmem:[#allocation28_spill] sm:$0xff] }
 0x4fe   :  { %vm10563_vm6 = vmor %vm1824_vm5, %vm2977_vm7  ;;  %v2379_v19 = vrot.slane %v8229_v14, 4  ;;  %vm10602_vm1 = vcmp.eq.s32.totalorder %v2724_v59, 1  ;;  %v2732_v23 = vperm.slane %v2607_v5, 0  ;;  %v3372_v16 = vadd.s32 %v3377_v37, %v3238_v33 }
 0x4ff   :  { %vm3856_vm11 = vmand %vm1952_vm2, %vm10527_vm8  ;;  %vm1955_vm2 = vcmp.eq.f32.partialorder %v10391_v2, %v9691_v11  ;;  %1722 = vperm.xlu2 %4737, %v1717_v35   ;;  %v2130_v57 = vrot.slane %v12996_v48, 4  ;;  %v3233_v17 = vsel %vm10563_vm6, 1, %v11991_v52  ;;  %v3611_v37 = vperm.slane %v3486_v50, 0 }
 0x500   :  { %vm3984_vm7 = vmor %vm1824_vm5, %vm3856_vm11  ;;  %vm13011_vm5 = vcmp.gt.f32.partialorder %v10249_v30, %v9691_v11  ;;  %vm10613_vm11 = vcmp.eq.s32.totalorder %v3603_v6, 1  ;;  %v4117_v40 = vsel %vm10543_vm15, %v10168_v22, 0.0  ;;  %v2386_v33 = vrot.slane %v12999_v46, 4 }
 0x501   :  { %v4112_v38 = vsel %vm3984_vm7, %v10264_v55, 0.0  ;;  %vm2985_vm8 = vmand %vm1960_vm3, %vm2857_vm14  ;;  %vm2235_vm14 = vcmp.ne.s32.totalorder %v2123_v0, 0  ;;  %vm2491_vm7 = vcmp.ne.s32.totalorder %v2379_v19, 0  ;;  %vm10652_vm15 = vcmp.eq.s32.totalorder %v2732_v23, 1 }
 0x502   :  { %v4239_v47 = vadd.f32 %v4238_v1, %v4112_v38  ;;  %vm10598_vm0 = vmor %vm13011_vm5, %vm2985_vm8  ;;  %vm13019_vm8 = vnez %v13018_v24  ;;  %v2603_v6 = vsel %vm2235_vm14, 1, %v11991_v52  ;;  %v3482_v5 = vsel %vm2491_vm7, 1, %v11991_v52  ;;  %v13033_v24 = vld [vmem:[#allocation30_spill] sm:$0xff] }
 0x503   :  { %vm3864_vm10 = vmand %vm1960_vm3, %vm10581_vm13  ;;  %v13021_v29 = vsel %vm13019_vm8, %v13020_v26, 0.0  ;;  %vm1963_vm14 = vcmp.eq.f32.partialorder %v10380_v58, %v9691_v11  ;;  %v3376_v0 = vadd.s32 %v3372_v16, %v3233_v17  ;;  %v2727_v38 = vperm.slane %v2603_v6, 0  ;;  %v13035_v26 = vld [vmem:[#allocation29_spill] sm:$0xff] }
 0x504   :  { %v4240_v1 = vadd.f32 %v4239_v47, %v13021_v29  ;;  %vm13022_vm13 = vmmov %vm13011_vm5  ;;  %vm2242_vm5 = vcmp.ne.s32.totalorder %v2130_v57, 0  ;;  %vm2498_vm8 = vcmp.ne.s32.totalorder %v2386_v33, 0  ;;  %v3606_v50 = vperm.slane %v3482_v5, 0 }
 0x505   :  { %vm10630_vm3 = vmor %vm13022_vm13, %vm3864_vm10  ;;  %v2126_v35 = vrot.slane %v8226_v44, 7  ;;  %v3241_v19 = vsel %vm10598_vm0, 1, %v11991_v52  ;;  %v2382_v44 = vrot.slane %v8229_v14, 7  ;;  %v3489_v3 = vsel %vm2498_vm8, 1, %v11991_v52 }
 0x506   :  { %vm2980_vm6 = vmand %vm1955_vm2, %vm10602_vm1  ;;  %v4241_v8 = vadd.f32 %v4240_v1, %v4114_v53  ;;  %v2610_v53 = vsel %vm2242_vm5, 1, %v11991_v52  ;;  %vm1830_vm1 = vcmp.gt.f32.partialorder %v10512_v49, %v9691_v11  ;;  %vm10692_vm5 = vcmp.eq.s32.totalorder %v2727_v38, 1 }
 0x507   :  { %vm10648_vm10 = vmor %vm1827_vm9, %vm2980_vm6  ;;  %vm3739_vm6 = vcmp.eq.s32.totalorder %v3611_v37, 1  ;;  %v2735_v16 = vperm.slane %v2610_v53, 0  ;;  %vm2238_vm0 = vcmp.ne.s32.totalorder %v2126_v35, 0  ;;  %v4120_v14 = vsel %vm10630_vm3, %v10249_v30, 0.0  ;;  %v10716_v30 = vpop.permute.xlu0 %1589 }
 0x508   :  { %vm3859_vm7 = vmand %vm1955_vm2, %vm10613_vm11  ;;  %v2606_v57 = vsel %vm2238_vm0, 1, %v11991_v52  ;;  %v3236_v17 = vsel %vm10648_vm10, 1, %v11991_v52  ;;  %v3614_v6 = vperm.slane %v3489_v3, 0  ;;  %v2133_v33 = vrot.slane %v12996_v48, 7 }
 0x509   :  { %vm3987_vm13 = vmor %vm1827_vm9, %vm3859_vm7  ;;  %vm1958_vm9 = vcmp.eq.f32.partialorder %v10512_v49, %v9691_v11  ;;  %vm13034_vm7 = vnez %v13033_v24  ;;  %v2389_v31 = vrot.slane %v12999_v46, 7  ;;  %vm1966_vm0 = vcmp.eq.f32.partialorder %v10500_v54, %v9691_v11  ;;  %v13053_v24 = vld [vmem:[#allocation34_spill] sm:$0xff] }
 0x50a   :  { %v4115_v47 = vsel %vm3987_vm13, %v10391_v2, 0.0  ;;  %vm10681_vm2 = vmand %vm1963_vm14, %vm10652_vm15  ;;  %v3380_v2 = vadd.s32 %v3376_v0, %v3241_v19  ;;  %vm2494_vm15 = vcmp.ne.s32.totalorder %v2382_v44, 0  ;;  %v13036_v29 = vsel %vm13034_vm7, %v13035_v26, 0.0  ;;  %v13055_v26 = vld [vmem:[#allocation31_spill] sm:$0xff] }
 0x50b   :  { %v4242_v23 = vadd.f32 %v4241_v8, %v4115_v47  ;;  %vm3867_vm11 = vmand %vm1963_vm14, %vm3739_vm6  ;;  %vm13037_vm14 = vcmp.gt.f32.partialorder %v10380_v58, %v9691_v11  ;;  %vm3734_vm13 = vcmp.eq.s32.totalorder %v3606_v50, 1  ;;  %v3485_v5 = vsel %vm2494_vm15, 1, %v11991_v52  ;;  %v10728_v8 = vpop.permute.xlu2 %1533 }
 0x50c   :  { %vm10712_vm8 = vmor %vm13037_vm14, %vm10681_vm2  ;;  %vm10739_vm2 = vcmp.eq.s32.totalorder %v2735_v16, 1  ;;  %v2730_v53 = vperm.slane %v2606_v57, 0  ;;  %v3375_v50 = vadd.s32 %v3380_v2, %v3236_v17  ;;  %vm2245_vm15 = vcmp.ne.s32.totalorder %v2133_v33, 0 }
 0x50d   :  { %v4243_v1 = vadd.f32 %v4242_v23, %v13036_v29  ;;  %vm13040_vm3 = vmmov %vm13037_vm14  ;;  %vm2501_vm7 = vcmp.ne.s32.totalorder %v2389_v31, 0  ;;  %v2613_v35 = vsel %vm2245_vm15, 1, %v11991_v52  ;;  %v2128_v47 = vrot.slane %v12996_v48, 2 }
 0x50e   :  { %vm10721_vm10 = vmor %vm13040_vm3, %vm3867_vm11  ;;  %v3492_v19 = vsel %vm2501_vm7, 1, %v11991_v52  ;;  %vm10757_vm3 = vcmp.eq.s32.totalorder %v3614_v6, 1  ;;  %v2384_v23 = vrot.slane %v12999_v46, 2  ;;  %vm2858_vm15 = vcmp.eq.s32.totalorder %v2730_v53, 1 }
 0x50f   :  { %vm10735_vm6 = vmand %vm1958_vm9, %vm10692_vm5  ;;  %v4244_v0 = vadd.f32 %v4243_v1, %v4117_v40  ;;  %vm11785_vm5 = vcmp.gt.f32.partialorder %v10500_v54, %v9691_v11  ;;  %v3609_v40 = vperm.slane %v3485_v5, 0  ;;  %v2738_v2 = vperm.slane %v2613_v35, 0  ;;  %v10826_v53 = vpop.permute.xlu0 %1610 }
 0x510   :  { %vm3862_vm11 = vmand %vm1958_vm9, %vm3734_vm13  ;;  %vm1961_vm13 = vcmp.eq.f32.partialorder %v10618_v62, %v9691_v11  ;;  %vm2240_vm7 = vcmp.ne.s32.totalorder %v2128_v47, 0  ;;  %v3244_v60 = vsel %vm10712_vm8, 1, %v11991_v52  ;;  %v4123_v5 = vsel %vm10721_vm10, %v10380_v58, 0.0 }
 0x511   :  { %vm3990_vm14 = vmor %vm1830_vm1, %vm3862_vm11  ;;  %v3379_v17 = vadd.s32 %v3375_v50, %v3244_v60  ;;  %v2608_v6 = vsel %vm2240_vm7, 1, %v11991_v52  ;;  %v2135_v31 = vrot.slane %v8921_v34, 2  ;;  %vm10821_vm10 = vcmp.eq.s32.totalorder %v2738_v2, 1 }
 0x512   :  { %v4118_v55 = vsel %vm3990_vm14, %v10512_v49, 0.0  ;;  %vm2991_vm9 = vmand %vm1966_vm0, %vm10739_vm2  ;;  %v3617_v49 = vperm.slane %v3492_v19, 0  ;;  %vm13054_vm14 = vnez %v13053_v24  ;;  %v2391_v38 = vrot.slane %v8924_v21, 2  ;;  %v13070_v24 = vld [vmem:[#allocation36_spill] sm:$0xff] }
 0x513   :  { %vm10774_vm11 = vmor %vm1830_vm1, %vm10735_vm6  ;;  %v4245_v3 = vadd.f32 %v4244_v0, %v4118_v55  ;;  %vm1833_vm1 = vcmp.gt.f32.partialorder %v10618_v62, %v9691_v11  ;;  %vm2496_vm6 = vcmp.ne.s32.totalorder %v2384_v23, 0  ;;  %v13056_v29 = vsel %vm13054_vm14, %v13055_v26, 0.0  ;;  %v10842_v35 = vpop.permute.xlu2 %1554  ;;  %v13072_v26 = vld [vmem:[#allocation35_spill] sm:$0xff] }
 0x514   :  { %vm10784_vm2 = vmor %vm11785_vm5, %vm2991_vm9  ;;  %vm3737_vm9 = vcmp.eq.s32.totalorder %v3609_v40, 1  ;;  %vm1969_vm5 = vcmp.eq.f32.partialorder %v10606_v61, %v9691_v11  ;;  %v3487_v33 = vsel %vm2496_vm6, 1, %v11991_v52  ;;  %v2733_v0 = vperm.slane %v2608_v6, 0 }
 0x515   :  { %v4246_v1 = vadd.f32 %v4245_v3, %v13056_v29  ;;  %vm10799_vm8 = vmand %vm1966_vm0, %vm10757_vm3  ;;  %v3239_v50 = vsel %vm10774_vm11, 1, %v11991_v52  ;;  %vm2247_vm6 = vcmp.ne.s32.totalorder %v2135_v31, 0  ;;  %vm13065_vm11 = vcmp.gt.f32.partialorder %v10500_v54, %v9691_v11 }
 0x516   :  { %vm2986_vm14 = vmand %vm1961_vm13, %vm2858_vm15  ;;  %vm10834_vm15 = vcmp.eq.s32.totalorder %v3617_v49, 1  ;;  %v3612_v47 = vperm.slane %v3487_v33, 0  ;;  %v2615_v55 = vsel %vm2247_vm6, 1, %v11991_v52  ;;  %v2131_v44 = vrot.slane %v12996_v48, 5 }
 0x517   :  { %vm10817_vm0 = vmor %vm1833_vm1, %vm2986_vm14  ;;  %v4247_v59 = vadd.f32 %v4246_v1, %v4120_v14  ;;  %v10838_v14 = vld [vmem:[#allocation11] sm:$0xff]  ;;  %v2387_v3 = vrot.slane %v12999_v46, 5  ;;  %v3383_v60 = vadd.s32 %v3379_v17, %v3239_v50  ;;  %v3247_v49 = vsel %vm10784_vm2, 1, %v11991_v52  ;;  %v10932_v40 = vpop.permute.xlu0 %1631 }
 0x518   :  { %vm3865_vm3 = vmand %vm1961_vm13, %vm3737_vm9  ;;  %vm1841_vm7 = vcmp.gt.f32.partialorder %v10606_v61, %v10838_v14  ;;  %vm2503_vm9 = vcmp.ne.s32.totalorder %v2391_v38, 0  ;;  %vm2243_vm6 = vcmp.ne.s32.totalorder %v2131_v44, 0  ;;  %v3242_v37 = vsel %vm10817_vm0, 1, %v11991_v52 }
 0x519   :  { %vm10849_vm14 = vmor %vm13065_vm11, %vm10799_vm8  ;;  %v3494_v16 = vsel %vm2503_vm9, 1, %v11991_v52  ;;  %vm2499_vm9 = vcmp.ne.s32.totalorder %v2387_v3, 0  ;;  %v2611_v46 = vsel %vm2243_vm6, 1, %v11991_v52  ;;  %vm13076_vm2 = vcmp.eq.f32.partialorder %v10728_v8, %v10838_v14 }
 0x51a   :  { %vm3993_vm13 = vmor %vm1833_vm1, %vm3865_vm3  ;;  %vm2861_vm3 = vcmp.eq.s32.totalorder %v2733_v0, 1  ;;  %v3620_v1 = vperm.slane %v3494_v16, 0  ;;  %v3490_v57 = vsel %vm2499_vm9, 1, %v11991_v52  ;;  %v2138_v6 = vrot.slane %v8921_v34, 5 }
 0x51b   :  { %v4121_v23 = vsel %vm3993_vm13, %v10618_v62, 0.0  ;;  %vm2994_vm8 = vmand %vm1969_vm5, %vm10821_vm10  ;;  %v2741_v62 = vperm.slane %v2615_v55, 0  ;;  %vm1836_vm13 = vcmp.gt.f32.partialorder %v10728_v8, %v10838_v14  ;;  %v2394_v58 = vrot.slane %v8924_v21, 5 }
 0x51c   :  { %v4248_v2 = vadd.f32 %v4247_v59, %v4121_v23  ;;  %vm10871_vm1 = vmor %vm1841_vm7, %vm2994_vm8  ;;  %vm13071_vm8 = vnez %v13070_v24  ;;  %v2736_v59 = vperm.slane %v2611_v46, 0  ;;  %v3378_v0 = vadd.s32 %v3383_v60, %v3247_v49  ;;  %v10941_v23 = vpop.permute.xlu2 %1575  ;;  %v13088_v46 = vld [vmem:[#allocation38_spill] sm:$0xff] }
 0x51d   :  { %vm3873_vm10 = vmand %vm1969_vm5, %vm10834_vm15  ;;  %v13073_v17 = vsel %vm13071_vm8, %v13072_v26, 0.0  ;;  %vm3740_vm5 = vcmp.eq.s32.totalorder %v3612_v47, 1  ;;  %vm10914_vm0 = vcmp.eq.s32.totalorder %v2741_v62, 1  ;;  %vm1844_vm9 = vcmp.gt.f32.partialorder %v10716_v30, %v10838_v14 }
 0x51e   :  { %v4249_v29 = vadd.f32 %v4248_v2, %v13073_v17  ;;  %vm10893_vm11 = vmor %vm1841_vm7, %vm3873_vm10  ;;  %vm2250_vm8 = vcmp.ne.s32.totalorder %v2138_v6, 0  ;;  %v3615_v38 = vperm.slane %v3490_v57, 0  ;;  %vm2506_vm6 = vcmp.ne.s32.totalorder %v2394_v58, 0 }
 0x51f   :  { %vm2989_vm15 = vmand %vm13076_vm2, %vm2861_vm3  ;;  %v2618_v50 = vsel %vm2250_vm8, 1, %v11991_v52  ;;  %v3382_v47 = vadd.s32 %v3378_v0, %v3242_v37  ;;  %v3497_v44 = vsel %vm2506_vm6, 1, %v11991_v52  ;;  %vm1967_vm8 = vcmp.eq.f32.partialorder %v10842_v35, %v10838_v14 }
 0x520   :  { %vm10910_vm7 = vmor %vm1836_vm13, %vm2989_vm15  ;;  %v4250_v31 = vadd.f32 %v4249_v29, %v4123_v5  ;;  %vm10927_vm15 = vcmp.eq.s32.totalorder %v3620_v1, 1  ;;  %v4126_v2 = vsel %vm10849_vm14, %v10500_v54, 0.0  ;;  %v3250_v62 = vsel %vm10871_vm1, 1, %v11991_v52  ;;  %v13090_v54 = vld [vmem:[#allocation37_spill] sm:$0xff] }
 0x521   :  { %vm13081_vm3 = vmmov %vm13076_vm2  ;;  %v3245_v60 = vsel %vm10910_vm7, 1, %v11991_v52  ;;  %vm3743_vm1 = vcmp.eq.s32.totalorder %v3615_v38, 1  ;;  %v3623_v24 = vperm.slane %v3497_v44, 0  ;;  %v3386_v26 = vadd.s32 %v3382_v47, %v3250_v62  ;;  %v11044_v44 = vpop.permute.xlu0 %1652 }
 0x522   :  { %vm3868_vm10 = vmand %vm13081_vm3, %vm3740_vm5  ;;  %vm13084_vm5 = vcmp.eq.f32.partialorder %v10716_v30, %v10838_v14  ;;  %v4129_v17 = vsel %vm10893_vm11, %v10606_v61, 0.0  ;;  %v2739_v29 = vperm.slane %v8921_v34, 0  ;;  %v2136_v61 = vrot.slane %v8921_v34, 3 }
 0x523   :  { %vm3996_vm2 = vmor %vm1836_vm13, %vm3868_vm10  ;;  %vm2864_vm10 = vcmp.eq.s32.totalorder %v2736_v59, 1  ;;  %v2392_v11 = vrot.slane %v8924_v21, 3  ;;  %v3381_v57 = vadd.s32 %v3386_v26, %v3245_v60  ;;  %v3618_v6 = vperm.slane %v8924_v21, 0 }
 0x524   :  { %v4124_v55 = vsel %vm3996_vm2, %v10728_v8, 0.0  ;;  %vm2997_vm3 = vmand %vm13084_vm5, %vm10914_vm0  ;;  %v2744_v8 = vperm.slane %v2618_v50, 0  ;;  %vm1839_vm2 = vcmp.gt.f32.partialorder %v10842_v35, %v10838_v14  ;;  %v2143_v33 = vrot.slane %v9361_v56, 3 }
 0x525   :  { %v4251_v16 = vadd.f32 %v4250_v31, %v4124_v55  ;;  %vm10946_vm13 = vmor %vm1844_vm9, %vm2997_vm3  ;;  %v2747_v59 = vperm.slane %v9361_v56, 0  ;;  %v2399_v38 = vrot.slane %v9364_v12, 3  ;;  %v3626_v55 = vperm.slane %v9364_v12, 0 }
 0x526   :  { %vm13087_vm6 = vmmov %vm13084_vm5  ;;  %vm13089_vm5 = vnez %v13088_v46  ;;  %vm2872_vm3 = vcmp.eq.s32.totalorder %v2744_v8, 1  ;;  %v3253_v31 = vsel %vm10946_vm13, 1, %v11991_v52  ;;  %vm11021_vm13 = vcmp.ne.s32.totalorder %v2136_v61, 0 }
 0x527   :  { %vm3876_vm0 = vmand %vm13087_vm6, %vm10927_vm15  ;;  %v13091_v19 = vsel %vm13089_vm5, %v13090_v54, 0.0  ;;  %vm1975_vm15 = vcmp.eq.f32.partialorder %v10826_v53, %v10838_v14  ;;  %v2616_v54 = vsel %vm11021_vm13, 1, %v11991_v52  ;;  %vm13114_vm13 = vcmp.gt.f32.partialorder %v10941_v23, %v10838_v14 }
 0x528   :  { %v4252_v49 = vadd.f32 %v4251_v16, %v13091_v19  ;;  %vm10975_vm14 = vmor %vm1844_vm9, %vm3876_vm0  ;;  %vm11010_vm0 = vcmp.eq.s32.totalorder %v3623_v24, 1  ;;  %v3385_v16 = vadd.s32 %v3381_v57, %v3253_v31  ;;  %v2139_v26 = vrot.slane %v8921_v34, 6 }
 0x529   :  { %vm2992_vm7 = vmand %vm1967_vm8, %vm2864_vm10  ;;  %vm1847_vm10 = vcmp.gt.f32.partialorder %v10826_v53, %v10838_v14  ;;  %v4132_v3 = vsel %vm10975_vm14, %v10716_v30, 0.0  ;;  %v2742_v1 = vperm.slane %v2616_v54, 0  ;;  %v2395_v61 = vrot.slane %v8924_v21, 6  ;;  %v13144_v21 = vld [vmem:[#allocation40_spill] sm:$0xff] }
 0x52a   :  { %vm10991_vm9 = vmor %vm1839_vm2, %vm2992_vm7  ;;  %v4253_v37 = vadd.f32 %v4252_v49, %v4126_v2  ;;  %vm11037_vm7 = vcmp.eq.s32.totalorder %v2739_v29, 1  ;;  %v11058_v2 = vpop.permute.xlu2 %1596  ;;  %v2397_v48 = vrot.slane %v9364_v12, 1  ;;  %v2400_v46 = vrot.slane %v9364_v12, 4 }
 0x52b   :  { %vm3871_vm11 = vmand %vm1967_vm8, %vm3743_vm1  ;;  %v3248_v62 = vsel %vm10991_vm9, 1, %v11991_v52  ;;  %vm13108_vm8 = vnez %v12670_v25  ;;  %vm11085_vm9 = vcmp.eq.s32.totalorder %v2747_v59, 1 }
 0x52c   :  { %vm3999_vm6 = vmor %vm1839_vm2, %vm3871_vm11  ;;  %vm11025_vm2 = vcmp.ne.s32.totalorder %v2392_v11, 0  ;;  %v13109_v30 = vsel %vm13108_vm8, %v8821_v63, 0.0  ;;  %vm2511_vm8 = vcmp.ne.s32.totalorder %v2399_v38, 0  ;;  %v3389_v29 = vadd.s32 %v3385_v16, %v3248_v62 }
 0x52d   :  { %v4127_v58 = vsel %vm3999_vm6, %v10842_v35, 0.0  ;;  %vm3000_vm5 = vmand %vm1975_vm15, %vm2872_vm3  ;;  %vm1970_vm3 = vcmp.eq.f32.partialorder %v10941_v23, %v10838_v14  ;;  %vm11054_vm6 = vcmp.eq.s32.totalorder %v3618_v6, 1  ;;  %v3495_v19 = vsel %vm11025_vm2, 1, %v11991_v52 }
 0x52e   :  { %v4254_v50 = vadd.f32 %v4253_v37, %v4127_v58  ;;  %vm11033_vm1 = vmor %vm1847_vm10, %vm3000_vm5  ;;  %vm2255_vm5 = vcmp.ne.s32.totalorder %v2143_v33, 0  ;;  %v3621_v37 = vperm.slane %v3495_v19, 0  ;;  %v3502_v34 = vsel %vm2511_vm8, 1, %v11991_v52 }
 0x52f   :  { %vm3879_vm11 = vmand %vm1975_vm15, %vm11010_vm0  ;;  %vm1978_vm0 = vcmp.eq.f32.partialorder %v10932_v40, %v10838_v14  ;;  %v2623_v24 = vsel %vm2255_vm5, 1, %v11991_v52  ;;  %v2146_v11 = vrot.slane %v9361_v56, 6  ;;  %v2402_v33 = vrot.slane %v9364_v12, 6 }
 0x530   :  { %v4255_v60 = vadd.f32 %v4254_v50, %v13109_v30  ;;  %vm11070_vm14 = vmor %vm1847_vm10, %vm3879_vm11  ;;  %vm1850_vm10 = vcmp.gt.f32.partialorder %v10932_v40, %v10838_v14  ;;  %v2750_v6 = vperm.slane %v2623_v24, 0  ;;  %vm11146_vm8 = vcmp.eq.s32.totalorder %v2742_v1, 1 }
 0x531   :  { %vm2995_vm15 = vmand %vm1970_vm3, %vm11037_vm7  ;;  %vm11100_vm7 = vcmp.eq.s32.totalorder %v3626_v55, 1  ;;  %v3629_v5 = vperm.slane %v3502_v34, 0  ;;  %v4135_v38 = vsel %vm11070_vm14, %v10826_v53, 0.0  ;;  %v11172_v53 = vpop.permute.xlu0 %1673  ;;  %v2141_v63 = vrot.slane %v9361_v56, 1 }
 0x532   :  { %vm11096_vm2 = vmor %vm13114_vm13, %vm2995_vm15  ;;  %v4256_v49 = vadd.f32 %v4255_v60, %v4129_v17  ;;  %v3256_v17 = vsel %vm11033_vm1, 1, %v11991_v52  ;;  %vm1845_vm1 = vcmp.gt.f32.partialorder %v11058_v2, %v10838_v14  ;;  %v11184_v62 = vpop.permute.xlu2 %1617  ;;  %v2148_v24 = vrot.slane %v9708_v18, 1 }
 0x533   :  { %vm3874_vm11 = vmand %vm1970_vm3, %vm11054_vm6  ;;  %v3251_v31 = vsel %vm11096_vm2, 1, %v11991_v52  ;;  %vm11136_vm6 = vcmp.ne.s32.totalorder %v2395_v61, 0  ;;  %v3384_v58 = vadd.s32 %v3389_v29, %v3256_v17  ;;  %vm1973_vm2 = vcmp.eq.f32.partialorder %v11058_v2, %v10838_v14 }
 0x534   :  { %vm13119_vm5 = vmmov %vm13114_vm13  ;;  %vm2251_vm13 = vcmp.ne.s32.totalorder %v2139_v26, 0  ;;  %v3498_v8 = vsel %vm11136_vm6, 1, %v11991_v52  ;;  %vm1981_vm6 = vcmp.eq.f32.partialorder %v11044_v44, %v10838_v14 }
 0x535   :  { %vm4002_vm15 = vmor %vm13119_vm5, %vm3874_vm11  ;;  %v2619_v59 = vsel %vm2251_vm13, 1, %v11991_v52  ;;  %vm13126_vm11 = vnez %v12699_v4  ;;  %vm11168_vm5 = vcmp.ne.s32.totalorder %v2146_v11, 0  ;;  %v3388_v4 = vadd.s32 %v3384_v58, %v3251_v31 }
 0x536   :  { %v4130_v57 = vsel %vm4002_vm15, %v10941_v23, 0.0  ;;  %vm11126_vm3 = vmand %vm1978_vm0, %vm11085_vm9  ;;  %v13127_v50 = vsel %vm13126_vm11, %v8968_v27, 0.0  ;;  %v2745_v16 = vperm.slane %v2619_v59, 0  ;;  %vm2514_vm15 = vcmp.ne.s32.totalorder %v2402_v33, 0 }
 0x537   :  { %v4257_v23 = vadd.f32 %v4256_v49, %v4130_v57  ;;  %vm3882_vm9 = vmand %vm1978_vm0, %vm11100_vm7  ;;  %vm11164_vm7 = vcmp.eq.s32.totalorder %v3621_v37, 1  ;;  %v2626_v19 = vsel %vm11168_vm5, 1, %v11991_v52  ;;  %v3624_v25 = vperm.slane %v3498_v8, 0 }
 0x538   :  { %vm3131_vm0 = vmor %vm1850_vm10, %vm11126_vm3  ;;  %vm11786_vm3 = vcmp.gt.f32.partialorder %v11044_v44, %v10838_v14  ;;  %v3505_v49 = vsel %vm2514_vm15, 1, %v11991_v52  ;;  %v2753_v61 = vperm.slane %v2626_v19, 0  ;;  %vm2509_vm15 = vcmp.ne.s32.totalorder %v2397_v48, 0 }
 0x539   :  { %v4258_v35 = vadd.f32 %v4257_v23, %v13127_v50  ;;  %vm11177_vm14 = vmor %vm1850_vm10, %vm3882_vm9  ;;  %vm11195_vm10 = vcmp.eq.s32.totalorder %v2750_v6, 1  ;;  %v3259_v54 = vsel %vm3131_vm0, 1, %v11991_v52  ;;  %vm11229_vm0 = vcmp.eq.s32.totalorder %v2745_v16, 1  ;;  %v13146_v6 = vld [vmem:[#allocation39_spill] sm:$0xff]  ;;  %v11290_v55 = vpop.permute.xlu0 %1694 }
 0x53a   :  { %vm11191_vm13 = vmand %vm1973_vm2, %vm11146_vm8  ;;  %vm11209_vm8 = vcmp.eq.s32.totalorder %v3629_v5, 1  ;;  %v3392_v26 = vadd.s32 %v3388_v4, %v3259_v54  ;;  %v2404_v11 = vrot.slane %v9753_v9, 1  ;;  %v4138_v59 = vsel %vm11177_vm14, %v10932_v40, 0.0  ;;  %v11270_v5 = vpop.permute.xlu2 %1638 }
 0x53b   :  { %v4259_v60 = vadd.f32 %v4258_v35, %v4132_v3  ;;  %vm3877_vm9 = vmand %vm1973_vm2, %vm11164_vm7  ;;  %vm2253_vm7 = vcmp.ne.s32.totalorder %v2141_v63, 0  ;;  %v3500_v0 = vsel %vm2509_vm15, 1, %v11991_v52  ;;  %v2144_v8 = vrot.slane %v9361_v56, 4 }
 0x53c   :  { %vm4005_vm11 = vmor %vm1845_vm1, %vm3877_vm9  ;;  %v2621_v17 = vsel %vm2253_vm7, 1, %v11991_v52  ;;  %vm13145_vm9 = vnez %v13144_v21  ;;  %v2151_v54 = vrot.slane %v9708_v18, 4  ;;  %v2407_v63 = vrot.slane %v9753_v9, 4 }
 0x53d   :  { %vm3126_vm2 = vmor %vm1845_vm1, %vm11191_vm13  ;;  %v4133_v29 = vsel %vm4005_vm11, %v11058_v2, 0.0  ;;  %vm1976_vm1 = vcmp.eq.f32.partialorder %v11184_v62, %v10838_v14  ;;  %v3632_v2 = vperm.slane %v3505_v49, 0  ;;  %vm11241_vm13 = vcmp.ne.s32.totalorder %v2148_v24, 0 }
 0x53e   :  { %v4260_v37 = vadd.f32 %v4259_v60, %v4133_v29  ;;  %vm3006_vm5 = vmand %vm1981_vm6, %vm11195_vm10  ;;  %v3254_v57 = vsel %vm3126_vm2, 1, %v11991_v52  ;;  %v13147_v33 = vsel %vm13145_vm9, %v13146_v6, 0.0  ;;  %vm11251_vm10 = vcmp.eq.s32.totalorder %v3624_v25, 1 }
 0x53f   :  { %v2748_v22 = vperm.slane %v2621_v17, 0  ;;  %vm11261_vm11 = vmor %vm11786_vm3, %vm3006_vm5  ;;  %vm1848_vm2 = vcmp.gt.f32.partialorder %v11184_v62, %v10838_v14  ;;  %vm11281_vm5 = vcmp.eq.s32.totalorder %v2753_v61, 1  ;;  %vm11787_vm9 = vcmp.eq.f32.partialorder %v11172_v53, %v10838_v14 }
 0x540   :  { %v4261_v31 = vadd.f32 %v4260_v37, %v13147_v33  ;;  %vm11277_vm14 = vmand %vm1976_vm1, %vm11229_vm0  ;;  %v2628_v47 = vsel %vm11241_vm13, 1, %v11991_v52  ;;  %v3387_v4 = vadd.s32 %v3392_v26, %v3254_v57  ;;  %vm11306_vm3 = vcmp.eq.s32.totalorder %v3632_v2, 1 }
 0x541   :  { %vm11297_vm0 = vmand %vm1981_vm6, %vm11209_vm8  ;;  %vm11310_vm13 = vcmp.ne.s32.totalorder %v2404_v11, 0  ;;  %vm11318_vm8 = vcmp.eq.s32.totalorder %v2748_v22, 1  ;;  %v3627_v60 = vperm.slane %v3500_v0, 0  ;;  %v2756_v19 = vperm.slane %v2628_v47, 0  ;;  %v11408_v22 = vpop.permute.xlu0 %1715 }
 0x542   :  { %v4262_v50 = vadd.f32 %v4261_v31, %v4135_v38  ;;  %vm3880_vm15 = vmand %vm1976_vm1, %vm11251_vm10  ;;  %vm2256_vm10 = vcmp.ne.s32.totalorder %v2144_v8, 0  ;;  %vm2512_vm7 = vcmp.ne.s32.totalorder %v2400_v46, 0  ;;  %v13171_v29 = vsel %vm9424_vm12, %v9247_v45, 0.0  ;;  %v11387_v34 = vpop.permute.xlu2 %1659 }
 0x543   :  { %vm4008_vm6 = vmor %vm1848_vm2, %vm3880_vm15  ;;  %v2624_v48 = vsel %vm2256_vm10, 1, %v11991_v52  ;;  %v3503_v61 = vsel %vm2512_vm7, 1, %v11991_v52  ;;  %v2147_v17 = vrot.slane %v9361_v56, 7  ;;  %v3262_v51 = vsel %vm11261_vm11, 1, %v11991_v52 }
 0x544   :  { %v4136_v3 = vsel %vm4008_vm6, %v11184_v62, 0.0  ;;  %vm3009_vm1 = vmand %vm11787_vm9, %vm11281_vm5  ;;  %vm13166_vm5 = vcmp.gt.f32.partialorder %v11172_v53, %v10838_v14  ;;  %v3507_v62 = vsel %vm11310_vm13, 1, %v11991_v52  ;;  %vm11357_vm6 = vcmp.ne.s32.totalorder %v2151_v54, 0 }
 0x545   :  { %vm11336_vm15 = vmor %vm1848_vm2, %vm11277_vm14  ;;  %v4263_v49 = vadd.f32 %v4262_v50, %v4136_v3  ;;  %vm1851_vm2 = vcmp.gt.f32.partialorder %v11270_v5, %v10838_v14  ;;  %vm1987_vm14 = vcmp.eq.f32.partialorder %v11290_v55, %v10838_v14  ;;  %vm3755_vm13 = vcmp.eq.s32.totalorder %v3627_v60, 1 }
 0x546   :  { %vm11346_vm9 = vmor %vm13166_vm5, %vm3009_vm1  ;;  %vm13172_vm1 = vcmp.eq.f32.partialorder %v11172_v53, %v10838_v14  ;;  %v3257_v45 = vsel %vm11336_vm15, 1, %v11991_v52  ;;  %vm13175_vm12 = vcmp.eq.f32.partialorder %v11270_v5, %v10838_v14  ;;  %v2751_v2 = vperm.slane %v2624_v48, 0 }
 0x547   :  { %v4264_v1 = vadd.f32 %v4263_v49, %v13171_v29  ;;  %vm11370_vm10 = vmand %vm13172_vm1, %vm11306_vm3  ;;  %vm2519_vm7 = vcmp.ne.s32.totalorder %v2407_v63, 0  ;;  %v3391_v11 = vadd.s32 %v3387_v4, %v3262_v51  ;;  %vm2884_vm11 = vcmp.eq.s32.totalorder %v2756_v19, 1 }
 0x548   :  { %vm3004_vm3 = vmand %vm13175_vm12, %vm11318_vm8  ;;  %v2631_v21 = vsel %vm11357_vm6, 1, %v11991_v52  ;;  %v3635_v6 = vperm.slane %v3507_v62, 0  ;;  %vm11788_vm1 = vcmp.gt.f32.partialorder %v11290_v55, %v10838_v14  ;;  %v3630_v33 = vperm.slane %v3503_v61, 0 }
 0x549   :  { %vm11392_vm5 = vmor %vm1851_vm2, %vm3004_vm3  ;;  %v4265_v57 = vadd.f32 %v4264_v1, %v4138_v59  ;;  %v3395_v31 = vadd.s32 %v3391_v11, %v3257_v45  ;;  %v3510_v23 = vsel %vm2519_vm7, 1, %v11991_v52  ;;  %vm2259_vm3 = vcmp.ne.s32.totalorder %v2147_v17, 0 }
 0x54a   :  { %vm13178_vm8 = vmmov %vm13175_vm12  ;;  %v2403_v59 = vrot.slane %v9364_v12, 7  ;;  %v2759_v50 = vperm.slane %v2631_v21, 0  ;;  %v2154_v35 = vrot.slane %v9708_v18, 7  ;;  %v2627_v4 = vsel %vm2259_vm3, 1, %v11991_v52  ;;  %v1681_v49 = vpop.permute.xlu2 %1680  ;;  %v11550_v21 = vpop.permute.xlu0 %1736 }
 0x54b   :  { %vm3883_vm15 = vmand %vm13178_vm8, %vm3755_vm13  ;;  %vm11419_vm13 = vcmp.eq.s32.totalorder %v2751_v2, 1  ;;  %v3265_v38 = vsel %vm11346_vm9, 1, %v11991_v52  ;;  %vm1854_vm3 = vcmp.gt.f32.partialorder %v11387_v34, %v10838_v14  ;;  %v3638_v8 = vperm.slane %v3510_v23, 0 }
 0x54c   :  { %vm4011_vm12 = vmor %vm1851_vm2, %vm3883_vm15  ;;  %vm13183_vm2 = vcmp.gt.f32.partialorder %v11044_v44, %v10838_v14  ;;  %vm11435_vm8 = vcmp.ne.s32.totalorder %v2403_v59, 0  ;;  %v3260_v30 = vsel %vm11392_vm5, 1, %v11991_v52  ;;  %vm13193_vm9 = vnez %v12805_v7 }
 0x54d   :  { %v4139_v58 = vsel %vm4011_vm12, %v11270_v5, 0.0  ;;  %vm11415_vm6 = vmand %vm1987_vm14, %vm2884_vm11  ;;  %vm1982_vm11 = vcmp.eq.f32.partialorder %v11387_v34, %v10838_v14  ;;  %vm11452_vm12 = vcmp.eq.s32.totalorder %v3630_v33, 1  ;;  %v13194_v60 = vsel %vm13193_vm9, %v9394_v32, 0.0 }
 0x54e   :  { %vm11429_vm7 = vmor %vm13183_vm2, %vm11297_vm0  ;;  %v4266_v5 = vadd.f32 %v4265_v57, %v4139_v58  ;;  %vm13188_vm0 = vcmp.gt.f32.partialorder %v11172_v53, %v10838_v14  ;;  %vm11474_vm2 = vcmp.ne.s32.totalorder %v2154_v35, 0  ;;  %v2149_v19 = vrot.slane %v9708_v18, 2 }
 0x54f   :  { %vm11448_vm15 = vmor %vm13188_vm0, %vm11370_vm10  ;;  %v4141_v32 = vsel %vm11429_vm7, %v11044_v44, 0.0  ;;  %v3390_v7 = vadd.s32 %v3395_v31, %v3265_v38  ;;  %v2754_v63 = vperm.slane %v2627_v4, 0  ;;  %v3506_v25 = vsel %vm11435_vm8, 1, %v11991_v52 }
 0x550   :  { %v4267_v46 = vadd.f32 %v4266_v5, %v13194_v60  ;;  %vm11470_vm10 = vmor %vm11788_vm1, %vm11415_vm6  ;;  %vm11490_vm6 = vcmp.eq.s32.totalorder %v3635_v6, 1  ;;  %vm2887_vm0 = vcmp.eq.s32.totalorder %v2759_v50, 1  ;;  %vm11508_vm9 = vcmp.eq.s32.totalorder %v3638_v8, 1 }
 0x551   :  { %vm3007_vm5 = vmand %vm1982_vm11, %vm11419_vm13  ;;  %vm1990_vm13 = vcmp.eq.f32.partialorder %v11408_v22, %v10838_v14  ;;  %v3394_v62 = vadd.s32 %v3390_v7, %v3260_v30  ;;  %v2634_v29 = vsel %vm11474_vm2, 1, %v11991_v52  ;;  %v3268_v1 = vsel %vm11470_vm10, 1, %v11991_v52 }
 0x552   :  { %vm11497_vm7 = vmor %vm1854_vm3, %vm3007_vm5  ;;  %v4268_v24 = vadd.f32 %v4267_v46, %v4141_v32  ;;  %vm11789_vm5 = vcmp.gt.f32.partialorder %v11408_v22, %v10838_v14  ;;  %v3633_v37 = vperm.slane %v3506_v25, 0  ;;  %v2405_v17 = vrot.slane %v9753_v9, 2  ;;  %v1702_v50 = vpop.permute.xlu2 %1701 }
 0x553   :  { %vm3886_vm8 = vmand %vm1982_vm11, %vm11452_vm12  ;;  %vm11523_vm11 = vcmp.ne.s32.totalorder %v2149_v19, 0  ;;  %vm11532_vm2 = vcmp.eq.s32.totalorder %v2754_v63, 1  ;;  %vm1985_vm10 = vcmp.eq.f32.partialorder %v1681_v49, %v10838_v14  ;;  %v2152_v2 = vrot.slane %v9708_v18, 5 }
 0x554   :  { %vm4014_vm1 = vmor %vm1854_vm3, %vm3886_vm8  ;;  %v2762_v57 = vperm.slane %v2634_v29, 0  ;;  %v3398_v6 = vadd.s32 %v3394_v62, %v3268_v1  ;;  %v2629_v33 = vsel %vm11523_vm11, 1, %v11991_v52  ;;  %v2408_v31 = vrot.slane %v9753_v9, 5 }
 0x555   :  { %v4142_v51 = vsel %vm4014_vm1, %v11387_v34, 0.0  ;;  %vm3015_vm12 = vmand %vm1990_vm13, %vm2887_vm0  ;;  %v3263_v34 = vsel %vm11497_vm7, 1, %v11991_v52  ;;  %vm2517_vm1 = vcmp.ne.s32.totalorder %v2405_v17, 0  ;;  %vm3761_vm8 = vcmp.eq.s32.totalorder %v3633_v37, 1 }
 0x556   :  { %vm11543_vm3 = vmand %vm1987_vm14, %vm11490_vm6  ;;  %v4269_v56 = vadd.f32 %v4268_v24, %v4142_v51  ;;  %vm1857_vm14 = vcmp.gt.f32.partialorder %v1681_v49, %v10838_v14  ;;  %vm13213_vm6 = vnez %v12836_v36  ;;  %v2410_v0 = vrot.slane %v9753_v9, 7 }
 0x557   :  { %vm11555_vm0 = vmor %vm11789_vm5, %vm3015_vm12  ;;  %v13214_v23 = vsel %vm13213_vm6, %v9587_v39, 0.0  ;;  %vm2264_vm11 = vcmp.ne.s32.totalorder %v2152_v2, 0  ;;  %v4144_v36 = vsel %vm11448_vm15, %v11172_v53, 0.0  ;;  %v3393_v40 = vadd.s32 %v3398_v6, %v3263_v34 }
 0x558   :  { %v4270_v59 = vadd.f32 %v4269_v56, %v13214_v23  ;;  %vm11573_vm7 = vmand %vm1990_vm13, %vm11508_vm9  ;;  %vm1993_vm13 = vcmp.eq.f32.partialorder %v11550_v21, %v10838_v14  ;;  %v3508_v39 = vsel %vm2517_vm1, 1, %v11991_v52  ;;  %vm2890_vm6 = vcmp.eq.s32.totalorder %v2762_v57, 1 }
 0x559   :  { %vm3010_vm12 = vmand %vm1985_vm10, %vm11532_vm2  ;;  %v2757_v35 = vperm.slane %v2629_v33, 0  ;;  %vm2520_vm5 = vcmp.ne.s32.totalorder %v2408_v31, 0  ;;  %v2632_v53 = vsel %vm2264_vm11, 1, %v11991_v52  ;;  %v3271_v12 = vsel %vm11555_vm0, 1, %v11991_v52 }
 0x55a   :  { %vm3138_vm9 = vmor %vm1857_vm14, %vm3010_vm12  ;;  %v4271_v9 = vadd.f32 %v4270_v59, %v4144_v36  ;;  %vm2522_vm1 = vcmp.ne.s32.totalorder %v2410_v0, 0  ;;  %vm11790_vm12 = vcmp.gt.f32.partialorder %v11550_v21, %v10838_v14  ;;  %v3636_v5 = vperm.slane %v3508_v39, 0  ;;  %v1723_v7 = vpop.permute.xlu2 %1722 }
 0x55b   :  { %vm3889_vm15 = vmand %vm1985_vm10, %vm3761_vm8  ;;  %v3397_v47 = vadd.s32 %v3393_v40, %v3271_v12  ;;  %v3266_v4 = vsel %vm3138_vm9, 1, %v11991_v52  ;;  %v3511_v27 = vsel %vm2520_vm5, 1, %v11991_v52  ;;  %vm13217_vm0 = vcmp.gt.f32.partialorder %v11290_v55, %v10838_v14 }
 0x55c   :  { %vm4017_vm2 = vmor %vm1857_vm14, %vm3889_vm15  ;;  %vm2885_vm8 = vcmp.eq.s32.totalorder %v2757_v35, 1  ;;  %vm1988_vm11 = vcmp.eq.f32.partialorder %v1702_v50, %v10838_v14  ;;  %v2760_v30 = vperm.slane %v2632_v53, 0  ;;  %vm13220_vm9 = vcmp.gt.f32.partialorder %v11408_v22, %v10838_v14 }
 0x55d   :  { %v4145_v38 = vsel %vm4017_vm2, %v1681_v49, 0.0  ;;  %vm3018_vm10 = vmand %vm1993_vm13, %vm2890_vm6  ;;  %v3513_v46 = vsel %vm2522_vm1, 1, %v11991_v52  ;;  %v3400_v54 = vadd.s32 %v3397_v47, %v3266_v4  ;;  %vm3764_vm2 = vcmp.eq.s32.totalorder %v3636_v5, 1 }
 0x55e   :  { %vm11610_vm14 = vmor %vm13217_vm0, %vm11543_vm3  ;;  %v4272_v8 = vadd.f32 %v4271_v9, %v4145_v38  ;;  %vm1860_vm3 = vcmp.gt.f32.partialorder %v1702_v50, %v10838_v14  ;;  %v3639_v19 = vperm.slane %v3511_v27, 0  ;;  %v3641_v63 = vperm.slane %v3513_v46, 0 }
 0x55f   :  { %vm11620_vm5 = vmor %vm13220_vm9, %vm11573_vm7  ;;  %v4147_v32 = vsel %vm11610_vm14, %v11290_v55, 0.0  ;;  %vm2888_vm0 = vcmp.eq.s32.totalorder %v2760_v30, 1  ;;  %vm1991_vm9 = vcmp.eq.f32.partialorder %v1723_v7, %v10838_v14  ;;  %vm1863_vm14 = vcmp.gt.f32.partialorder %v1723_v7, %v10838_v14 }
 0x560   :  { %v4273_v3 = vadd.f32 %v4272_v8, %v4146_v10  ;;  %vm3146_vm15 = vmor %vm11790_vm12, %vm3018_vm10  ;;  %vm3767_vm6 = vcmp.eq.s32.totalorder %v3639_v19, 1  ;;  %vm3769_vm12 = vcmp.eq.s32.totalorder %v3641_v63, 1  ;;  %v4150_v29 = vsel %vm11620_vm5, %v11408_v22, 0.0  ;;  %v4343_v63 = vld [vmem:[#allocation9] sm:$0xff] }
 0x561   :  { %vm3013_vm7 = vmand %vm1988_vm11, %vm2885_vm8  ;;  %v3274_v43 = vsel %vm3146_vm15, 1, %v11991_v52  ;;  %v4152_v17 = vsel %vm10163_vm4, %v10047_v13, 0.0 }
 0x562   :  { %vm3141_vm1 = vmor %vm1860_vm3, %vm3013_vm7  ;;  %v4274_v20 = vadd.f32 %v4273_v3, %v4147_v32  ;;  %v3396_v55 = vadd.s32 %v3400_v54, %v3274_v43 }
 0x563   :  { %v3269_v10 = vsel %vm3141_vm1, 1, %v11991_v52  ;;  %vm3892_vm10 = vmand %vm1988_vm11, %vm3764_vm2  ;;  %vm13224_vm2 = vnez %v12889_v28 }
 0x564   :  { %vm4020_vm8 = vmor %vm1860_vm3, %vm3892_vm10  ;;  %v3399_v49 = vadd.s32 %v3396_v55, %v3269_v10  ;;  %v13225_v24 = vsel %vm13224_vm2, %v9908_v41, 0.0 }
 0x565   :  { %v4148_v25 = vsel %vm4020_vm8, %v1702_v50, 0.0  ;;  %vm3016_vm7 = vmand %vm1991_vm9, %vm2888_vm0  ;;  %vm13226_vm0 = vcmp.gt.f32.partialorder %v11550_v21, %v10838_v14 }
 0x566   :  { %v4275_v48 = vadd.f32 %v4274_v20, %v4148_v25  ;;  %vm3144_vm15 = vmor %vm1863_vm14, %vm3016_vm7 }
 0x567   :  { %v3272_v44 = vsel %vm3144_vm15, 1, %v11991_v52  ;;  %vm3895_vm11 = vmand %vm1991_vm9, %vm3767_vm6 }
 0x568   :  { %v4276_v62 = vadd.f32 %v4275_v48, %v13225_v24  ;;  %v3401_v26 = vadd.s32 %v3399_v49, %v3272_v44  ;;  %vm4023_vm3 = vmor %vm1863_vm14, %vm3895_vm11 }
 0x569   :  { %vm3897_vm1 = vmand %vm1993_vm13, %vm3769_vm12  ;;  %v4151_v1 = vsel %vm4023_vm3, %v1723_v7, 0.0  ;;  %vm13227_vm12 = vcmp.lt.s32.totalorder %v4970_v42, 16 }
 0x56a   :  { %v4277_v37 = vadd.f32 %v4276_v62, %v4150_v29  ;;  %v4282_v61 = vadd.s32 1, %v3401_v26  ;;  %vm4025_vm9 = vmor %vm13226_vm0, %vm3897_vm1 }
 0x56b   :  { %v4153_v45 = vsel %vm4025_vm9, %v11550_v21, 0.0  ;;  %vm13228_vm6 = vmmov %vm13227_vm12 }
 0x56c   :  { %v4278_v28 = vadd.f32 %v4277_v37, %v4151_v1  ;;  %v4655_v41 = vadd.s32 4294967291, %v4282_v61 }
 0x56e   :  { %v4279_v51 = vadd.f32 %v4278_v28, %v4152_v17  ;;  %vm4284_vm10 = vcmp.gt.s32.totalorder %v4655_v41, 0  ;;  %v4656_v22 = vcvt.s32.f32 %v4655_v41 }
 0x570   :  { %v4280_v2 = vadd.f32 %v4279_v51, %v4153_v45  ;;  %v4657_v11 = vsel %vm4284_vm10, %v4656_v22, 0.0 }
 0x571   :  { %v4287_v34 = vmul.f32 0.01, %v4657_v11 }
 0x573   :  { %v4288_v56 = vadd.f32 %v4287_v34, %v4280_v2 }
 0x575   :  { %vm4289_vm13 = vcmp.le.f32.partialorder %v4288_v56, 0.97995156 }
 0x576   :  { %vm4290_vm5 = vmand %vm13227_vm12, %vm4289_vm13 }
 0x577   :  { %v4291_v57 = vsel %vm4290_vm5, 1, %v11991_v52 }
 0x578   :  { %v4293_v6 = vshrl.u32 %v4291_v57, 16  ;;  %v4292_v18 = vand.u32 65535, %v4291_v57 }
 0x57a   :  { %v4295_v33 = vcvt.s32.f32 %v4293_v6  ;;  %v4294_v15 = vcvt.s32.f32 %v4292_v18 }
 0x57c   :  { %4298 = vadd.xlane.f32.xlu2 %v4295_v33  ;;  %4296 = vadd.xlane.f32.xlu1 %v4294_v15 }
 0x5ef   :  { %v4299_v13 = vpop.xlane.xlu2 %4298  ;;  %v4297_v31 = vpop.xlane.xlu1 %4296 }
 0x5f0   :  { %v4301_v23 = vcvt.f32.s32 %v4299_v13  ;;  %v4300_v59 = vcvt.f32.s32 %v4297_v31 }
 0x5f2   :  { %v4302_v21 = vshll.u32 %v4301_v23, 16 }
 0x5f4   :  { %v4303_v58 = vadd.s32 %v4302_v21, %v4300_v59 }
 0x5f6   :  { %v4304_v0 = vadd.s32 1, %v4303_v58 }
 0x5f8   :  { %vm4305_vm4 = vcmp.lt.s32.totalorder %v4304_v0, 16 }
 0x5f9   :  { %v4306_v36 = vsel %vm4305_vm4, %v4304_v0, 16 }
 0x5fa   :  { %v4658_v40 = vadd.s32 4294967295, %v4306_v36 }
 0x5fc   :  { %vm4308_vm14 = vcmp.gt.s32.totalorder %v4658_v40, 0 }
 0x5fd   :  { %v4309_v39 = vsel %vm4308_vm14, %v4658_v40, 0 }
 0x5fe   :  { %vm4310_vm8 = vcmp.eq.s32.totalorder %v3401_v26, %v4309_v39 }
 0x5ff   :  { %vm4311_vm7 = vmand %vm4310_vm8, %vm13228_vm6 }
 0x600   :  { %v4315_v50 = vsel %vm4311_vm7, %v4280_v2, 0.0  ;;  %v4312_v9 = vsel %vm4311_vm7, %v10838_v14, 0.0  ;;  %v4318_v14 = vadd.s32 1, %v4309_v39 }
 0x601   :  { %4316 = vadd.xlane.f32.xlu2 %v4315_v50  ;;  %4313 = vadd.xlane.f32.xlu0 %v4312_v9 }
 0x602   :  { %v4659_v53 = vadd.s32 4294967291, %v4318_v14 }
 0x604   :  { %v4660_v47 = vcvt.s32.f32 %v4659_v53  ;;  %vm4320_vm15 = vcmp.gt.s32.totalorder %v4659_v53, 0 }
 0x606   :  { %v4661_v16 = vsel %vm4320_vm15, %v4660_v47, 0.0 }
 0x607   :  { %v4323_v54 = vmul.f32 0.01, %v4661_v16 }
 0x674   :  { %v4314_v42 = vpop.xlane.xlu0 %4313  ;;  %v4317_v12 = vpop.xlane.xlu2 %4316 }
 0x675   :  { %v4324_v35 = vmax.f32 %v4314_v42, 1e-30  ;;  %v4339_v38 = vsub.f32 %v4317_v12, %v4314_v42 }
 0x677   :  { %4744 = vrcp.f32 %v4324_v35  ;;  %v4336_v8 = vand.u32 2147483648, %v4324_v35  ;;  %v4334_v60 = vand.u32 2147483647, %v4324_v35  ;;  %v4340_v46 = vsub.f32 0.97995156, %v4339_v38 }
 0x678   :  { %vm4330_vm2 = vweird.f32 %v4324_v35 }
 0x679   :  { %v4337_v19 = vor.u32 1.1754944e-38, %v4336_v8  ;;  %vm4335_vm1 = vcmp.eq.f32.partialorder %v4334_v60, 8.507059e+37  ;;  %v4341_v7 = vsub.f32 %v4340_v46, %v4323_v54 }
 0x67d   :  { %v4745_v5 = vpop.eup %4744 }
 0x67e   :  { %v4326_v4 = vmul.f32 %v4745_v5, %v4324_v35  ;;  %vm4331_vm11 = vweird.f32 %v4745_v5 }
 0x67f   :  { %vm4332_vm3 = vmor %vm4330_vm2, %vm4331_vm11 }
 0x680   :  { %v4327_v27 = vsub.f32 1.0, %v4326_v4 }
 0x682   :  { %v4328_v30 = vmul.f32 %v4745_v5, %v4327_v27 }
 0x684   :  { %v4329_v3 = vadd.f32 %v4745_v5, %v4328_v30 }
 0x686   :  { %v4333_v32 = vsel %vm4332_vm3, %v4745_v5, %v4329_v3 }
 0x687   :  { %v4338_v20 = vsel %vm4335_vm1, %v4337_v19, %v4333_v32 }
 0x688   :  { %v4342_v43 = vmul.f32 %v4341_v7, %v4338_v20 }
 0x68a   :  { %vm4344_vm0 = vcmp.ge.f32.partialorder %v4343_v63, %v4342_v43 }
 0x68b   :  { %v4345_v10 = vsel %vm4344_vm0, 1, %v11991_v52 }
 0x68c   :  { %v4346_v55 = vsub.s32 %v4306_v36, %v4345_v10 }
 0x68e   :  { %vm4347_vm9 = vcmp.gt.s32.totalorder %v4346_v55, 1 }
 0x68f   :  { %v4348_v25 = vsel %vm4347_vm9, %v4346_v55, 1 }
 0x690   :  { %4349 = vst [vmem:[#allocation13] sm:$0xff] %v4348_v25 }
 0x691   :  { %4382 = dma.vmem_to_hbm [thread:$0]  %s4378_s5, 128, %s4380_s24, [#allocation12]  }
 0x692   :  { %4910 = dma.done.wait [#allocation6], 128  }
 0x693   :  { %4911 = vsyncadd [#allocation6], 4294967168 }
 0x694   :  { %4912 = dma.done.wait [#allocation12], 256  }
 0x695   :  { %4913 = vsyncadd [#allocation12], 4294967040 }
 0x696   :  { %4395 = vsyncpa [#allocation5], 1 }
 0x697   :  { %4396 = vsyncpa [#allocation8], 1 }
 0x698   :  { %4397 = vsyncpa [#allocation6], 1 }
 0x699   :  { %4398 = vsyncpa [#allocation12], 1 }

</bundles_post_ra>
